<compile_context>
chip_gen: v5e
topology: v5e:2x2
jax: 0.10.0
libtpu: 0.0.40
codegen_flags: <defaults>
</compile_context>

<pallas_src>
import functools

import jax
import jax.numpy as jnp
from jax.experimental import pallas as pl
from jax.experimental.pallas import tpu as pltpu

# ----------------------------- tiny T5 config -------------------------------
VOCAB = 128
D_MODEL = 32
D_KV = 8
N_HEADS = 4
HKV = N_HEADS * D_KV          # 32
D_FF = 64
N_LAYERS = 2
REL_BUCKETS = 8
REL_MAX_DIST = 16
EPS = 1e-6
NEG = -1e9
GELU_C = 0.7978845608028654   # sqrt(2/pi)


# ----------------------- in-kernel helper functions -------------------------
def _rmsnorm(x, w):
    # T5LayerNorm: no mean subtraction, no bias.
    var = jnp.mean(x * x, axis=-1, keepdims=True)
    return x * jax.lax.rsqrt(var + EPS) * w


# --------------------------- the single fused kernel -------------------------
def _t5_kernel(xy_ref, bias_ref, wqkv_ref, wo_ref, wi_ref, wff_ref,
               ln_ref, lm_ref, logits_ref, *, seq):
    f32 = jnp.float32
    L = N_LAYERS

    x = xy_ref[0, 0]                       # (T, D)   encoder embeddings
    y = xy_ref[0, 1]                       # (T, D)   decoder embeddings

    bias_all = bias_ref[0]                 # (3H, T, T)
    enc_bias = bias_all[0:N_HEADS]
    dec_bias = bias_all[N_HEADS:2 * N_HEADS]
    cross_bias = bias_all[2 * N_HEADS:3 * N_HEADS]

    def ln(idx):
        return ln_ref[idx]                 # (1, D)

    def attn(h_q, h_kv, qi, ki, vi, oi, bias):
        # Batched over heads: one set of head-batched matmuls, no per-head
        # lane slicing, no K transpose, no scratch stores.
        wq = wqkv_ref[qi]                  # (H, D, D_KV)
        wk = wqkv_ref[ki]
        wv = wqkv_ref[vi]
        wo = wo_ref[oi]                    # (H, D_KV, D)
        hq = jnp.broadcast_to(h_q[None], (N_HEADS, seq, D_MODEL))
        hk = jnp.broadcast_to(h_kv[None], (N_HEADS, seq, D_MODEL))
        q = jnp.einsum("htd,hdk->htk", hq, wq, preferred_element_type=f32)
        k = jnp.einsum("htd,hdk->htk", hk, wk, preferred_element_type=f32)
        v = jnp.einsum("htd,hdk->htk", hk, wv, preferred_element_type=f32)
        # T5 attention: no 1/sqrt(d) scaling.
        s = jnp.einsum("hqd,hkd->hqk", q, k, preferred_element_type=f32) + bias
        m = jnp.max(s, axis=-1, keepdims=True)
        p = jnp.exp(s - m)
        p = p / jnp.sum(p, axis=-1, keepdims=True)      # exact division
        ctx = jnp.einsum("hqk,hkd->hqd", p, v, preferred_element_type=f32)
        # Per-head output projection then reduce over heads (== concat @ Wo).
        o = jnp.einsum("hqd,hdo->hqo", ctx, wo, preferred_element_type=f32)
        return jnp.sum(o, axis=0)          # (T, D)

    def gated_ffn(h, idx):
        wi = wi_ref[idx]                   # (D, 2*D_FF)  fused [wi0 | wi1]
        wo = wff_ref[idx]                  # (D_FF, D)
        gl = jnp.dot(h, wi, preferred_element_type=f32)     # (T, 128) lane dense
        g = gl[:, :D_FF]
        lin = gl[:, D_FF:]
        gelu = 0.5 * g * (1.0 + jnp.tanh(GELU_C * (g + 0.044715 * g * g * g)))
        return jnp.dot(gelu * lin, wo, preferred_element_type=f32)

    # --------------------------------- encoder ---------------------------------
    for l in range(L):
        h = _rmsnorm(x, ln(l))
        x = x + attn(h, h, 3 * l, 3 * l + 1, 3 * l + 2, l, enc_bias)
        h = _rmsnorm(x, ln(L + l))
        x = x + gated_ffn(h, l)
    enc_out = _rmsnorm(x, ln(2 * L))

    # --------------------------------- decoder ---------------------------------
    for l in range(L):
        # self-attention (causal + relative bias)
        h = _rmsnorm(y, ln(2 * L + 1 + l))
        y = y + attn(h, h, 3 * L + 3 * l, 3 * L + 3 * l + 1, 3 * L + 3 * l + 2,
                     L + l, dec_bias)
        # cross-attention (encoder padding mask only)
        h = _rmsnorm(y, ln(3 * L + 1 + l))
        y = y + attn(h, enc_out, 6 * L + l, 7 * L + 2 * l, 7 * L + 2 * l + 1,
                     2 * L + l, cross_bias)
        # gated-GELU FFN
        h = _rmsnorm(y, ln(4 * L + 1 + l))
        y = y + gated_ffn(h, L + l)
    y = _rmsnorm(y, ln(5 * L + 1))

    # flan-t5: lm_head is NOT tied -> no 1/sqrt(d) scaling.  (T, 128) lane-dense store.
    logits_ref[0] = jnp.dot(y, lm_ref[...], preferred_element_type=f32)


# ------------------------- parameter initialization -------------------------
def init_params(key):
    keys = iter(jax.random.split(key, 256))

    def w(shape, scale=0.02):
        return (scale * jax.random.normal(next(keys), shape)).astype(jnp.float32)

    def attn():
        return dict(q=w((D_MODEL, HKV)), k=w((D_MODEL, HKV)),
                    v=w((D_MODEL, HKV)), o=w((HKV, D_MODEL)))

    def ff():
        return dict(wi0=w((D_MODEL, D_FF)), wi1=w((D_MODEL, D_FF)),
                    wo=w((D_FF, D_MODEL)))

    def enc_block():
        return dict(ln_self=jnp.ones((1, D_MODEL), jnp.float32), self_attn=attn(),
                    ln_ff=jnp.ones((1, D_MODEL), jnp.float32), ff=ff())

    def dec_block():
        return dict(ln_self=jnp.ones((1, D_MODEL), jnp.float32), self_attn=attn(),
                    ln_cross=jnp.ones((1, D_MODEL), jnp.float32), cross_attn=attn(),
                    ln_ff=jnp.ones((1, D_MODEL), jnp.float32), ff=ff())

    return dict(
        embed=w((VOCAB, D_MODEL)),
        enc_rel_bias=w((REL_BUCKETS, N_HEADS)),
        dec_rel_bias=w((REL_BUCKETS, N_HEADS)),
        encoder=[enc_block() for _ in range(N_LAYERS)],
        decoder=[dec_block() for _ in range(N_LAYERS)],
        enc_final_ln=jnp.ones((1, D_MODEL), jnp.float32),
        dec_final_ln=jnp.ones((1, D_MODEL), jnp.float32),
        lm_head=w((D_MODEL, VOCAB)),
    )


def pack_params(params):
    """Host-side packing into a few stacked, per-head-laid-out weight slabs."""
    enc, dec = params["encoder"], params["decoder"]

    def head_in(wm):    # (D, H*D_KV) -> (H, D, D_KV)
        return wm.reshape(D_MODEL, N_HEADS, D_KV).transpose(1, 0, 2)

    def head_out(wm):   # (H*D_KV, D) -> (H, D_KV, D)
        return wm.reshape(N_HEADS, D_KV, D_MODEL)

    qkv = []
    for b in enc:
        a = b["self_attn"]
        qkv += [head_in(a["q"]), head_in(a["k"]), head_in(a["v"])]
    for b in dec:
        a = b["self_attn"]
        qkv += [head_in(a["q"]), head_in(a["k"]), head_in(a["v"])]
    for b in dec:
        qkv.append(head_in(b["cross_attn"]["q"]))
    for b in dec:
        a = b["cross_attn"]
        qkv += [head_in(a["k"]), head_in(a["v"])]

    wo = ([head_out(b["self_attn"]["o"]) for b in enc]
          + [head_out(b["self_attn"]["o"]) for b in dec]
          + [head_out(b["cross_attn"]["o"]) for b in dec])

    wi = ([jnp.concatenate([b["ff"]["wi0"], b["ff"]["wi1"]], axis=1) for b in enc]
          + [jnp.concatenate([b["ff"]["wi0"], b["ff"]["wi1"]], axis=1) for b in dec])

    wff = [b["ff"]["wo"] for b in enc] + [b["ff"]["wo"] for b in dec]

    ln = ([b["ln_self"] for b in enc] + [b["ln_ff"] for b in enc]
          + [params["enc_final_ln"]]
          + [b["ln_self"] for b in dec] + [b["ln_cross"] for b in dec]
          + [b["ln_ff"] for b in dec] + [params["dec_final_ln"]])

    return dict(
        embed=params["embed"],
        enc_rel_bias=params["enc_rel_bias"],
        dec_rel_bias=params["dec_rel_bias"],
        w_qkv=jnp.stack(qkv),        # (9L, H, D, D_KV)
        w_o=jnp.stack(wo),           # (3L, H, D_KV, D)
        w_wi=jnp.stack(wi),          # (2L, D, 2*D_FF)
        w_ff=jnp.stack(wff),         # (2L, D_FF, D)
        w_ln=jnp.stack(ln),          # (5L+2, 1, D)
        lm_head=params["lm_head"],   # (D, VOCAB)
    )


# --------------------------- T5 relative pos bias ---------------------------
def relative_position_bucket(relative_position, bidirectional, num_buckets, max_distance):
    relative_buckets = jnp.zeros_like(relative_position)
    if bidirectional:
        num_buckets //= 2
        relative_buckets = relative_buckets + (relative_position > 0).astype(jnp.int32) * num_buckets
        relative_position = jnp.abs(relative_position)
    else:
        relative_position = -jnp.minimum(relative_position, 0)
    max_exact = num_buckets // 2
    is_small = relative_position < max_exact
    rp = jnp.maximum(relative_position, 1).astype(jnp.float32)
    rel_if_large = max_exact + (
        jnp.log(rp / max_exact) / jnp.log(max_distance / max_exact) * (num_buckets - max_exact)
    ).astype(jnp.int32)
    rel_if_large = jnp.minimum(rel_if_large, num_buckets - 1)
    return relative_buckets + jnp.where(is_small, relative_position, rel_if_large)


def compute_position_bias(rel_table, tq, tk, bidirectional):
    ctx = jnp.arange(tq)[:, None]
    mem = jnp.arange(tk)[None, :]
    buckets = relative_position_bucket(mem - ctx, bidirectional, REL_BUCKETS, REL_MAX_DIST)
    bias = rel_table[buckets]                     # (tq, tk, H)
    return jnp.transpose(bias, (2, 0, 1))[None]   # (1, H, tq, tk)


def shift_right(ids):
    # T5 decoder_start_token_id == pad_token_id == 0
    return jnp.concatenate([jnp.zeros((ids.shape[0], 1), ids.dtype), ids[:, :-1]], axis=1)


# --------------------------------- forward ----------------------------------
@jax.jit
def verification_model_forward(packed, input_ids, attention_mask):
    """Returns .logits of the T5ForConditionalGeneration forward (eval mode)."""
    B, T = input_ids.shape
    amask = attention_mask.astype(jnp.float32)
    enc_mask = (1.0 - amask)[:, None, None, :] * NEG                      # (B,1,1,T)

    # embeddings (plain JAX gather)
    x = packed["embed"][input_ids]                                        # (B,T,D)
    # TODO(synk): HF T5 errors without decoder_input_ids/labels; we feed the
    # shifted-right input_ids (decoder_start_token_id = 0) as decoder input.
    y = packed["embed"][shift_right(input_ids)]                           # (B,T,D)
    xy = jnp.stack([x, y], axis=1)                                        # (B,2,T,D)

    # additive attention biases, pre-assembled in the batched layout
    enc_pos = compute_position_bias(packed["enc_rel_bias"], T, T, True)   # (1,H,T,T)
    dec_pos = compute_position_bias(packed["dec_rel_bias"], T, T, False)
    causal = jnp.tril(jnp.ones((T, T), jnp.float32))
    self_mask = (1.0 - causal)[None, None] * NEG
    enc_bias = jnp.broadcast_to(enc_pos + enc_mask, (B, N_HEADS, T, T))
    dec_bias = jnp.broadcast_to(dec_pos + self_mask, (B, N_HEADS, T, T))
    cross_bias = jnp.broadcast_to(enc_mask, (B, N_HEADS, T, T))           # no rel bias
    bias = jnp.concatenate([enc_bias, dec_bias, cross_bias], axis=1)      # (B,3H,T,T)

    kernel = functools.partial(_t5_kernel, seq=T)
    logits = pl.pallas_call(
        kernel,
        out_shape=jax.ShapeDtypeStruct((B, T, VOCAB), jnp.float32),
        grid=(B,),
        in_specs=[
            pl.BlockSpec((1, 2, T, D_MODEL), lambda b: (b, 0, 0, 0)),
            pl.BlockSpec((1, 3 * N_HEADS, T, T), lambda b: (b, 0, 0, 0)),
            pl.BlockSpec(packed["w_qkv"].shape, lambda b: (0, 0, 0, 0)),
            pl.BlockSpec(packed["w_o"].shape, lambda b: (0, 0, 0, 0)),
            pl.BlockSpec(packed["w_wi"].shape, lambda b: (0, 0, 0)),
            pl.BlockSpec(packed["w_ff"].shape, lambda b: (0, 0, 0)),
            pl.BlockSpec(packed["w_ln"].shape, lambda b: (0, 0, 0)),
            pl.BlockSpec(packed["lm_head"].shape, lambda b: (0, 0)),
        ],
        out_specs=pl.BlockSpec((1, T, VOCAB), lambda b: (b, 0, 0)),
        compiler_params=pltpu.CompilerParams(
            dimension_semantics=("parallel",),          # v7x: batch across TCs
            vmem_limit_bytes=32 * 1024 * 1024,
        ),
    )(xy, bias, packed["w_qkv"], packed["w_o"], packed["w_wi"],
      packed["w_ff"], packed["w_ln"], packed["lm_head"])
    return logits


# ----------------------------------- main ------------------------------------
if __name__ == "__main__":
    key = jax.random.PRNGKey(0)
    k_param, k_ids = jax.random.split(key)
    params = init_params(k_param)
    packed = pack_params(params)

    B, T = 2, 8
    input_ids = jax.random.randint(k_ids, (B, T), 0, VOCAB, dtype=jnp.int32)
    attention_mask = jnp.ones((B, T), jnp.int32).at[1, -2:].set(0)  # exercise masking

    logits = verification_model_forward(packed, input_ids, attention_mask)
    logits = jax.block_until_ready(logits)
    assert logits.shape == (B, T, VOCAB) and logits.dtype == jnp.float32
    assert bool(jnp.all(jnp.isfinite(logits)))
    print("KERNEL_OK")
</pallas_src>

<mosaic_0001>
module attributes {stable_mosaic.version = 11 : i64} {
  func.func @_t5_kernel(%arg0: i32, %arg1: memref<1x2x8x32xf32, #tpu.memory_space<vmem>>, %arg2: memref<1x12x8x8xf32, #tpu.memory_space<vmem>>, %arg3: memref<18x4x32x8xf32, #tpu.memory_space<vmem>>, %arg4: memref<6x4x8x32xf32, #tpu.memory_space<vmem>>, %arg5: memref<4x32x128xf32, #tpu.memory_space<vmem>>, %arg6: memref<4x64x32xf32, #tpu.memory_space<vmem>>, %arg7: memref<12x1x32xf32, #tpu.memory_space<vmem>>, %arg8: memref<32x128xf32, #tpu.memory_space<vmem>>, %arg9: memref<1x8x128xf32, #tpu.memory_space<vmem>>) attributes {dimension_semantics = [#tpu.dimension_semantics<parallel>], iteration_bounds = array<i64: 2>, scalar_prefetch = 0 : i64, scratch_operands = 0 : i64, tpu.core_type = #tpu.core_type<tc>, window_params = [{transform_indices = @transform_0, window_bounds = array<i64: 1, 2, 8, 32>}, {transform_indices = @transform_1, window_bounds = array<i64: 1, 12, 8, 8>}, {pipeline_mode = #tpu.pipeline_mode<synchronous>, transform_indices = @transform_2, window_bounds = array<i64: 18, 4, 32, 8>}, {pipeline_mode = #tpu.pipeline_mode<synchronous>, transform_indices = @transform_3, window_bounds = array<i64: 6, 4, 8, 32>}, {pipeline_mode = #tpu.pipeline_mode<synchronous>, transform_indices = @transform_4, window_bounds = array<i64: 4, 32, 128>}, {pipeline_mode = #tpu.pipeline_mode<synchronous>, transform_indices = @transform_5, window_bounds = array<i64: 4, 64, 32>}, {pipeline_mode = #tpu.pipeline_mode<synchronous>, transform_indices = @transform_6, window_bounds = array<i64: 12, 1, 32>}, {pipeline_mode = #tpu.pipeline_mode<synchronous>, transform_indices = @transform_7, window_bounds = array<i64: 32, 128>}, {transform_indices = @transform_8, window_bounds = array<i64: 1, 8, 128>}]} {
    %c0 = arith.constant 0 : index
    %c0_0 = arith.constant 0 : index
    %c0_1 = arith.constant 0 : index
    %c0_2 = arith.constant 0 : index
    %0 = vector.load %arg1[%c0, %c0_0, %c0_1, %c0_2] : memref<1x2x8x32xf32, #tpu.memory_space<vmem>>, vector<1x1x8x32xf32>
    %1 = vector.shape_cast %0 : vector<1x1x8x32xf32> to vector<8x32xf32>
    %c0_3 = arith.constant 0 : index
    %c1 = arith.constant 1 : index
    %c0_4 = arith.constant 0 : index
    %c0_5 = arith.constant 0 : index
    %2 = vector.load %arg1[%c0_3, %c1, %c0_4, %c0_5] : memref<1x2x8x32xf32, #tpu.memory_space<vmem>>, vector<1x1x8x32xf32>
    %3 = vector.shape_cast %2 : vector<1x1x8x32xf32> to vector<8x32xf32>
    %c0_6 = arith.constant 0 : index
    %c0_7 = arith.constant 0 : index
    %c0_8 = arith.constant 0 : index
    %c0_9 = arith.constant 0 : index
    %4 = vector.load %arg2[%c0_6, %c0_7, %c0_8, %c0_9] : memref<1x12x8x8xf32, #tpu.memory_space<vmem>>, vector<1x12x8x8xf32>
    %5 = vector.shape_cast %4 : vector<1x12x8x8xf32> to vector<12x8x8xf32>
    %6 = vector.extract_strided_slice %5 {offsets = [0, 0, 0], sizes = [4, 8, 8], strides = [1, 1, 1]} : vector<12x8x8xf32> to vector<4x8x8xf32>
    %7 = vector.extract_strided_slice %5 {offsets = [4, 0, 0], sizes = [4, 8, 8], strides = [1, 1, 1]} : vector<12x8x8xf32> to vector<4x8x8xf32>
    %8 = vector.extract_strided_slice %5 {offsets = [8, 0, 0], sizes = [4, 8, 8], strides = [1, 1, 1]} : vector<12x8x8xf32> to vector<4x8x8xf32>
    %c0_10 = arith.constant 0 : index
    %c0_11 = arith.constant 0 : index
    %c0_12 = arith.constant 0 : index
    %9 = vector.load %arg7[%c0_10, %c0_11, %c0_12] : memref<12x1x32xf32, #tpu.memory_space<vmem>>, vector<1x1x32xf32>
    %10 = vector.shape_cast %9 : vector<1x1x32xf32> to vector<1x32xf32>
    %11 = arith.mulf %1, %1 : vector<8x32xf32>
    %cst = arith.constant dense<0.000000e+00> : vector<8xf32>
    %12 = vector.multi_reduction <add>, %11, %cst [1] : vector<8x32xf32> to vector<8xf32>
    %13 = vector.shape_cast %12 : vector<8xf32> to vector<8x1xf32>
    %cst_13 = arith.constant 3.200000e+01 : f32
    %14 = vector.broadcast %cst_13 : f32 to vector<8x1xf32>
    %15 = arith.divf %13, %14 : vector<8x1xf32>
    %cst_14 = arith.constant 9.99999997E-7 : f32
    %16 = vector.broadcast %cst_14 : f32 to vector<8x1xf32>
    %17 = arith.addf %15, %16 : vector<8x1xf32>
    %18 = math.rsqrt %17 : vector<8x1xf32>
    %19 = vector.broadcast %18 : vector<8x1xf32> to vector<8x32xf32>
    %20 = arith.mulf %1, %19 : vector<8x32xf32>
    %21 = vector.broadcast %10 : vector<1x32xf32> to vector<8x32xf32>
    %22 = arith.mulf %20, %21 : vector<8x32xf32>
    %c0_15 = arith.constant 0 : index
    %c0_16 = arith.constant 0 : index
    %c0_17 = arith.constant 0 : index
    %c0_18 = arith.constant 0 : index
    %23 = vector.load %arg3[%c0_15, %c0_16, %c0_17, %c0_18] : memref<18x4x32x8xf32, #tpu.memory_space<vmem>>, vector<1x4x32x8xf32>
    %24 = vector.shape_cast %23 : vector<1x4x32x8xf32> to vector<4x32x8xf32>
    %c1_19 = arith.constant 1 : index
    %c0_20 = arith.constant 0 : index
    %c0_21 = arith.constant 0 : index
    %c0_22 = arith.constant 0 : index
    %25 = vector.load %arg3[%c1_19, %c0_20, %c0_21, %c0_22] : memref<18x4x32x8xf32, #tpu.memory_space<vmem>>, vector<1x4x32x8xf32>
    %26 = vector.shape_cast %25 : vector<1x4x32x8xf32> to vector<4x32x8xf32>
    %c2 = arith.constant 2 : index
    %c0_23 = arith.constant 0 : index
    %c0_24 = arith.constant 0 : index
    %c0_25 = arith.constant 0 : index
    %27 = vector.load %arg3[%c2, %c0_23, %c0_24, %c0_25] : memref<18x4x32x8xf32, #tpu.memory_space<vmem>>, vector<1x4x32x8xf32>
    %28 = vector.shape_cast %27 : vector<1x4x32x8xf32> to vector<4x32x8xf32>
    %c0_26 = arith.constant 0 : index
    %c0_27 = arith.constant 0 : index
    %c0_28 = arith.constant 0 : index
    %c0_29 = arith.constant 0 : index
    %29 = vector.load %arg4[%c0_26, %c0_27, %c0_28, %c0_29] : memref<6x4x8x32xf32, #tpu.memory_space<vmem>>, vector<1x4x8x32xf32>
    %30 = vector.shape_cast %29 : vector<1x4x8x32xf32> to vector<4x8x32xf32>
    %31 = vector.shape_cast %22 : vector<8x32xf32> to vector<1x8x32xf32>
    %32 = vector.shape_cast %31 : vector<1x8x32xf32> to vector<1x8x32xf32>
    %33 = vector.broadcast %32 : vector<1x8x32xf32> to vector<4x8x32xf32>
    %34 = vector.shape_cast %22 : vector<8x32xf32> to vector<1x8x32xf32>
    %35 = vector.shape_cast %34 : vector<1x8x32xf32> to vector<1x8x32xf32>
    %36 = vector.broadcast %35 : vector<1x8x32xf32> to vector<4x8x32xf32>
    "tpu.trace_start"() <{level = 10 : i32, message = "htd,hdk->htk"}> : () -> ()
    %cst_30 = arith.constant dense<0.000000e+00> : vector<4x8x8xf32>
    %37 = tpu.matmul %33, %24, %cst_30 {dimension_numbers = #tpu.dot_dimension_numbers<[2], [1], [1], [2], [0, 0, 0, 1, 1, 2], [0], [0]>} : vector<4x8x32xf32>, vector<4x32x8xf32>, vector<4x8x8xf32> -> vector<4x8x8xf32>
    %cst_31 = arith.constant dense<0.000000e+00> : vector<4x8x8xf32>
    %38 = tpu.matmul %36, %26, %cst_31 {dimension_numbers = #tpu.dot_dimension_numbers<[2], [1], [1], [2], [0, 0, 0, 1, 1, 2], [0], [0]>} : vector<4x8x32xf32>, vector<4x32x8xf32>, vector<4x8x8xf32> -> vector<4x8x8xf32>
    %cst_32 = arith.constant dense<0.000000e+00> : vector<4x8x8xf32>
    %39 = tpu.matmul %36, %28, %cst_32 {dimension_numbers = #tpu.dot_dimension_numbers<[2], [1], [1], [2], [0, 0, 0, 1, 1, 2], [0], [0]>} : vector<4x8x32xf32>, vector<4x32x8xf32>, vector<4x8x8xf32> -> vector<4x8x8xf32>
    "tpu.trace_stop"() : () -> ()
    "tpu.trace_start"() <{level = 10 : i32, message = "hqd,hkd->hqk"}> : () -> ()
    %cst_33 = arith.constant dense<0.000000e+00> : vector<4x8x8xf32>
    %40 = tpu.matmul %37, %38, %cst_33 {dimension_numbers = #tpu.dot_dimension_numbers<[2], [2], [1], [1], [0, 0, 0, 1, 1, 1], [0], [0]>} : vector<4x8x8xf32>, vector<4x8x8xf32>, vector<4x8x8xf32> -> vector<4x8x8xf32>
    "tpu.trace_stop"() : () -> ()
    %41 = arith.addf %40, %6 : vector<4x8x8xf32>
    %cst_34 = arith.constant dense<0xFF800000> : vector<4x8xf32>
    %42 = vector.multi_reduction <maximumf>, %41, %cst_34 [2] : vector<4x8x8xf32> to vector<4x8xf32>
    %43 = vector.shape_cast %42 : vector<4x8xf32> to vector<4x8x1xf32>
    %44 = vector.broadcast %43 : vector<4x8x1xf32> to vector<4x8x8xf32>
    %45 = arith.subf %41, %44 : vector<4x8x8xf32>
    %46 = math.exp %45 : vector<4x8x8xf32>
    %cst_35 = arith.constant dense<0.000000e+00> : vector<4x8xf32>
    %47 = vector.multi_reduction <add>, %46, %cst_35 [2] : vector<4x8x8xf32> to vector<4x8xf32>
    %48 = vector.shape_cast %47 : vector<4x8xf32> to vector<4x8x1xf32>
    %49 = vector.broadcast %48 : vector<4x8x1xf32> to vector<4x8x8xf32>
    %50 = arith.divf %46, %49 : vector<4x8x8xf32>
    "tpu.trace_start"() <{level = 10 : i32, message = "hqk,hkd->hqd"}> : () -> ()
    %cst_36 = arith.constant dense<0.000000e+00> : vector<4x8x8xf32>
    %51 = tpu.matmul %50, %39, %cst_36 {dimension_numbers = #tpu.dot_dimension_numbers<[2], [1], [1], [2], [0, 0, 0, 1, 1, 2], [0], [0]>} : vector<4x8x8xf32>, vector<4x8x8xf32>, vector<4x8x8xf32> -> vector<4x8x8xf32>
    "tpu.trace_stop"() : () -> ()
    "tpu.trace_start"() <{level = 10 : i32, message = "hqd,hdo->hqo"}> : () -> ()
    %cst_37 = arith.constant dense<0.000000e+00> : vector<4x8x32xf32>
    %52 = tpu.matmul %51, %30, %cst_37 {dimension_numbers = #tpu.dot_dimension_numbers<[2], [1], [1], [2], [0, 0, 0, 1, 1, 2], [0], [0]>} : vector<4x8x8xf32>, vector<4x8x32xf32>, vector<4x8x32xf32> -> vector<4x8x32xf32>
    "tpu.trace_stop"() : () -> ()
    %cst_38 = arith.constant dense<0.000000e+00> : vector<8x32xf32>
    %53 = vector.multi_reduction <add>, %52, %cst_38 [0] : vector<4x8x32xf32> to vector<8x32xf32>
    %54 = arith.addf %1, %53 : vector<8x32xf32>
    %c2_39 = arith.constant 2 : index
    %c0_40 = arith.constant 0 : index
    %c0_41 = arith.constant 0 : index
    %55 = vector.load %arg7[%c2_39, %c0_40, %c0_41] : memref<12x1x32xf32, #tpu.memory_space<vmem>>, vector<1x1x32xf32>
    %56 = vector.shape_cast %55 : vector<1x1x32xf32> to vector<1x32xf32>
    %57 = arith.mulf %54, %54 : vector<8x32xf32>
    %cst_42 = arith.constant dense<0.000000e+00> : vector<8xf32>
    %58 = vector.multi_reduction <add>, %57, %cst_42 [1] : vector<8x32xf32> to vector<8xf32>
    %59 = vector.shape_cast %58 : vector<8xf32> to vector<8x1xf32>
    %cst_43 = arith.constant 3.200000e+01 : f32
    %60 = vector.broadcast %cst_43 : f32 to vector<8x1xf32>
    %61 = arith.divf %59, %60 : vector<8x1xf32>
    %cst_44 = arith.constant 9.99999997E-7 : f32
    %62 = vector.broadcast %cst_44 : f32 to vector<8x1xf32>
    %63 = arith.addf %61, %62 : vector<8x1xf32>
    %64 = math.rsqrt %63 : vector<8x1xf32>
    %65 = vector.broadcast %64 : vector<8x1xf32> to vector<8x32xf32>
    %66 = arith.mulf %54, %65 : vector<8x32xf32>
    %67 = vector.broadcast %56 : vector<1x32xf32> to vector<8x32xf32>
    %68 = arith.mulf %66, %67 : vector<8x32xf32>
    %c0_45 = arith.constant 0 : index
    %c0_46 = arith.constant 0 : index
    %c0_47 = arith.constant 0 : index
    %69 = vector.load %arg5[%c0_45, %c0_46, %c0_47] : memref<4x32x128xf32, #tpu.memory_space<vmem>>, vector<1x32x128xf32>
    %70 = vector.shape_cast %69 : vector<1x32x128xf32> to vector<32x128xf32>
    %c0_48 = arith.constant 0 : index
    %c0_49 = arith.constant 0 : index
    %c0_50 = arith.constant 0 : index
    %71 = vector.load %arg6[%c0_48, %c0_49, %c0_50] : memref<4x64x32xf32, #tpu.memory_space<vmem>>, vector<1x64x32xf32>
    %72 = vector.shape_cast %71 : vector<1x64x32xf32> to vector<64x32xf32>
    %cst_51 = arith.constant dense<0.000000e+00> : vector<8x128xf32>
    %73 = tpu.matmul %68, %70, %cst_51 {dimension_numbers = #tpu.dot_dimension_numbers<[1], [0], [0], [1], [0, 0, 1, 1], [], []>} : vector<8x32xf32>, vector<32x128xf32>, vector<8x128xf32> -> vector<8x128xf32>
    %74 = vector.extract_strided_slice %73 {offsets = [0, 0], sizes = [8, 64], strides = [1, 1]} : vector<8x128xf32> to vector<8x64xf32>
    %75 = vector.extract_strided_slice %73 {offsets = [0, 64], sizes = [8, 64], strides = [1, 1]} : vector<8x128xf32> to vector<8x64xf32>
    %cst_52 = arith.constant 5.000000e-01 : f32
    %76 = vector.broadcast %cst_52 : f32 to vector<8x64xf32>
    %77 = arith.mulf %76, %74 : vector<8x64xf32>
    %cst_53 = arith.constant 4.471500e-02 : f32
    %78 = vector.broadcast %cst_53 : f32 to vector<8x64xf32>
    %79 = arith.mulf %78, %74 : vector<8x64xf32>
    %80 = arith.mulf %79, %74 : vector<8x64xf32>
    %81 = arith.mulf %80, %74 : vector<8x64xf32>
    %82 = arith.addf %74, %81 : vector<8x64xf32>
    %cst_54 = arith.constant 0.797884583 : f32
    %83 = vector.broadcast %cst_54 : f32 to vector<8x64xf32>
    %84 = arith.mulf %83, %82 : vector<8x64xf32>
    %85 = math.tanh %84 : vector<8x64xf32>
    %cst_55 = arith.constant 1.000000e+00 : f32
    %86 = vector.broadcast %cst_55 : f32 to vector<8x64xf32>
    %87 = arith.addf %86, %85 : vector<8x64xf32>
    %88 = arith.mulf %77, %87 : vector<8x64xf32>
    %89 = arith.mulf %88, %75 : vector<8x64xf32>
    %cst_56 = arith.constant dense<0.000000e+00> : vector<8x32xf32>
    %90 = tpu.matmul %89, %72, %cst_56 {dimension_numbers = #tpu.dot_dimension_numbers<[1], [0], [0], [1], [0, 0, 1, 1], [], []>} : vector<8x64xf32>, vector<64x32xf32>, vector<8x32xf32> -> vector<8x32xf32>
    %91 = arith.addf %54, %90 : vector<8x32xf32>
    %c1_57 = arith.constant 1 : index
    %c0_58 = arith.constant 0 : index
    %c0_59 = arith.constant 0 : index
    %92 = vector.load %arg7[%c1_57, %c0_58, %c0_59] : memref<12x1x32xf32, #tpu.memory_space<vmem>>, vector<1x1x32xf32>
    %93 = vector.shape_cast %92 : vector<1x1x32xf32> to vector<1x32xf32>
    %94 = arith.mulf %91, %91 : vector<8x32xf32>
    %cst_60 = arith.constant dense<0.000000e+00> : vector<8xf32>
    %95 = vector.multi_reduction <add>, %94, %cst_60 [1] : vector<8x32xf32> to vector<8xf32>
    %96 = vector.shape_cast %95 : vector<8xf32> to vector<8x1xf32>
    %cst_61 = arith.constant 3.200000e+01 : f32
    %97 = vector.broadcast %cst_61 : f32 to vector<8x1xf32>
    %98 = arith.divf %96, %97 : vector<8x1xf32>
    %cst_62 = arith.constant 9.99999997E-7 : f32
    %99 = vector.broadcast %cst_62 : f32 to vector<8x1xf32>
    %100 = arith.addf %98, %99 : vector<8x1xf32>
    %101 = math.rsqrt %100 : vector<8x1xf32>
    %102 = vector.broadcast %101 : vector<8x1xf32> to vector<8x32xf32>
    %103 = arith.mulf %91, %102 : vector<8x32xf32>
    %104 = vector.broadcast %93 : vector<1x32xf32> to vector<8x32xf32>
    %105 = arith.mulf %103, %104 : vector<8x32xf32>
    %c3 = arith.constant 3 : index
    %c0_63 = arith.constant 0 : index
    %c0_64 = arith.constant 0 : index
    %c0_65 = arith.constant 0 : index
    %106 = vector.load %arg3[%c3, %c0_63, %c0_64, %c0_65] : memref<18x4x32x8xf32, #tpu.memory_space<vmem>>, vector<1x4x32x8xf32>
    %107 = vector.shape_cast %106 : vector<1x4x32x8xf32> to vector<4x32x8xf32>
    %c4 = arith.constant 4 : index
    %c0_66 = arith.constant 0 : index
    %c0_67 = arith.constant 0 : index
    %c0_68 = arith.constant 0 : index
    %108 = vector.load %arg3[%c4, %c0_66, %c0_67, %c0_68] : memref<18x4x32x8xf32, #tpu.memory_space<vmem>>, vector<1x4x32x8xf32>
    %109 = vector.shape_cast %108 : vector<1x4x32x8xf32> to vector<4x32x8xf32>
    %c5 = arith.constant 5 : index
    %c0_69 = arith.constant 0 : index
    %c0_70 = arith.constant 0 : index
    %c0_71 = arith.constant 0 : index
    %110 = vector.load %arg3[%c5, %c0_69, %c0_70, %c0_71] : memref<18x4x32x8xf32, #tpu.memory_space<vmem>>, vector<1x4x32x8xf32>
    %111 = vector.shape_cast %110 : vector<1x4x32x8xf32> to vector<4x32x8xf32>
    %c1_72 = arith.constant 1 : index
    %c0_73 = arith.constant 0 : index
    %c0_74 = arith.constant 0 : index
    %c0_75 = arith.constant 0 : index
    %112 = vector.load %arg4[%c1_72, %c0_73, %c0_74, %c0_75] : memref<6x4x8x32xf32, #tpu.memory_space<vmem>>, vector<1x4x8x32xf32>
    %113 = vector.shape_cast %112 : vector<1x4x8x32xf32> to vector<4x8x32xf32>
    %114 = vector.shape_cast %105 : vector<8x32xf32> to vector<1x8x32xf32>
    %115 = vector.shape_cast %114 : vector<1x8x32xf32> to vector<1x8x32xf32>
    %116 = vector.broadcast %115 : vector<1x8x32xf32> to vector<4x8x32xf32>
    %117 = vector.shape_cast %105 : vector<8x32xf32> to vector<1x8x32xf32>
    %118 = vector.shape_cast %117 : vector<1x8x32xf32> to vector<1x8x32xf32>
    %119 = vector.broadcast %118 : vector<1x8x32xf32> to vector<4x8x32xf32>
    "tpu.trace_start"() <{level = 10 : i32, message = "htd,hdk->htk"}> : () -> ()
    %cst_76 = arith.constant dense<0.000000e+00> : vector<4x8x8xf32>
    %120 = tpu.matmul %116, %107, %cst_76 {dimension_numbers = #tpu.dot_dimension_numbers<[2], [1], [1], [2], [0, 0, 0, 1, 1, 2], [0], [0]>} : vector<4x8x32xf32>, vector<4x32x8xf32>, vector<4x8x8xf32> -> vector<4x8x8xf32>
    %cst_77 = arith.constant dense<0.000000e+00> : vector<4x8x8xf32>
    %121 = tpu.matmul %119, %109, %cst_77 {dimension_numbers = #tpu.dot_dimension_numbers<[2], [1], [1], [2], [0, 0, 0, 1, 1, 2], [0], [0]>} : vector<4x8x32xf32>, vector<4x32x8xf32>, vector<4x8x8xf32> -> vector<4x8x8xf32>
    %cst_78 = arith.constant dense<0.000000e+00> : vector<4x8x8xf32>
    %122 = tpu.matmul %119, %111, %cst_78 {dimension_numbers = #tpu.dot_dimension_numbers<[2], [1], [1], [2], [0, 0, 0, 1, 1, 2], [0], [0]>} : vector<4x8x32xf32>, vector<4x32x8xf32>, vector<4x8x8xf32> -> vector<4x8x8xf32>
    "tpu.trace_stop"() : () -> ()
    "tpu.trace_start"() <{level = 10 : i32, message = "hqd,hkd->hqk"}> : () -> ()
    %cst_79 = arith.constant dense<0.000000e+00> : vector<4x8x8xf32>
    %123 = tpu.matmul %120, %121, %cst_79 {dimension_numbers = #tpu.dot_dimension_numbers<[2], [2], [1], [1], [0, 0, 0, 1, 1, 1], [0], [0]>} : vector<4x8x8xf32>, vector<4x8x8xf32>, vector<4x8x8xf32> -> vector<4x8x8xf32>
    "tpu.trace_stop"() : () -> ()
    %124 = arith.addf %123, %6 : vector<4x8x8xf32>
    %cst_80 = arith.constant dense<0xFF800000> : vector<4x8xf32>
    %125 = vector.multi_reduction <maximumf>, %124, %cst_80 [2] : vector<4x8x8xf32> to vector<4x8xf32>
    %126 = vector.shape_cast %125 : vector<4x8xf32> to vector<4x8x1xf32>
    %127 = vector.broadcast %126 : vector<4x8x1xf32> to vector<4x8x8xf32>
    %128 = arith.subf %124, %127 : vector<4x8x8xf32>
    %129 = math.exp %128 : vector<4x8x8xf32>
    %cst_81 = arith.constant dense<0.000000e+00> : vector<4x8xf32>
    %130 = vector.multi_reduction <add>, %129, %cst_81 [2] : vector<4x8x8xf32> to vector<4x8xf32>
    %131 = vector.shape_cast %130 : vector<4x8xf32> to vector<4x8x1xf32>
    %132 = vector.broadcast %131 : vector<4x8x1xf32> to vector<4x8x8xf32>
    %133 = arith.divf %129, %132 : vector<4x8x8xf32>
    "tpu.trace_start"() <{level = 10 : i32, message = "hqk,hkd->hqd"}> : () -> ()
    %cst_82 = arith.constant dense<0.000000e+00> : vector<4x8x8xf32>
    %134 = tpu.matmul %133, %122, %cst_82 {dimension_numbers = #tpu.dot_dimension_numbers<[2], [1], [1], [2], [0, 0, 0, 1, 1, 2], [0], [0]>} : vector<4x8x8xf32>, vector<4x8x8xf32>, vector<4x8x8xf32> -> vector<4x8x8xf32>
    "tpu.trace_stop"() : () -> ()
    "tpu.trace_start"() <{level = 10 : i32, message = "hqd,hdo->hqo"}> : () -> ()
    %cst_83 = arith.constant dense<0.000000e+00> : vector<4x8x32xf32>
    %135 = tpu.matmul %134, %113, %cst_83 {dimension_numbers = #tpu.dot_dimension_numbers<[2], [1], [1], [2], [0, 0, 0, 1, 1, 2], [0], [0]>} : vector<4x8x8xf32>, vector<4x8x32xf32>, vector<4x8x32xf32> -> vector<4x8x32xf32>
    "tpu.trace_stop"() : () -> ()
    %cst_84 = arith.constant dense<0.000000e+00> : vector<8x32xf32>
    %136 = vector.multi_reduction <add>, %135, %cst_84 [0] : vector<4x8x32xf32> to vector<8x32xf32>
    %137 = arith.addf %91, %136 : vector<8x32xf32>
    %c3_85 = arith.constant 3 : index
    %c0_86 = arith.constant 0 : index
    %c0_87 = arith.constant 0 : index
    %138 = vector.load %arg7[%c3_85, %c0_86, %c0_87] : memref<12x1x32xf32, #tpu.memory_space<vmem>>, vector<1x1x32xf32>
    %139 = vector.shape_cast %138 : vector<1x1x32xf32> to vector<1x32xf32>
    %140 = arith.mulf %137, %137 : vector<8x32xf32>
    %cst_88 = arith.constant dense<0.000000e+00> : vector<8xf32>
    %141 = vector.multi_reduction <add>, %140, %cst_88 [1] : vector<8x32xf32> to vector<8xf32>
    %142 = vector.shape_cast %141 : vector<8xf32> to vector<8x1xf32>
    %cst_89 = arith.constant 3.200000e+01 : f32
    %143 = vector.broadcast %cst_89 : f32 to vector<8x1xf32>
    %144 = arith.divf %142, %143 : vector<8x1xf32>
    %cst_90 = arith.constant 9.99999997E-7 : f32
    %145 = vector.broadcast %cst_90 : f32 to vector<8x1xf32>
    %146 = arith.addf %144, %145 : vector<8x1xf32>
    %147 = math.rsqrt %146 : vector<8x1xf32>
    %148 = vector.broadcast %147 : vector<8x1xf32> to vector<8x32xf32>
    %149 = arith.mulf %137, %148 : vector<8x32xf32>
    %150 = vector.broadcast %139 : vector<1x32xf32> to vector<8x32xf32>
    %151 = arith.mulf %149, %150 : vector<8x32xf32>
    %c1_91 = arith.constant 1 : index
    %c0_92 = arith.constant 0 : index
    %c0_93 = arith.constant 0 : index
    %152 = vector.load %arg5[%c1_91, %c0_92, %c0_93] : memref<4x32x128xf32, #tpu.memory_space<vmem>>, vector<1x32x128xf32>
    %153 = vector.shape_cast %152 : vector<1x32x128xf32> to vector<32x128xf32>
    %c1_94 = arith.constant 1 : index
    %c0_95 = arith.constant 0 : index
    %c0_96 = arith.constant 0 : index
    %154 = vector.load %arg6[%c1_94, %c0_95, %c0_96] : memref<4x64x32xf32, #tpu.memory_space<vmem>>, vector<1x64x32xf32>
    %155 = vector.shape_cast %154 : vector<1x64x32xf32> to vector<64x32xf32>
    %cst_97 = arith.constant dense<0.000000e+00> : vector<8x128xf32>
    %156 = tpu.matmul %151, %153, %cst_97 {dimension_numbers = #tpu.dot_dimension_numbers<[1], [0], [0], [1], [0, 0, 1, 1], [], []>} : vector<8x32xf32>, vector<32x128xf32>, vector<8x128xf32> -> vector<8x128xf32>
    %157 = vector.extract_strided_slice %156 {offsets = [0, 0], sizes = [8, 64], strides = [1, 1]} : vector<8x128xf32> to vector<8x64xf32>
    %158 = vector.extract_strided_slice %156 {offsets = [0, 64], sizes = [8, 64], strides = [1, 1]} : vector<8x128xf32> to vector<8x64xf32>
    %cst_98 = arith.constant 5.000000e-01 : f32
    %159 = vector.broadcast %cst_98 : f32 to vector<8x64xf32>
    %160 = arith.mulf %159, %157 : vector<8x64xf32>
    %cst_99 = arith.constant 4.471500e-02 : f32
    %161 = vector.broadcast %cst_99 : f32 to vector<8x64xf32>
    %162 = arith.mulf %161, %157 : vector<8x64xf32>
    %163 = arith.mulf %162, %157 : vector<8x64xf32>
    %164 = arith.mulf %163, %157 : vector<8x64xf32>
    %165 = arith.addf %157, %164 : vector<8x64xf32>
    %cst_100 = arith.constant 0.797884583 : f32
    %166 = vector.broadcast %cst_100 : f32 to vector<8x64xf32>
    %167 = arith.mulf %166, %165 : vector<8x64xf32>
    %168 = math.tanh %167 : vector<8x64xf32>
    %cst_101 = arith.constant 1.000000e+00 : f32
    %169 = vector.broadcast %cst_101 : f32 to vector<8x64xf32>
    %170 = arith.addf %169, %168 : vector<8x64xf32>
    %171 = arith.mulf %160, %170 : vector<8x64xf32>
    %172 = arith.mulf %171, %158 : vector<8x64xf32>
    %cst_102 = arith.constant dense<0.000000e+00> : vector<8x32xf32>
    %173 = tpu.matmul %172, %155, %cst_102 {dimension_numbers = #tpu.dot_dimension_numbers<[1], [0], [0], [1], [0, 0, 1, 1], [], []>} : vector<8x64xf32>, vector<64x32xf32>, vector<8x32xf32> -> vector<8x32xf32>
    %174 = arith.addf %137, %173 : vector<8x32xf32>
    %c4_103 = arith.constant 4 : index
    %c0_104 = arith.constant 0 : index
    %c0_105 = arith.constant 0 : index
    %175 = vector.load %arg7[%c4_103, %c0_104, %c0_105] : memref<12x1x32xf32, #tpu.memory_space<vmem>>, vector<1x1x32xf32>
    %176 = vector.shape_cast %175 : vector<1x1x32xf32> to vector<1x32xf32>
    %177 = arith.mulf %174, %174 : vector<8x32xf32>
    %cst_106 = arith.constant dense<0.000000e+00> : vector<8xf32>
    %178 = vector.multi_reduction <add>, %177, %cst_106 [1] : vector<8x32xf32> to vector<8xf32>
    %179 = vector.shape_cast %178 : vector<8xf32> to vector<8x1xf32>
    %cst_107 = arith.constant 3.200000e+01 : f32
    %180 = vector.broadcast %cst_107 : f32 to vector<8x1xf32>
    %181 = arith.divf %179, %180 : vector<8x1xf32>
    %cst_108 = arith.constant 9.99999997E-7 : f32
    %182 = vector.broadcast %cst_108 : f32 to vector<8x1xf32>
    %183 = arith.addf %181, %182 : vector<8x1xf32>
    %184 = math.rsqrt %183 : vector<8x1xf32>
    %185 = vector.broadcast %184 : vector<8x1xf32> to vector<8x32xf32>
    %186 = arith.mulf %174, %185 : vector<8x32xf32>
    %187 = vector.broadcast %176 : vector<1x32xf32> to vector<8x32xf32>
    %188 = arith.mulf %186, %187 : vector<8x32xf32>
    %c5_109 = arith.constant 5 : index
    %c0_110 = arith.constant 0 : index
    %c0_111 = arith.constant 0 : index
    %189 = vector.load %arg7[%c5_109, %c0_110, %c0_111] : memref<12x1x32xf32, #tpu.memory_space<vmem>>, vector<1x1x32xf32>
    %190 = vector.shape_cast %189 : vector<1x1x32xf32> to vector<1x32xf32>
    %191 = arith.mulf %3, %3 : vector<8x32xf32>
    %cst_112 = arith.constant dense<0.000000e+00> : vector<8xf32>
    %192 = vector.multi_reduction <add>, %191, %cst_112 [1] : vector<8x32xf32> to vector<8xf32>
    %193 = vector.shape_cast %192 : vector<8xf32> to vector<8x1xf32>
    %cst_113 = arith.constant 3.200000e+01 : f32
    %194 = vector.broadcast %cst_113 : f32 to vector<8x1xf32>
    %195 = arith.divf %193, %194 : vector<8x1xf32>
    %cst_114 = arith.constant 9.99999997E-7 : f32
    %196 = vector.broadcast %cst_114 : f32 to vector<8x1xf32>
    %197 = arith.addf %195, %196 : vector<8x1xf32>
    %198 = math.rsqrt %197 : vector<8x1xf32>
    %199 = vector.broadcast %198 : vector<8x1xf32> to vector<8x32xf32>
    %200 = arith.mulf %3, %199 : vector<8x32xf32>
    %201 = vector.broadcast %190 : vector<1x32xf32> to vector<8x32xf32>
    %202 = arith.mulf %200, %201 : vector<8x32xf32>
    %c6 = arith.constant 6 : index
    %c0_115 = arith.constant 0 : index
    %c0_116 = arith.constant 0 : index
    %c0_117 = arith.constant 0 : index
    %203 = vector.load %arg3[%c6, %c0_115, %c0_116, %c0_117] : memref<18x4x32x8xf32, #tpu.memory_space<vmem>>, vector<1x4x32x8xf32>
    %204 = vector.shape_cast %203 : vector<1x4x32x8xf32> to vector<4x32x8xf32>
    %c7 = arith.constant 7 : index
    %c0_118 = arith.constant 0 : index
    %c0_119 = arith.constant 0 : index
    %c0_120 = arith.constant 0 : index
    %205 = vector.load %arg3[%c7, %c0_118, %c0_119, %c0_120] : memref<18x4x32x8xf32, #tpu.memory_space<vmem>>, vector<1x4x32x8xf32>
    %206 = vector.shape_cast %205 : vector<1x4x32x8xf32> to vector<4x32x8xf32>
    %c8 = arith.constant 8 : index
    %c0_121 = arith.constant 0 : index
    %c0_122 = arith.constant 0 : index
    %c0_123 = arith.constant 0 : index
    %207 = vector.load %arg3[%c8, %c0_121, %c0_122, %c0_123] : memref<18x4x32x8xf32, #tpu.memory_space<vmem>>, vector<1x4x32x8xf32>
    %208 = vector.shape_cast %207 : vector<1x4x32x8xf32> to vector<4x32x8xf32>
    %c2_124 = arith.constant 2 : index
    %c0_125 = arith.constant 0 : index
    %c0_126 = arith.constant 0 : index
    %c0_127 = arith.constant 0 : index
    %209 = vector.load %arg4[%c2_124, %c0_125, %c0_126, %c0_127] : memref<6x4x8x32xf32, #tpu.memory_space<vmem>>, vector<1x4x8x32xf32>
    %210 = vector.shape_cast %209 : vector<1x4x8x32xf32> to vector<4x8x32xf32>
    %211 = vector.shape_cast %202 : vector<8x32xf32> to vector<1x8x32xf32>
    %212 = vector.shape_cast %211 : vector<1x8x32xf32> to vector<1x8x32xf32>
    %213 = vector.broadcast %212 : vector<1x8x32xf32> to vector<4x8x32xf32>
    %214 = vector.shape_cast %202 : vector<8x32xf32> to vector<1x8x32xf32>
    %215 = vector.shape_cast %214 : vector<1x8x32xf32> to vector<1x8x32xf32>
    %216 = vector.broadcast %215 : vector<1x8x32xf32> to vector<4x8x32xf32>
    "tpu.trace_start"() <{level = 10 : i32, message = "htd,hdk->htk"}> : () -> ()
    %cst_128 = arith.constant dense<0.000000e+00> : vector<4x8x8xf32>
    %217 = tpu.matmul %213, %204, %cst_128 {dimension_numbers = #tpu.dot_dimension_numbers<[2], [1], [1], [2], [0, 0, 0, 1, 1, 2], [0], [0]>} : vector<4x8x32xf32>, vector<4x32x8xf32>, vector<4x8x8xf32> -> vector<4x8x8xf32>
    %cst_129 = arith.constant dense<0.000000e+00> : vector<4x8x8xf32>
    %218 = tpu.matmul %216, %206, %cst_129 {dimension_numbers = #tpu.dot_dimension_numbers<[2], [1], [1], [2], [0, 0, 0, 1, 1, 2], [0], [0]>} : vector<4x8x32xf32>, vector<4x32x8xf32>, vector<4x8x8xf32> -> vector<4x8x8xf32>
    %cst_130 = arith.constant dense<0.000000e+00> : vector<4x8x8xf32>
    %219 = tpu.matmul %216, %208, %cst_130 {dimension_numbers = #tpu.dot_dimension_numbers<[2], [1], [1], [2], [0, 0, 0, 1, 1, 2], [0], [0]>} : vector<4x8x32xf32>, vector<4x32x8xf32>, vector<4x8x8xf32> -> vector<4x8x8xf32>
    "tpu.trace_stop"() : () -> ()
    "tpu.trace_start"() <{level = 10 : i32, message = "hqd,hkd->hqk"}> : () -> ()
    %cst_131 = arith.constant dense<0.000000e+00> : vector<4x8x8xf32>
    %220 = tpu.matmul %217, %218, %cst_131 {dimension_numbers = #tpu.dot_dimension_numbers<[2], [2], [1], [1], [0, 0, 0, 1, 1, 1], [0], [0]>} : vector<4x8x8xf32>, vector<4x8x8xf32>, vector<4x8x8xf32> -> vector<4x8x8xf32>
    "tpu.trace_stop"() : () -> ()
    %221 = arith.addf %220, %7 : vector<4x8x8xf32>
    %cst_132 = arith.constant dense<0xFF800000> : vector<4x8xf32>
    %222 = vector.multi_reduction <maximumf>, %221, %cst_132 [2] : vector<4x8x8xf32> to vector<4x8xf32>
    %223 = vector.shape_cast %222 : vector<4x8xf32> to vector<4x8x1xf32>
    %224 = vector.broadcast %223 : vector<4x8x1xf32> to vector<4x8x8xf32>
    %225 = arith.subf %221, %224 : vector<4x8x8xf32>
    %226 = math.exp %225 : vector<4x8x8xf32>
    %cst_133 = arith.constant dense<0.000000e+00> : vector<4x8xf32>
    %227 = vector.multi_reduction <add>, %226, %cst_133 [2] : vector<4x8x8xf32> to vector<4x8xf32>
    %228 = vector.shape_cast %227 : vector<4x8xf32> to vector<4x8x1xf32>
    %229 = vector.broadcast %228 : vector<4x8x1xf32> to vector<4x8x8xf32>
    %230 = arith.divf %226, %229 : vector<4x8x8xf32>
    "tpu.trace_start"() <{level = 10 : i32, message = "hqk,hkd->hqd"}> : () -> ()
    %cst_134 = arith.constant dense<0.000000e+00> : vector<4x8x8xf32>
    %231 = tpu.matmul %230, %219, %cst_134 {dimension_numbers = #tpu.dot_dimension_numbers<[2], [1], [1], [2], [0, 0, 0, 1, 1, 2], [0], [0]>} : vector<4x8x8xf32>, vector<4x8x8xf32>, vector<4x8x8xf32> -> vector<4x8x8xf32>
    "tpu.trace_stop"() : () -> ()
    "tpu.trace_start"() <{level = 10 : i32, message = "hqd,hdo->hqo"}> : () -> ()
    %cst_135 = arith.constant dense<0.000000e+00> : vector<4x8x32xf32>
    %232 = tpu.matmul %231, %210, %cst_135 {dimension_numbers = #tpu.dot_dimension_numbers<[2], [1], [1], [2], [0, 0, 0, 1, 1, 2], [0], [0]>} : vector<4x8x8xf32>, vector<4x8x32xf32>, vector<4x8x32xf32> -> vector<4x8x32xf32>
    "tpu.trace_stop"() : () -> ()
    %cst_136 = arith.constant dense<0.000000e+00> : vector<8x32xf32>
    %233 = vector.multi_reduction <add>, %232, %cst_136 [0] : vector<4x8x32xf32> to vector<8x32xf32>
    %234 = arith.addf %3, %233 : vector<8x32xf32>
    %c7_137 = arith.constant 7 : index
    %c0_138 = arith.constant 0 : index
    %c0_139 = arith.constant 0 : index
    %235 = vector.load %arg7[%c7_137, %c0_138, %c0_139] : memref<12x1x32xf32, #tpu.memory_space<vmem>>, vector<1x1x32xf32>
    %236 = vector.shape_cast %235 : vector<1x1x32xf32> to vector<1x32xf32>
    %237 = arith.mulf %234, %234 : vector<8x32xf32>
    %cst_140 = arith.constant dense<0.000000e+00> : vector<8xf32>
    %238 = vector.multi_reduction <add>, %237, %cst_140 [1] : vector<8x32xf32> to vector<8xf32>
    %239 = vector.shape_cast %238 : vector<8xf32> to vector<8x1xf32>
    %cst_141 = arith.constant 3.200000e+01 : f32
    %240 = vector.broadcast %cst_141 : f32 to vector<8x1xf32>
    %241 = arith.divf %239, %240 : vector<8x1xf32>
    %cst_142 = arith.constant 9.99999997E-7 : f32
    %242 = vector.broadcast %cst_142 : f32 to vector<8x1xf32>
    %243 = arith.addf %241, %242 : vector<8x1xf32>
    %244 = math.rsqrt %243 : vector<8x1xf32>
    %245 = vector.broadcast %244 : vector<8x1xf32> to vector<8x32xf32>
    %246 = arith.mulf %234, %245 : vector<8x32xf32>
    %247 = vector.broadcast %236 : vector<1x32xf32> to vector<8x32xf32>
    %248 = arith.mulf %246, %247 : vector<8x32xf32>
    %c12 = arith.constant 12 : index
    %c0_143 = arith.constant 0 : index
    %c0_144 = arith.constant 0 : index
    %c0_145 = arith.constant 0 : index
    %249 = vector.load %arg3[%c12, %c0_143, %c0_144, %c0_145] : memref<18x4x32x8xf32, #tpu.memory_space<vmem>>, vector<1x4x32x8xf32>
    %250 = vector.shape_cast %249 : vector<1x4x32x8xf32> to vector<4x32x8xf32>
    %c14 = arith.constant 14 : index
    %c0_146 = arith.constant 0 : index
    %c0_147 = arith.constant 0 : index
    %c0_148 = arith.constant 0 : index
    %251 = vector.load %arg3[%c14, %c0_146, %c0_147, %c0_148] : memref<18x4x32x8xf32, #tpu.memory_space<vmem>>, vector<1x4x32x8xf32>
    %252 = vector.shape_cast %251 : vector<1x4x32x8xf32> to vector<4x32x8xf32>
    %c15 = arith.constant 15 : index
    %c0_149 = arith.constant 0 : index
    %c0_150 = arith.constant 0 : index
    %c0_151 = arith.constant 0 : index
    %253 = vector.load %arg3[%c15, %c0_149, %c0_150, %c0_151] : memref<18x4x32x8xf32, #tpu.memory_space<vmem>>, vector<1x4x32x8xf32>
    %254 = vector.shape_cast %253 : vector<1x4x32x8xf32> to vector<4x32x8xf32>
    %c4_152 = arith.constant 4 : index
    %c0_153 = arith.constant 0 : index
    %c0_154 = arith.constant 0 : index
    %c0_155 = arith.constant 0 : index
    %255 = vector.load %arg4[%c4_152, %c0_153, %c0_154, %c0_155] : memref<6x4x8x32xf32, #tpu.memory_space<vmem>>, vector<1x4x8x32xf32>
    %256 = vector.shape_cast %255 : vector<1x4x8x32xf32> to vector<4x8x32xf32>
    %257 = vector.shape_cast %248 : vector<8x32xf32> to vector<1x8x32xf32>
    %258 = vector.shape_cast %257 : vector<1x8x32xf32> to vector<1x8x32xf32>
    %259 = vector.broadcast %258 : vector<1x8x32xf32> to vector<4x8x32xf32>
    %260 = vector.shape_cast %188 : vector<8x32xf32> to vector<1x8x32xf32>
    %261 = vector.shape_cast %260 : vector<1x8x32xf32> to vector<1x8x32xf32>
    %262 = vector.broadcast %261 : vector<1x8x32xf32> to vector<4x8x32xf32>
    "tpu.trace_start"() <{level = 10 : i32, message = "htd,hdk->htk"}> : () -> ()
    %cst_156 = arith.constant dense<0.000000e+00> : vector<4x8x8xf32>
    %263 = tpu.matmul %259, %250, %cst_156 {dimension_numbers = #tpu.dot_dimension_numbers<[2], [1], [1], [2], [0, 0, 0, 1, 1, 2], [0], [0]>} : vector<4x8x32xf32>, vector<4x32x8xf32>, vector<4x8x8xf32> -> vector<4x8x8xf32>
    %cst_157 = arith.constant dense<0.000000e+00> : vector<4x8x8xf32>
    %264 = tpu.matmul %262, %252, %cst_157 {dimension_numbers = #tpu.dot_dimension_numbers<[2], [1], [1], [2], [0, 0, 0, 1, 1, 2], [0], [0]>} : vector<4x8x32xf32>, vector<4x32x8xf32>, vector<4x8x8xf32> -> vector<4x8x8xf32>
    %cst_158 = arith.constant dense<0.000000e+00> : vector<4x8x8xf32>
    %265 = tpu.matmul %262, %254, %cst_158 {dimension_numbers = #tpu.dot_dimension_numbers<[2], [1], [1], [2], [0, 0, 0, 1, 1, 2], [0], [0]>} : vector<4x8x32xf32>, vector<4x32x8xf32>, vector<4x8x8xf32> -> vector<4x8x8xf32>
    "tpu.trace_stop"() : () -> ()
    "tpu.trace_start"() <{level = 10 : i32, message = "hqd,hkd->hqk"}> : () -> ()
    %cst_159 = arith.constant dense<0.000000e+00> : vector<4x8x8xf32>
    %266 = tpu.matmul %263, %264, %cst_159 {dimension_numbers = #tpu.dot_dimension_numbers<[2], [2], [1], [1], [0, 0, 0, 1, 1, 1], [0], [0]>} : vector<4x8x8xf32>, vector<4x8x8xf32>, vector<4x8x8xf32> -> vector<4x8x8xf32>
    "tpu.trace_stop"() : () -> ()
    %267 = arith.addf %266, %8 : vector<4x8x8xf32>
    %cst_160 = arith.constant dense<0xFF800000> : vector<4x8xf32>
    %268 = vector.multi_reduction <maximumf>, %267, %cst_160 [2] : vector<4x8x8xf32> to vector<4x8xf32>
    %269 = vector.shape_cast %268 : vector<4x8xf32> to vector<4x8x1xf32>
    %270 = vector.broadcast %269 : vector<4x8x1xf32> to vector<4x8x8xf32>
    %271 = arith.subf %267, %270 : vector<4x8x8xf32>
    %272 = math.exp %271 : vector<4x8x8xf32>
    %cst_161 = arith.constant dense<0.000000e+00> : vector<4x8xf32>
    %273 = vector.multi_reduction <add>, %272, %cst_161 [2] : vector<4x8x8xf32> to vector<4x8xf32>
    %274 = vector.shape_cast %273 : vector<4x8xf32> to vector<4x8x1xf32>
    %275 = vector.broadcast %274 : vector<4x8x1xf32> to vector<4x8x8xf32>
    %276 = arith.divf %272, %275 : vector<4x8x8xf32>
    "tpu.trace_start"() <{level = 10 : i32, message = "hqk,hkd->hqd"}> : () -> ()
    %cst_162 = arith.constant dense<0.000000e+00> : vector<4x8x8xf32>
    %277 = tpu.matmul %276, %265, %cst_162 {dimension_numbers = #tpu.dot_dimension_numbers<[2], [1], [1], [2], [0, 0, 0, 1, 1, 2], [0], [0]>} : vector<4x8x8xf32>, vector<4x8x8xf32>, vector<4x8x8xf32> -> vector<4x8x8xf32>
    "tpu.trace_stop"() : () -> ()
    "tpu.trace_start"() <{level = 10 : i32, message = "hqd,hdo->hqo"}> : () -> ()
    %cst_163 = arith.constant dense<0.000000e+00> : vector<4x8x32xf32>
    %278 = tpu.matmul %277, %256, %cst_163 {dimension_numbers = #tpu.dot_dimension_numbers<[2], [1], [1], [2], [0, 0, 0, 1, 1, 2], [0], [0]>} : vector<4x8x8xf32>, vector<4x8x32xf32>, vector<4x8x32xf32> -> vector<4x8x32xf32>
    "tpu.trace_stop"() : () -> ()
    %cst_164 = arith.constant dense<0.000000e+00> : vector<8x32xf32>
    %279 = vector.multi_reduction <add>, %278, %cst_164 [0] : vector<4x8x32xf32> to vector<8x32xf32>
    %280 = arith.addf %234, %279 : vector<8x32xf32>
    %c9 = arith.constant 9 : index
    %c0_165 = arith.constant 0 : index
    %c0_166 = arith.constant 0 : index
    %281 = vector.load %arg7[%c9, %c0_165, %c0_166] : memref<12x1x32xf32, #tpu.memory_space<vmem>>, vector<1x1x32xf32>
    %282 = vector.shape_cast %281 : vector<1x1x32xf32> to vector<1x32xf32>
    %283 = arith.mulf %280, %280 : vector<8x32xf32>
    %cst_167 = arith.constant dense<0.000000e+00> : vector<8xf32>
    %284 = vector.multi_reduction <add>, %283, %cst_167 [1] : vector<8x32xf32> to vector<8xf32>
    %285 = vector.shape_cast %284 : vector<8xf32> to vector<8x1xf32>
    %cst_168 = arith.constant 3.200000e+01 : f32
    %286 = vector.broadcast %cst_168 : f32 to vector<8x1xf32>
    %287 = arith.divf %285, %286 : vector<8x1xf32>
    %cst_169 = arith.constant 9.99999997E-7 : f32
    %288 = vector.broadcast %cst_169 : f32 to vector<8x1xf32>
    %289 = arith.addf %287, %288 : vector<8x1xf32>
    %290 = math.rsqrt %289 : vector<8x1xf32>
    %291 = vector.broadcast %290 : vector<8x1xf32> to vector<8x32xf32>
    %292 = arith.mulf %280, %291 : vector<8x32xf32>
    %293 = vector.broadcast %282 : vector<1x32xf32> to vector<8x32xf32>
    %294 = arith.mulf %292, %293 : vector<8x32xf32>
    %c2_170 = arith.constant 2 : index
    %c0_171 = arith.constant 0 : index
    %c0_172 = arith.constant 0 : index
    %295 = vector.load %arg5[%c2_170, %c0_171, %c0_172] : memref<4x32x128xf32, #tpu.memory_space<vmem>>, vector<1x32x128xf32>
    %296 = vector.shape_cast %295 : vector<1x32x128xf32> to vector<32x128xf32>
    %c2_173 = arith.constant 2 : index
    %c0_174 = arith.constant 0 : index
    %c0_175 = arith.constant 0 : index
    %297 = vector.load %arg6[%c2_173, %c0_174, %c0_175] : memref<4x64x32xf32, #tpu.memory_space<vmem>>, vector<1x64x32xf32>
    %298 = vector.shape_cast %297 : vector<1x64x32xf32> to vector<64x32xf32>
    %cst_176 = arith.constant dense<0.000000e+00> : vector<8x128xf32>
    %299 = tpu.matmul %294, %296, %cst_176 {dimension_numbers = #tpu.dot_dimension_numbers<[1], [0], [0], [1], [0, 0, 1, 1], [], []>} : vector<8x32xf32>, vector<32x128xf32>, vector<8x128xf32> -> vector<8x128xf32>
    %300 = vector.extract_strided_slice %299 {offsets = [0, 0], sizes = [8, 64], strides = [1, 1]} : vector<8x128xf32> to vector<8x64xf32>
    %301 = vector.extract_strided_slice %299 {offsets = [0, 64], sizes = [8, 64], strides = [1, 1]} : vector<8x128xf32> to vector<8x64xf32>
    %cst_177 = arith.constant 5.000000e-01 : f32
    %302 = vector.broadcast %cst_177 : f32 to vector<8x64xf32>
    %303 = arith.mulf %302, %300 : vector<8x64xf32>
    %cst_178 = arith.constant 4.471500e-02 : f32
    %304 = vector.broadcast %cst_178 : f32 to vector<8x64xf32>
    %305 = arith.mulf %304, %300 : vector<8x64xf32>
    %306 = arith.mulf %305, %300 : vector<8x64xf32>
    %307 = arith.mulf %306, %300 : vector<8x64xf32>
    %308 = arith.addf %300, %307 : vector<8x64xf32>
    %cst_179 = arith.constant 0.797884583 : f32
    %309 = vector.broadcast %cst_179 : f32 to vector<8x64xf32>
    %310 = arith.mulf %309, %308 : vector<8x64xf32>
    %311 = math.tanh %310 : vector<8x64xf32>
    %cst_180 = arith.constant 1.000000e+00 : f32
    %312 = vector.broadcast %cst_180 : f32 to vector<8x64xf32>
    %313 = arith.addf %312, %311 : vector<8x64xf32>
    %314 = arith.mulf %303, %313 : vector<8x64xf32>
    %315 = arith.mulf %314, %301 : vector<8x64xf32>
    %cst_181 = arith.constant dense<0.000000e+00> : vector<8x32xf32>
    %316 = tpu.matmul %315, %298, %cst_181 {dimension_numbers = #tpu.dot_dimension_numbers<[1], [0], [0], [1], [0, 0, 1, 1], [], []>} : vector<8x64xf32>, vector<64x32xf32>, vector<8x32xf32> -> vector<8x32xf32>
    %317 = arith.addf %280, %316 : vector<8x32xf32>
    %c6_182 = arith.constant 6 : index
    %c0_183 = arith.constant 0 : index
    %c0_184 = arith.constant 0 : index
    %318 = vector.load %arg7[%c6_182, %c0_183, %c0_184] : memref<12x1x32xf32, #tpu.memory_space<vmem>>, vector<1x1x32xf32>
    %319 = vector.shape_cast %318 : vector<1x1x32xf32> to vector<1x32xf32>
    %320 = arith.mulf %317, %317 : vector<8x32xf32>
    %cst_185 = arith.constant dense<0.000000e+00> : vector<8xf32>
    %321 = vector.multi_reduction <add>, %320, %cst_185 [1] : vector<8x32xf32> to vector<8xf32>
    %322 = vector.shape_cast %321 : vector<8xf32> to vector<8x1xf32>
    %cst_186 = arith.constant 3.200000e+01 : f32
    %323 = vector.broadcast %cst_186 : f32 to vector<8x1xf32>
    %324 = arith.divf %322, %323 : vector<8x1xf32>
    %cst_187 = arith.constant 9.99999997E-7 : f32
    %325 = vector.broadcast %cst_187 : f32 to vector<8x1xf32>
    %326 = arith.addf %324, %325 : vector<8x1xf32>
    %327 = math.rsqrt %326 : vector<8x1xf32>
    %328 = vector.broadcast %327 : vector<8x1xf32> to vector<8x32xf32>
    %329 = arith.mulf %317, %328 : vector<8x32xf32>
    %330 = vector.broadcast %319 : vector<1x32xf32> to vector<8x32xf32>
    %331 = arith.mulf %329, %330 : vector<8x32xf32>
    %c9_188 = arith.constant 9 : index
    %c0_189 = arith.constant 0 : index
    %c0_190 = arith.constant 0 : index
    %c0_191 = arith.constant 0 : index
    %332 = vector.load %arg3[%c9_188, %c0_189, %c0_190, %c0_191] : memref<18x4x32x8xf32, #tpu.memory_space<vmem>>, vector<1x4x32x8xf32>
    %333 = vector.shape_cast %332 : vector<1x4x32x8xf32> to vector<4x32x8xf32>
    %c10 = arith.constant 10 : index
    %c0_192 = arith.constant 0 : index
    %c0_193 = arith.constant 0 : index
    %c0_194 = arith.constant 0 : index
    %334 = vector.load %arg3[%c10, %c0_192, %c0_193, %c0_194] : memref<18x4x32x8xf32, #tpu.memory_space<vmem>>, vector<1x4x32x8xf32>
    %335 = vector.shape_cast %334 : vector<1x4x32x8xf32> to vector<4x32x8xf32>
    %c11 = arith.constant 11 : index
    %c0_195 = arith.constant 0 : index
    %c0_196 = arith.constant 0 : index
    %c0_197 = arith.constant 0 : index
    %336 = vector.load %arg3[%c11, %c0_195, %c0_196, %c0_197] : memref<18x4x32x8xf32, #tpu.memory_space<vmem>>, vector<1x4x32x8xf32>
    %337 = vector.shape_cast %336 : vector<1x4x32x8xf32> to vector<4x32x8xf32>
    %c3_198 = arith.constant 3 : index
    %c0_199 = arith.constant 0 : index
    %c0_200 = arith.constant 0 : index
    %c0_201 = arith.constant 0 : index
    %338 = vector.load %arg4[%c3_198, %c0_199, %c0_200, %c0_201] : memref<6x4x8x32xf32, #tpu.memory_space<vmem>>, vector<1x4x8x32xf32>
    %339 = vector.shape_cast %338 : vector<1x4x8x32xf32> to vector<4x8x32xf32>
    %340 = vector.shape_cast %331 : vector<8x32xf32> to vector<1x8x32xf32>
    %341 = vector.shape_cast %340 : vector<1x8x32xf32> to vector<1x8x32xf32>
    %342 = vector.broadcast %341 : vector<1x8x32xf32> to vector<4x8x32xf32>
    %343 = vector.shape_cast %331 : vector<8x32xf32> to vector<1x8x32xf32>
    %344 = vector.shape_cast %343 : vector<1x8x32xf32> to vector<1x8x32xf32>
    %345 = vector.broadcast %344 : vector<1x8x32xf32> to vector<4x8x32xf32>
    "tpu.trace_start"() <{level = 10 : i32, message = "htd,hdk->htk"}> : () -> ()
    %cst_202 = arith.constant dense<0.000000e+00> : vector<4x8x8xf32>
    %346 = tpu.matmul %342, %333, %cst_202 {dimension_numbers = #tpu.dot_dimension_numbers<[2], [1], [1], [2], [0, 0, 0, 1, 1, 2], [0], [0]>} : vector<4x8x32xf32>, vector<4x32x8xf32>, vector<4x8x8xf32> -> vector<4x8x8xf32>
    %cst_203 = arith.constant dense<0.000000e+00> : vector<4x8x8xf32>
    %347 = tpu.matmul %345, %335, %cst_203 {dimension_numbers = #tpu.dot_dimension_numbers<[2], [1], [1], [2], [0, 0, 0, 1, 1, 2], [0], [0]>} : vector<4x8x32xf32>, vector<4x32x8xf32>, vector<4x8x8xf32> -> vector<4x8x8xf32>
    %cst_204 = arith.constant dense<0.000000e+00> : vector<4x8x8xf32>
    %348 = tpu.matmul %345, %337, %cst_204 {dimension_numbers = #tpu.dot_dimension_numbers<[2], [1], [1], [2], [0, 0, 0, 1, 1, 2], [0], [0]>} : vector<4x8x32xf32>, vector<4x32x8xf32>, vector<4x8x8xf32> -> vector<4x8x8xf32>
    "tpu.trace_stop"() : () -> ()
    "tpu.trace_start"() <{level = 10 : i32, message = "hqd,hkd->hqk"}> : () -> ()
    %cst_205 = arith.constant dense<0.000000e+00> : vector<4x8x8xf32>
    %349 = tpu.matmul %346, %347, %cst_205 {dimension_numbers = #tpu.dot_dimension_numbers<[2], [2], [1], [1], [0, 0, 0, 1, 1, 1], [0], [0]>} : vector<4x8x8xf32>, vector<4x8x8xf32>, vector<4x8x8xf32> -> vector<4x8x8xf32>
    "tpu.trace_stop"() : () -> ()
    %350 = arith.addf %349, %7 : vector<4x8x8xf32>
    %cst_206 = arith.constant dense<0xFF800000> : vector<4x8xf32>
    %351 = vector.multi_reduction <maximumf>, %350, %cst_206 [2] : vector<4x8x8xf32> to vector<4x8xf32>
    %352 = vector.shape_cast %351 : vector<4x8xf32> to vector<4x8x1xf32>
    %353 = vector.broadcast %352 : vector<4x8x1xf32> to vector<4x8x8xf32>
    %354 = arith.subf %350, %353 : vector<4x8x8xf32>
    %355 = math.exp %354 : vector<4x8x8xf32>
    %cst_207 = arith.constant dense<0.000000e+00> : vector<4x8xf32>
    %356 = vector.multi_reduction <add>, %355, %cst_207 [2] : vector<4x8x8xf32> to vector<4x8xf32>
    %357 = vector.shape_cast %356 : vector<4x8xf32> to vector<4x8x1xf32>
    %358 = vector.broadcast %357 : vector<4x8x1xf32> to vector<4x8x8xf32>
    %359 = arith.divf %355, %358 : vector<4x8x8xf32>
    "tpu.trace_start"() <{level = 10 : i32, message = "hqk,hkd->hqd"}> : () -> ()
    %cst_208 = arith.constant dense<0.000000e+00> : vector<4x8x8xf32>
    %360 = tpu.matmul %359, %348, %cst_208 {dimension_numbers = #tpu.dot_dimension_numbers<[2], [1], [1], [2], [0, 0, 0, 1, 1, 2], [0], [0]>} : vector<4x8x8xf32>, vector<4x8x8xf32>, vector<4x8x8xf32> -> vector<4x8x8xf32>
    "tpu.trace_stop"() : () -> ()
    "tpu.trace_start"() <{level = 10 : i32, message = "hqd,hdo->hqo"}> : () -> ()
    %cst_209 = arith.constant dense<0.000000e+00> : vector<4x8x32xf32>
    %361 = tpu.matmul %360, %339, %cst_209 {dimension_numbers = #tpu.dot_dimension_numbers<[2], [1], [1], [2], [0, 0, 0, 1, 1, 2], [0], [0]>} : vector<4x8x8xf32>, vector<4x8x32xf32>, vector<4x8x32xf32> -> vector<4x8x32xf32>
    "tpu.trace_stop"() : () -> ()
    %cst_210 = arith.constant dense<0.000000e+00> : vector<8x32xf32>
    %362 = vector.multi_reduction <add>, %361, %cst_210 [0] : vector<4x8x32xf32> to vector<8x32xf32>
    %363 = arith.addf %317, %362 : vector<8x32xf32>
    %c8_211 = arith.constant 8 : index
    %c0_212 = arith.constant 0 : index
    %c0_213 = arith.constant 0 : index
    %364 = vector.load %arg7[%c8_211, %c0_212, %c0_213] : memref<12x1x32xf32, #tpu.memory_space<vmem>>, vector<1x1x32xf32>
    %365 = vector.shape_cast %364 : vector<1x1x32xf32> to vector<1x32xf32>
    %366 = arith.mulf %363, %363 : vector<8x32xf32>
    %cst_214 = arith.constant dense<0.000000e+00> : vector<8xf32>
    %367 = vector.multi_reduction <add>, %366, %cst_214 [1] : vector<8x32xf32> to vector<8xf32>
    %368 = vector.shape_cast %367 : vector<8xf32> to vector<8x1xf32>
    %cst_215 = arith.constant 3.200000e+01 : f32
    %369 = vector.broadcast %cst_215 : f32 to vector<8x1xf32>
    %370 = arith.divf %368, %369 : vector<8x1xf32>
    %cst_216 = arith.constant 9.99999997E-7 : f32
    %371 = vector.broadcast %cst_216 : f32 to vector<8x1xf32>
    %372 = arith.addf %370, %371 : vector<8x1xf32>
    %373 = math.rsqrt %372 : vector<8x1xf32>
    %374 = vector.broadcast %373 : vector<8x1xf32> to vector<8x32xf32>
    %375 = arith.mulf %363, %374 : vector<8x32xf32>
    %376 = vector.broadcast %365 : vector<1x32xf32> to vector<8x32xf32>
    %377 = arith.mulf %375, %376 : vector<8x32xf32>
    %c13 = arith.constant 13 : index
    %c0_217 = arith.constant 0 : index
    %c0_218 = arith.constant 0 : index
    %c0_219 = arith.constant 0 : index
    %378 = vector.load %arg3[%c13, %c0_217, %c0_218, %c0_219] : memref<18x4x32x8xf32, #tpu.memory_space<vmem>>, vector<1x4x32x8xf32>
    %379 = vector.shape_cast %378 : vector<1x4x32x8xf32> to vector<4x32x8xf32>
    %c16 = arith.constant 16 : index
    %c0_220 = arith.constant 0 : index
    %c0_221 = arith.constant 0 : index
    %c0_222 = arith.constant 0 : index
    %380 = vector.load %arg3[%c16, %c0_220, %c0_221, %c0_222] : memref<18x4x32x8xf32, #tpu.memory_space<vmem>>, vector<1x4x32x8xf32>
    %381 = vector.shape_cast %380 : vector<1x4x32x8xf32> to vector<4x32x8xf32>
    %c17 = arith.constant 17 : index
    %c0_223 = arith.constant 0 : index
    %c0_224 = arith.constant 0 : index
    %c0_225 = arith.constant 0 : index
    %382 = vector.load %arg3[%c17, %c0_223, %c0_224, %c0_225] : memref<18x4x32x8xf32, #tpu.memory_space<vmem>>, vector<1x4x32x8xf32>
    %383 = vector.shape_cast %382 : vector<1x4x32x8xf32> to vector<4x32x8xf32>
    %c5_226 = arith.constant 5 : index
    %c0_227 = arith.constant 0 : index
    %c0_228 = arith.constant 0 : index
    %c0_229 = arith.constant 0 : index
    %384 = vector.load %arg4[%c5_226, %c0_227, %c0_228, %c0_229] : memref<6x4x8x32xf32, #tpu.memory_space<vmem>>, vector<1x4x8x32xf32>
    %385 = vector.shape_cast %384 : vector<1x4x8x32xf32> to vector<4x8x32xf32>
    %386 = vector.shape_cast %377 : vector<8x32xf32> to vector<1x8x32xf32>
    %387 = vector.shape_cast %386 : vector<1x8x32xf32> to vector<1x8x32xf32>
    %388 = vector.broadcast %387 : vector<1x8x32xf32> to vector<4x8x32xf32>
    %389 = vector.shape_cast %188 : vector<8x32xf32> to vector<1x8x32xf32>
    %390 = vector.shape_cast %389 : vector<1x8x32xf32> to vector<1x8x32xf32>
    %391 = vector.broadcast %390 : vector<1x8x32xf32> to vector<4x8x32xf32>
    "tpu.trace_start"() <{level = 10 : i32, message = "htd,hdk->htk"}> : () -> ()
    %cst_230 = arith.constant dense<0.000000e+00> : vector<4x8x8xf32>
    %392 = tpu.matmul %388, %379, %cst_230 {dimension_numbers = #tpu.dot_dimension_numbers<[2], [1], [1], [2], [0, 0, 0, 1, 1, 2], [0], [0]>} : vector<4x8x32xf32>, vector<4x32x8xf32>, vector<4x8x8xf32> -> vector<4x8x8xf32>
    %cst_231 = arith.constant dense<0.000000e+00> : vector<4x8x8xf32>
    %393 = tpu.matmul %391, %381, %cst_231 {dimension_numbers = #tpu.dot_dimension_numbers<[2], [1], [1], [2], [0, 0, 0, 1, 1, 2], [0], [0]>} : vector<4x8x32xf32>, vector<4x32x8xf32>, vector<4x8x8xf32> -> vector<4x8x8xf32>
    %cst_232 = arith.constant dense<0.000000e+00> : vector<4x8x8xf32>
    %394 = tpu.matmul %391, %383, %cst_232 {dimension_numbers = #tpu.dot_dimension_numbers<[2], [1], [1], [2], [0, 0, 0, 1, 1, 2], [0], [0]>} : vector<4x8x32xf32>, vector<4x32x8xf32>, vector<4x8x8xf32> -> vector<4x8x8xf32>
    "tpu.trace_stop"() : () -> ()
    "tpu.trace_start"() <{level = 10 : i32, message = "hqd,hkd->hqk"}> : () -> ()
    %cst_233 = arith.constant dense<0.000000e+00> : vector<4x8x8xf32>
    %395 = tpu.matmul %392, %393, %cst_233 {dimension_numbers = #tpu.dot_dimension_numbers<[2], [2], [1], [1], [0, 0, 0, 1, 1, 1], [0], [0]>} : vector<4x8x8xf32>, vector<4x8x8xf32>, vector<4x8x8xf32> -> vector<4x8x8xf32>
    "tpu.trace_stop"() : () -> ()
    %396 = arith.addf %395, %8 : vector<4x8x8xf32>
    %cst_234 = arith.constant dense<0xFF800000> : vector<4x8xf32>
    %397 = vector.multi_reduction <maximumf>, %396, %cst_234 [2] : vector<4x8x8xf32> to vector<4x8xf32>
    %398 = vector.shape_cast %397 : vector<4x8xf32> to vector<4x8x1xf32>
    %399 = vector.broadcast %398 : vector<4x8x1xf32> to vector<4x8x8xf32>
    %400 = arith.subf %396, %399 : vector<4x8x8xf32>
    %401 = math.exp %400 : vector<4x8x8xf32>
    %cst_235 = arith.constant dense<0.000000e+00> : vector<4x8xf32>
    %402 = vector.multi_reduction <add>, %401, %cst_235 [2] : vector<4x8x8xf32> to vector<4x8xf32>
    %403 = vector.shape_cast %402 : vector<4x8xf32> to vector<4x8x1xf32>
    %404 = vector.broadcast %403 : vector<4x8x1xf32> to vector<4x8x8xf32>
    %405 = arith.divf %401, %404 : vector<4x8x8xf32>
    "tpu.trace_start"() <{level = 10 : i32, message = "hqk,hkd->hqd"}> : () -> ()
    %cst_236 = arith.constant dense<0.000000e+00> : vector<4x8x8xf32>
    %406 = tpu.matmul %405, %394, %cst_236 {dimension_numbers = #tpu.dot_dimension_numbers<[2], [1], [1], [2], [0, 0, 0, 1, 1, 2], [0], [0]>} : vector<4x8x8xf32>, vector<4x8x8xf32>, vector<4x8x8xf32> -> vector<4x8x8xf32>
    "tpu.trace_stop"() : () -> ()
    "tpu.trace_start"() <{level = 10 : i32, message = "hqd,hdo->hqo"}> : () -> ()
    %cst_237 = arith.constant dense<0.000000e+00> : vector<4x8x32xf32>
    %407 = tpu.matmul %406, %385, %cst_237 {dimension_numbers = #tpu.dot_dimension_numbers<[2], [1], [1], [2], [0, 0, 0, 1, 1, 2], [0], [0]>} : vector<4x8x8xf32>, vector<4x8x32xf32>, vector<4x8x32xf32> -> vector<4x8x32xf32>
    "tpu.trace_stop"() : () -> ()
    %cst_238 = arith.constant dense<0.000000e+00> : vector<8x32xf32>
    %408 = vector.multi_reduction <add>, %407, %cst_238 [0] : vector<4x8x32xf32> to vector<8x32xf32>
    %409 = arith.addf %363, %408 : vector<8x32xf32>
    %c10_239 = arith.constant 10 : index
    %c0_240 = arith.constant 0 : index
    %c0_241 = arith.constant 0 : index
    %410 = vector.load %arg7[%c10_239, %c0_240, %c0_241] : memref<12x1x32xf32, #tpu.memory_space<vmem>>, vector<1x1x32xf32>
    %411 = vector.shape_cast %410 : vector<1x1x32xf32> to vector<1x32xf32>
    %412 = arith.mulf %409, %409 : vector<8x32xf32>
    %cst_242 = arith.constant dense<0.000000e+00> : vector<8xf32>
    %413 = vector.multi_reduction <add>, %412, %cst_242 [1] : vector<8x32xf32> to vector<8xf32>
    %414 = vector.shape_cast %413 : vector<8xf32> to vector<8x1xf32>
    %cst_243 = arith.constant 3.200000e+01 : f32
    %415 = vector.broadcast %cst_243 : f32 to vector<8x1xf32>
    %416 = arith.divf %414, %415 : vector<8x1xf32>
    %cst_244 = arith.constant 9.99999997E-7 : f32
    %417 = vector.broadcast %cst_244 : f32 to vector<8x1xf32>
    %418 = arith.addf %416, %417 : vector<8x1xf32>
    %419 = math.rsqrt %418 : vector<8x1xf32>
    %420 = vector.broadcast %419 : vector<8x1xf32> to vector<8x32xf32>
    %421 = arith.mulf %409, %420 : vector<8x32xf32>
    %422 = vector.broadcast %411 : vector<1x32xf32> to vector<8x32xf32>
    %423 = arith.mulf %421, %422 : vector<8x32xf32>
    %c3_245 = arith.constant 3 : index
    %c0_246 = arith.constant 0 : index
    %c0_247 = arith.constant 0 : index
    %424 = vector.load %arg5[%c3_245, %c0_246, %c0_247] : memref<4x32x128xf32, #tpu.memory_space<vmem>>, vector<1x32x128xf32>
    %425 = vector.shape_cast %424 : vector<1x32x128xf32> to vector<32x128xf32>
    %c3_248 = arith.constant 3 : index
    %c0_249 = arith.constant 0 : index
    %c0_250 = arith.constant 0 : index
    %426 = vector.load %arg6[%c3_248, %c0_249, %c0_250] : memref<4x64x32xf32, #tpu.memory_space<vmem>>, vector<1x64x32xf32>
    %427 = vector.shape_cast %426 : vector<1x64x32xf32> to vector<64x32xf32>
    %cst_251 = arith.constant dense<0.000000e+00> : vector<8x128xf32>
    %428 = tpu.matmul %423, %425, %cst_251 {dimension_numbers = #tpu.dot_dimension_numbers<[1], [0], [0], [1], [0, 0, 1, 1], [], []>} : vector<8x32xf32>, vector<32x128xf32>, vector<8x128xf32> -> vector<8x128xf32>
    %429 = vector.extract_strided_slice %428 {offsets = [0, 0], sizes = [8, 64], strides = [1, 1]} : vector<8x128xf32> to vector<8x64xf32>
    %430 = vector.extract_strided_slice %428 {offsets = [0, 64], sizes = [8, 64], strides = [1, 1]} : vector<8x128xf32> to vector<8x64xf32>
    %cst_252 = arith.constant 5.000000e-01 : f32
    %431 = vector.broadcast %cst_252 : f32 to vector<8x64xf32>
    %432 = arith.mulf %431, %429 : vector<8x64xf32>
    %cst_253 = arith.constant 4.471500e-02 : f32
    %433 = vector.broadcast %cst_253 : f32 to vector<8x64xf32>
    %434 = arith.mulf %433, %429 : vector<8x64xf32>
    %435 = arith.mulf %434, %429 : vector<8x64xf32>
    %436 = arith.mulf %435, %429 : vector<8x64xf32>
    %437 = arith.addf %429, %436 : vector<8x64xf32>
    %cst_254 = arith.constant 0.797884583 : f32
    %438 = vector.broadcast %cst_254 : f32 to vector<8x64xf32>
    %439 = arith.mulf %438, %437 : vector<8x64xf32>
    %440 = math.tanh %439 : vector<8x64xf32>
    %cst_255 = arith.constant 1.000000e+00 : f32
    %441 = vector.broadcast %cst_255 : f32 to vector<8x64xf32>
    %442 = arith.addf %441, %440 : vector<8x64xf32>
    %443 = arith.mulf %432, %442 : vector<8x64xf32>
    %444 = arith.mulf %443, %430 : vector<8x64xf32>
    %cst_256 = arith.constant dense<0.000000e+00> : vector<8x32xf32>
    %445 = tpu.matmul %444, %427, %cst_256 {dimension_numbers = #tpu.dot_dimension_numbers<[1], [0], [0], [1], [0, 0, 1, 1], [], []>} : vector<8x64xf32>, vector<64x32xf32>, vector<8x32xf32> -> vector<8x32xf32>
    %446 = arith.addf %409, %445 : vector<8x32xf32>
    %c11_257 = arith.constant 11 : index
    %c0_258 = arith.constant 0 : index
    %c0_259 = arith.constant 0 : index
    %447 = vector.load %arg7[%c11_257, %c0_258, %c0_259] : memref<12x1x32xf32, #tpu.memory_space<vmem>>, vector<1x1x32xf32>
    %448 = vector.shape_cast %447 : vector<1x1x32xf32> to vector<1x32xf32>
    %449 = arith.mulf %446, %446 : vector<8x32xf32>
    %cst_260 = arith.constant dense<0.000000e+00> : vector<8xf32>
    %450 = vector.multi_reduction <add>, %449, %cst_260 [1] : vector<8x32xf32> to vector<8xf32>
    %451 = vector.shape_cast %450 : vector<8xf32> to vector<8x1xf32>
    %cst_261 = arith.constant 3.200000e+01 : f32
    %452 = vector.broadcast %cst_261 : f32 to vector<8x1xf32>
    %453 = arith.divf %451, %452 : vector<8x1xf32>
    %cst_262 = arith.constant 9.99999997E-7 : f32
    %454 = vector.broadcast %cst_262 : f32 to vector<8x1xf32>
    %455 = arith.addf %453, %454 : vector<8x1xf32>
    %456 = math.rsqrt %455 : vector<8x1xf32>
    %457 = vector.broadcast %456 : vector<8x1xf32> to vector<8x32xf32>
    %458 = arith.mulf %446, %457 : vector<8x32xf32>
    %459 = vector.broadcast %448 : vector<1x32xf32> to vector<8x32xf32>
    %460 = arith.mulf %458, %459 : vector<8x32xf32>
    %c0_263 = arith.constant 0 : index
    %c0_264 = arith.constant 0 : index
    %461 = vector.load %arg8[%c0_263, %c0_264] : memref<32x128xf32, #tpu.memory_space<vmem>>, vector<32x128xf32>
    %cst_265 = arith.constant dense<0.000000e+00> : vector<8x128xf32>
    %462 = tpu.matmul %460, %461, %cst_265 {dimension_numbers = #tpu.dot_dimension_numbers<[1], [0], [0], [1], [0, 0, 1, 1], [], []>} : vector<8x32xf32>, vector<32x128xf32>, vector<8x128xf32> -> vector<8x128xf32>
    %c0_266 = arith.constant 0 : index
    %c0_267 = arith.constant 0 : index
    %c0_268 = arith.constant 0 : index
    %463 = vector.load %arg9[%c0_266, %c0_267, %c0_268] : memref<1x8x128xf32, #tpu.memory_space<vmem>>, vector<1x8x128xf32>
    %464 = vector.shape_cast %463 : vector<1x8x128xf32> to vector<8x128xf32>
    %465 = vector.shape_cast %462 : vector<8x128xf32> to vector<1x8x128xf32>
    tpu.vector_store %arg9[%c0_266, %c0_267, %c0_268], %465 {strides = array<i32>} : memref<1x8x128xf32, #tpu.memory_space<vmem>>, vector<1x8x128xf32>,
    return
  }
  func.func @transform_0(%arg0: i32) -> (i32, i32, i32, i32) {
    %c0_i32 = arith.constant 0 : i32
    %c0_i32_0 = arith.constant 0 : i32
    %c0_i32_1 = arith.constant 0 : i32
    %c0_i32_2 = arith.constant 0 : i32
    return %arg0, %c0_i32, %c0_i32_0, %c0_i32_1 : i32, i32, i32, i32
  }
  func.func @transform_1(%arg0: i32) -> (i32, i32, i32, i32) {
    %c0_i32 = arith.constant 0 : i32
    %c0_i32_0 = arith.constant 0 : i32
    %c0_i32_1 = arith.constant 0 : i32
    %c0_i32_2 = arith.constant 0 : i32
    return %arg0, %c0_i32, %c0_i32_0, %c0_i32_1 : i32, i32, i32, i32
  }
  func.func @transform_2(%arg0: i32) -> (i32, i32, i32, i32) {
    %c0_i32 = arith.constant 0 : i32
    %c0_i32_0 = arith.constant 0 : i32
    %c0_i32_1 = arith.constant 0 : i32
    %c0_i32_2 = arith.constant 0 : i32
    %c0_i32_3 = arith.constant 0 : i32
    return %c0_i32, %c0_i32_0, %c0_i32_1, %c0_i32_2 : i32, i32, i32, i32
  }
  func.func @transform_3(%arg0: i32) -> (i32, i32, i32, i32) {
    %c0_i32 = arith.constant 0 : i32
    %c0_i32_0 = arith.constant 0 : i32
    %c0_i32_1 = arith.constant 0 : i32
    %c0_i32_2 = arith.constant 0 : i32
    %c0_i32_3 = arith.constant 0 : i32
    return %c0_i32, %c0_i32_0, %c0_i32_1, %c0_i32_2 : i32, i32, i32, i32
  }
  func.func @transform_4(%arg0: i32) -> (i32, i32, i32) {
    %c0_i32 = arith.constant 0 : i32
    %c0_i32_0 = arith.constant 0 : i32
    %c0_i32_1 = arith.constant 0 : i32
    %c0_i32_2 = arith.constant 0 : i32
    return %c0_i32, %c0_i32_0, %c0_i32_1 : i32, i32, i32
  }
  func.func @transform_5(%arg0: i32) -> (i32, i32, i32) {
    %c0_i32 = arith.constant 0 : i32
    %c0_i32_0 = arith.constant 0 : i32
    %c0_i32_1 = arith.constant 0 : i32
    %c0_i32_2 = arith.constant 0 : i32
    return %c0_i32, %c0_i32_0, %c0_i32_1 : i32, i32, i32
  }
  func.func @transform_6(%arg0: i32) -> (i32, i32, i32) {
    %c0_i32 = arith.constant 0 : i32
    %c0_i32_0 = arith.constant 0 : i32
    %c0_i32_1 = arith.constant 0 : i32
    %c0_i32_2 = arith.constant 0 : i32
    return %c0_i32, %c0_i32_0, %c0_i32_1 : i32, i32, i32
  }
  func.func @transform_7(%arg0: i32) -> (i32, i32) {
    %c0_i32 = arith.constant 0 : i32
    %c0_i32_0 = arith.constant 0 : i32
    %c0_i32_1 = arith.constant 0 : i32
    return %c0_i32, %c0_i32_0 : i32, i32
  }
  func.func @transform_8(%arg0: i32) -> (i32, i32, i32) {
    %c0_i32 = arith.constant 0 : i32
    %c0_i32_0 = arith.constant 0 : i32
    %c0_i32_1 = arith.constant 0 : i32
    return %arg0, %c0_i32, %c0_i32_0 : i32, i32, i32
  }
}

</mosaic_0001>

<bundles_post_ra>
// kernel: verification_model_forward.1
= control target key start
LH: loop header
LB: loop body
LE: loop exit
PB: predicated region body
PF: predicated region fallthrough
CT: control target
= control target key end

     0   :  { %13 = vsyncpa [#allocation3], 0  ;;  %s7695_s0 = inlined_call_operand.vmem [shape: f32[2,2,8,32], index: 0, kind: input, shape index: {}]   ;;  %s7696_s1 = inlined_call_operand.vmem [shape: f32[2,12,8,8], index: 1, kind: input, shape index: {}]   ;;  %s7697_s2 = inlined_call_operand.vmem [shape: f32[18,4,32,8], index: 2, kind: input, shape index: {}]   ;;  %s7698_s3 = inlined_call_operand.vmem [shape: f32[6,4,8,32], index: 3, kind: input, shape index: {}]   ;;  %s7699_s4 = inlined_call_operand.vmem [shape: f32[4,32,128], index: 4, kind: input, shape index: {}]   ;;  %s7700_s5 = inlined_call_operand.vmem [shape: f32[4,64,32], index: 5, kind: input, shape index: {}]   ;;  %s7701_s6 = inlined_call_operand.vmem [shape: f32[12,1,32], index: 6, kind: input, shape index: {}]   ;;  %s7702_s7 = inlined_call_operand.vmem [shape: f32[32,128], index: 7, kind: input, shape index: {}]   ;;  %s7703_s8 = inlined_call_operand.hbm [shape: f32[2,8,128], index: 8, kind: output, shape index: {}]  }
   0x1   :  { %15 = vsyncpa [#allocation3 + $0x1], 0  ;;  %s6017_s27 = smov 0   ;;  %s6019_s28 = smov 0  }
   0x2   :  { %s6021_s29 = smov 0   ;;  %s6023_s30 = smov 0  }
   0x3 LB: > { %s6038_s9 = sadd.s32 4294967295, %s5968_s30   ;;  %s5184_s10 = sadd.s32 4294967294, %s5968_s30   ;;  %s5968_s30 = sphi %s6023_s30, %s7709_s30   ;;  %s5964_s29 = sphi %s6021_s29, %s7708_s29   ;;  %s5960_s28 = sphi %s6019_s28, %s7707_s28   ;;  %s5956_s27 = sphi %s6017_s27, %s7706_s27  }
   0x4   : > { %s6042_s11 = sadd.s32 1, %s5968_s30   ;;  %s206_s12 = sadd.s32 1, %s5964_s29 }
   0x5   : > { %s203_s13 = ssub.s32 %s5968_s30, %s6042_s11  ;;  %p216_p0 = scmp.ne.s32.totalorder %s5964_s29, %s5960_s28 }
   0x6   : > { %p204_p1 = scmp.eq.s32.totalorder %s203_s13, 0  ;;  %p217_p2 = scmp.eq.s32.totalorder %s6038_s9, 1 }
   0x7   : > { %p222_p3 = scmp.ne.s32.totalorder %s5960_s28, %s5956_s27  ;;  %p223_p4 = scmp.eq.s32.totalorder %s5184_s10, 1 }
   0x8   : > { %s6053_s14 = scalar_select %p204_p1, %s5964_s29, %s206_s12  }
   0x9   : > { %p6055_p5 = por %p217_p2, %p216_p0  ;;  %p6059_p6 = por %p223_p4, %p222_p3 }
   0xa   : > { %p5187_p7 = scmp.ge.s32.totalorder %s5968_s30, 1  ;;  %p275_p8 = scmp.lt.s32.totalorder %s5968_s30, 3 }
   0xc   : > { %p276_p9 = pnand %p5187_p7, %p275_p8 }
   0xd   : > { %p314_p10 = scmp.lt.s32.totalorder (!%p276_p9), %s6038_s9, 1  ;;  %s5971_s23 = smov (!%p276_p9), 64  }
   0xe   : > { %279 = sbr.rel (%p276_p9) target bundleno = 7831 (0x1e97), region = 52  ;;  %s5710_s26 = sshll.u32 (!%p276_p9), %s6038_s9, 3 }
   0xf   : > { %s5108_s12 = scalar_lea.hbm (!%p276_p9), %s7703_s8, %s5710_s26 }
  0x13   : > { %s6067_s17 = scalar_select %p314_p10, %s6038_s9, 1  ;;  %vm341_vm0 = vcmask 261120   ;;  %v5970_v3 = vmov 32.0   ;;  %v372_v7 = vld [vmem:[%s7697_s2 + $0x18] sm:$0xff]  ;;  %v371_v11 = vld [vmem:[%s7697_s2 + $0x10] sm:$0xff]  ;;  %v370_v16 = vld [vmem:[%s7697_s2 + $0x8] sm:$0xff] }
  0x14   : > { %5768 = vrcp.f32 %v5970_v3  ;;  %v376_v8 = vld [vmem:[%s7697_s2 + $0x38] sm:$0xff]  ;;  %438 = vmatpush.msra.mxu0 %v372_v7  ;;  %v375_v12 = vld [vmem:[%s7697_s2 + $0x30] sm:$0xff]  ;;  %v374_v17 = vld [vmem:[%s7697_s2 + $0x28] sm:$0xff]  ;;  %vm666_vm5 = vcmask 64512  }
  0x15   : > { %s5713_s18 = sshll.u32 %s6067_s17, 4  ;;  %v380_v9 = vld [vmem:[%s7697_s2 + $0x58] sm:$0xff]  ;;  %458 = vmatpush.msra.mxu1 %v376_v8  ;;  %v379_v13 = vld [vmem:[%s7697_s2 + $0x50] sm:$0xff]  ;;  %v378_v18 = vld [vmem:[%s7697_s2 + $0x48] sm:$0xff]  ;;  %s5714_s20 = smul.u32 96, %s6067_s17 }
  0x16   : > { %s6073_s21 = scalar_lea.vmem %s7695_s0, %s5713_s18  ;;  %v384_v10 = vld [vmem:[%s7697_s2 + $0x78] sm:$0xff]  ;;  %478 = vmatpush.msra.mxu2 %v380_v9  ;;  %439 = vmatpush.msra.mxu0 %v371_v11  ;;  %v383_v15 = vld [vmem:[%s7697_s2 + $0x70] sm:$0xff]  ;;  %v382_v19 = vld [vmem:[%s7697_s2 + $0x68] sm:$0xff]  ;;  %s311_s17 = sand.u32 1, %s5960_s28  }
  0x17   : > { %v6076_v0 = vld [vmem:[%s6073_s21] sm:$0xff]  ;;  %498 = vmatpush.msra.mxu3 %v384_v10  ;;  %459 = vmatpush.msra.mxu1 %v375_v12  ;;  %v5196_v25 = vld [vmem:[%s7697_s2 + $0x98] sm:$0xff]  ;;  %v5195_v29 = vld [vmem:[%s7697_s2 + $0x90] sm:$0xff]  ;;  %s6256_s24 = scalar_lea.vmem %s7696_s1, %s5714_s20  ;;  %s5188_s25 = sshll.u32 %s311_s17, 3 }
  0x18   : > { %v340_v1 = vmul.f32 %v6076_v0, %v6076_v0  ;;  %479 = vmatpush.msra.mxu2 %v379_v13  ;;  %440 = vmatpush.msra.mxu0 %v370_v16  ;;  %v369_v20 = vld [vmem:[%s7697_s2] sm:$0xff]  ;;  %v5200_v26 = vld [vmem:[%s7697_s2 + $0xb8] sm:$0xff]  ;;  %v5199_v30 = vld [vmem:[%s7697_s2 + $0xb0] sm:$0xff]  ;;  %s5112_s18 = sshll.u32 %s5108_s12, 4  ;;  %s5098_s19 = scalar_lea.sflag [#allocation3], %s311_s17  ;;  %s5113_s18 = int_to_ptr.hbm [resolvable:$true] %s5112_s18 }
  0x19   : > { %499 = vmatpush.msra.mxu3 %v383_v15  ;;  %460 = vmatpush.msra.mxu1 %v374_v17  ;;  %v373_v21 = vld [vmem:[%s7697_s2 + $0x20] sm:$0xff]  ;;  %v5204_v27 = vld [vmem:[%s7697_s2 + $0xd8] sm:$0xff]  ;;  %v5203_v32 = vld [vmem:[%s7697_s2 + $0xd0] sm:$0xff] }
  0x1a   : > { %v342_v2 = vsel %vm341_vm0, %v340_v1, 0.0  ;;  %v5769_v4 = vpop.eup %5768  ;;  %480 = vmatpush.msra.mxu2 %v378_v18  ;;  %v377_v22 = vld [vmem:[%s7697_s2 + $0x40] sm:$0xff]  ;;  %441 = vmatpush.msra.mxu0 %v369_v20  ;;  %v5208_v28 = vld [vmem:[%s7697_s2 + $0xf8] sm:$0xff]  ;;  %v5207_v33 = vld [vmem:[%s7697_s2 + $0xf0] sm:$0xff] }
  0x1b   : > { %343 = vadd.xlane.f32.xlu0 %v342_v2  ;;  %v346_v5 = vmul.f32 32.0, %v5769_v4  ;;  %500 = vmatpush.msra.mxu3 %v382_v19  ;;  %v381_v24 = vld [vmem:[%s7697_s2 + $0x60] sm:$0xff]  ;;  %vm350_vm1 = vweird.f32 %v5769_v4  ;;  %v5194_v34 = vld [vmem:[%s7697_s2 + $0x88] sm:$0xff]  ;;  %v5212_v55 = vld [vmem:[%s7697_s2 + $0x118] sm:$0xff] }
  0x1c   : > { %461 = vmatpush.msra.mxu1 %v373_v21  ;;  %481 = vmatpush.msra.mxu2 %v377_v22  ;;  %v5198_v35 = vld [vmem:[%s7697_s2 + $0xa8] sm:$0xff]  ;;  %v5193_v39 = vld [vmem:[%s7697_s2 + $0x80] sm:$0xff]  ;;  %v5216_v56 = vld [vmem:[%s7697_s2 + $0x138] sm:$0xff] }
  0x1d   : > { %v347_v6 = vsub.f32 1.0, %v346_v5  ;;  %501 = vmatpush.msra.mxu3 %v381_v24  ;;  %518 = vmatpush.msrb.mxu0 %v5196_v25  ;;  %v5202_v36 = vld [vmem:[%s7697_s2 + $0xc8] sm:$0xff]  ;;  %v5197_v40 = vld [vmem:[%s7697_s2 + $0xa0] sm:$0xff]  ;;  %v5220_v57 = vld [vmem:[%s7697_s2 + $0x158] sm:$0xff] }
  0x1e   : > { %538 = vmatpush.msrb.mxu1 %v5200_v26  ;;  %558 = vmatpush.msrb.mxu2 %v5204_v27  ;;  %v5206_v37 = vld [vmem:[%s7697_s2 + $0xe8] sm:$0xff]  ;;  %v5201_v42 = vld [vmem:[%s7697_s2 + $0xc0] sm:$0xff]  ;;  %v5224_v58 = vld [vmem:[%s7697_s2 + $0x178] sm:$0xff] }
  0x1f   : > { %v348_v14 = vmul.f32 %v5769_v4, %v347_v6  ;;  %578 = vmatpush.msrb.mxu3 %v5208_v28  ;;  %519 = vmatpush.msrb.mxu0 %v5195_v29  ;;  %v5205_v43 = vld [vmem:[%s7697_s2 + $0xe0] sm:$0xff]  ;;  %v5211_v59 = vld [vmem:[%s7697_s2 + $0x110] sm:$0xff]  ;;  %v5210_v63 = vld [vmem:[%s7697_s2 + $0x108] sm:$0xff] }
  0x20   : > { %539 = vmatpush.msrb.mxu1 %v5199_v30  ;;  %559 = vmatpush.msrb.mxu2 %v5203_v32  ;;  %v5756_v51 = vld [vmem:[%s7701_s6] ss:$0 sm:$0xff]  ;;  %v5215_v60 = vld [vmem:[%s7697_s2 + $0x130] sm:$0xff]  ;;  %v5214_v1 = vld [vmem:[%s7697_s2 + $0x128] sm:$0xff] }
  0x21   : > { %v349_v23 = vadd.f32 %v5769_v4, %v348_v14  ;;  %579 = vmatpush.msrb.mxu3 %v5207_v33  ;;  %520 = vmatpush.msrb.mxu0 %v5194_v34  ;;  %v5219_v61 = vld [vmem:[%s7697_s2 + $0x150] sm:$0xff]  ;;  %v5218_v2 = vld [vmem:[%s7697_s2 + $0x148] sm:$0xff]  ;;  %v5213_v5 = vld [vmem:[%s7697_s2 + $0x120] sm:$0xff] }
  0x22   : > { %540 = vmatpush.msrb.mxu1 %v5198_v35  ;;  %560 = vmatpush.msrb.mxu2 %v5202_v36  ;;  %v5223_v62 = vld [vmem:[%s7697_s2 + $0x170] sm:$0xff]  ;;  %v5222_v3 = vld [vmem:[%s7697_s2 + $0x168] sm:$0xff]  ;;  %v5217_v6 = vld [vmem:[%s7697_s2 + $0x140] sm:$0xff] }
  0x23   : > { %v6147_v31 = vsel %vm350_vm1, %v5769_v4, %v349_v23  ;;  %580 = vmatpush.msrb.mxu3 %v5206_v37  ;;  %521 = vmatpush.msrb.mxu0 %v5193_v39  ;;  %v5209_v4 = vld [vmem:[%s7697_s2 + $0x100] sm:$0xff]  ;;  %v6259_v20 = vld [vmem:[%s6256_s24 + $0x8] sm:$0xff]  ;;  %v6264_v24 = vld [vmem:[%s6256_s24 + $0x10] sm:$0xff] }
  0x24   : > { %541 = vmatpush.msrb.mxu1 %v5197_v40  ;;  %561 = vmatpush.msrb.mxu2 %v5201_v42  ;;  %v5221_v7 = vld [vmem:[%s7697_s2 + $0x160] sm:$0xff]  ;;  %v6267_v25 = vld [vmem:[%s6256_s24 + $0x18] sm:$0xff] }
  0x25   : > { %581 = vmatpush.msrb.mxu3 %v5205_v43  ;;  %v6274_v33 = vld [vmem:[%s6256_s24] sm:$0xff] }
  0x8e   : > { %v344_v38 = vpop.xlane.xlu0 %343 }
  0x8f   : > { %v352_v41 = vmul.f32 %v6147_v31, %v344_v38 }
  0x91   : > { %v353_v44 = vadd.f32 1e-06, %v352_v41 }
  0x93   : > { %5770 = vrsqrt.f32 %v353_v44  ;;  %vm360_vm3 = vweird.f32 %v353_v44 }
  0x99   : > { %v5771_v45 = vpop.eup %5770 }
  0x9a   : > { %v355_v46 = vmul.f32 %v5771_v45, %v353_v44  ;;  %vm361_vm2 = vweird.f32 %v5771_v45 }
  0x9b   : > { %vm362_vm4 = vmor %vm360_vm3, %vm361_vm2 }
  0x9c   : > { %v356_v47 = vmul.f32 %v5771_v45, %v355_v46 }
  0x9e   : > { %v357_v48 = vmul.f32 0.5, %v356_v47 }
  0xa0   : > { %v358_v49 = vsub.f32 1.5, %v357_v48 }
  0xa2   : > { %v359_v50 = vmul.f32 %v5771_v45, %v358_v49 }
  0xa4   : > { %v363_v52 = vsel %vm362_vm4, %v5771_v45, %v359_v50 }
  0xa5   : > { %v364_v53 = vmul.f32 %v363_v52, %v6076_v0 }
  0xa7   : > { %v368_v54 = vmul.f32 %v5756_v51, %v364_v53 }
  0xa9   : > { %5225 = vmatmul.msk.f32.vlgmr.msra.gmra.mxu0 %vm341_vm0, %v368_v54  ;;  %5226 = vmatmul.msk.f32.vlgmr.msra.gmra.mxu1 %vm341_vm0, %v368_v54 }
  0xaa   : > { %5227 = vmatmul.msk.f32.vlgmr.msra.gmra.mxu2 %vm341_vm0, %v368_v54  ;;  %5228 = vmatmul.msk.f32.vlgmr.msra.gmra.mxu3 %vm341_vm0, %v368_v54 }
  0xab   : > { %598 = vmatpush.msra.mxu0 %v5212_v55  ;;  %618 = vmatpush.msra.mxu1 %v5216_v56 }
  0xac   : > { %638 = vmatpush.msra.mxu2 %v5220_v57  ;;  %658 = vmatpush.msra.mxu3 %v5224_v58  ;;  %v421_v57 = vld [vmem:[%s7698_s3 + $0x10] sm:$0xff] }
  0xad   : > { %599 = vmatpush.msra.mxu0 %v5211_v59  ;;  %619 = vmatpush.msra.mxu1 %v5215_v60 }
  0xae   : > { %639 = vmatpush.msra.mxu2 %v5219_v61  ;;  %659 = vmatpush.msra.mxu3 %v5223_v62 }
  0xaf   : > { %600 = vmatpush.msra.mxu0 %v5210_v63  ;;  %620 = vmatpush.msra.mxu1 %v5214_v1 }
  0xb0   : > { %640 = vmatpush.msra.mxu2 %v5218_v2  ;;  %660 = vmatpush.msra.mxu3 %v5222_v3 }
  0xb1   : > { %5229 = vmatmul.msk.f32.vlgmr.msrb.gmra.mxu0 %vm341_vm0, %v368_v54  ;;  %5230 = vmatmul.msk.f32.vlgmr.msrb.gmra.mxu1 %vm341_vm0, %v368_v54 }
  0xb2   : > { %5231 = vmatmul.msk.f32.vlgmr.msrb.gmra.mxu2 %vm341_vm0, %v368_v54  ;;  %5232 = vmatmul.msk.f32.vlgmr.msrb.gmra.mxu3 %vm341_vm0, %v368_v54 }
  0xb3   : > { %601 = vmatpush.msra.mxu0 %v5209_v4  ;;  %621 = vmatpush.msra.mxu1 %v5213_v5 }
  0xb4   : > { %641 = vmatpush.msra.mxu2 %v5217_v6  ;;  %661 = vmatpush.msra.mxu3 %v5221_v7 }
  0xb9   : > { %5233 = vmatmul.msk.f32.vlgmr.msra.gmra.mxu0 %vm341_vm0, %v368_v54  ;;  %5234 = vmatmul.msk.f32.vlgmr.msra.gmra.mxu1 %vm341_vm0, %v368_v54 }
  0xba   : > { %5235 = vmatmul.msk.f32.vlgmr.msra.gmra.mxu2 %vm341_vm0, %v368_v54  ;;  %5236 = vmatmul.msk.f32.vlgmr.msra.gmra.mxu3 %vm341_vm0, %v368_v54 }
 0x126   : > { %v443_v8 = vpop.f32.mrf.mxu0  ;;  %v463_v9 = vpop.f32.mrf.mxu1 }
 0x12d   : > { %v483_v10 = vpop.f32.mrf.mxu2  ;;  %v503_v11 = vpop.f32.mrf.mxu3 }
 0x12e   : > { %v523_v12 = vpop.f32.mrf.mxu0  ;;  %v543_v13 = vpop.f32.mrf.mxu1 }
 0x12f   : > { %5237 = vmatpush.xpose.msk.msrb.mxu0 %vm666_vm5, %v523_v12  ;;  %5239 = vmatpush.xpose.msk.msrb.mxu1 %vm666_vm5, %v543_v13 }
 0x132   : > { %5238 = vmatmul.msk.f32.vlgmr.msrb.gmra.mxu0 %vm666_vm5, %v443_v8  ;;  %5240 = vmatmul.msk.f32.vlgmr.msrb.gmra.mxu1 %vm666_vm5, %v463_v9 }
 0x135   : > { %v563_v14 = vpop.f32.mrf.mxu2  ;;  %v583_v15 = vpop.f32.mrf.mxu3 }
 0x136   : > { %5241 = vmatpush.xpose.msk.msrb.mxu2 %vm666_vm5, %v563_v14  ;;  %5243 = vmatpush.xpose.msk.msrb.mxu3 %vm666_vm5, %v583_v15  ;;  %v603_v16 = vpop.f32.mrf.mxu0  ;;  %v623_v17 = vpop.f32.mrf.mxu1 }
 0x137   : > { %885 = vmatpush.msra.mxu0 %v603_v16  ;;  %908 = vmatpush.msra.mxu1 %v623_v17 }
 0x139   : > { %5242 = vmatmul.msk.f32.vlgmr.msrb.gmra.mxu2 %vm666_vm5, %v483_v10  ;;  %5244 = vmatmul.msk.f32.vlgmr.msrb.gmra.mxu3 %vm666_vm5, %v503_v11 }
 0x13d   : > { %v643_v18 = vpop.f32.mrf.mxu2  ;;  %v663_v19 = vpop.f32.mrf.mxu3 }
 0x13e   : > { %931 = vmatpush.msra.mxu2 %v643_v18  ;;  %954 = vmatpush.msra.mxu3 %v663_v19 }
 0x140   : > { %1023 = vmatpush.msrb.mxu2 %v421_v57 }
 0x1af   : > { %v716_v21 = vpop.f32.mrf.mxu1  ;;  %v690_v34 = vpop.f32.mrf.mxu0 }
 0x1b0   : > { %v717_v22 = vadd.f32 %v716_v21, %v6259_v20  ;;  %v691_v35 = vadd.f32 %v690_v34, %v6274_v33 }
 0x1b2   : > { %v774_v23 = vsel %vm666_vm5, %v717_v22, -inf  ;;  %v771_v36 = vsel %vm666_vm5, %v691_v35, -inf }
 0x1b3   : > { %775 = vmax.xlane.f32.xlu2 %v774_v23 }
 0x1bc   : > { %v742_v26 = vpop.f32.mrf.mxu2  ;;  %v768_v27 = vpop.f32.mrf.mxu3 }
 0x1bd   : > { %v743_v28 = vadd.f32 %v742_v26, %v6264_v24  ;;  %v769_v29 = vadd.f32 %v768_v27, %v6267_v25 }
 0x1bf   : > { %v780_v30 = vsel %vm666_vm5, %v769_v29, -inf  ;;  %v777_v32 = vsel %vm666_vm5, %v743_v28, -inf }
 0x1c0   : > { %781 = vmax.xlane.f32.xlu1 %v780_v30  ;;  %778 = vmax.xlane.f32.xlu0 %v777_v32 }
 0x1c8   : > { %772 = vmax.xlane.f32.xlu1 %v771_v36 }
 0x226   : > { %v776_v39 = vpop.xlane.xlu2 %775 }
 0x227   : > { %v784_v44 = vsub.f32 %v717_v22, %v776_v39 }
 0x229   : > { %v789_v45 = vmul.f32 1.442695, %v784_v44 }
 0x233   : > { %v782_v37 = vpop.xlane.xlu1 %781  ;;  %v779_v38 = vpop.xlane.xlu0 %778 }
 0x234   : > { %v786_v40 = vsub.f32 %v769_v29, %v782_v37  ;;  %v785_v41 = vsub.f32 %v743_v28, %v779_v38 }
 0x236   : > { %v793_v42 = vmul.f32 1.442695, %v786_v40  ;;  %v791_v43 = vmul.f32 1.442695, %v785_v41 }
 0x238   : > { %5772 = vpow2.f32 %v793_v42 }
 0x239   : > { %5774 = vpow2.f32 %v791_v43 }
 0x23a   : > { %5776 = vpow2.f32 %v789_v45 }
 0x23b   : > { %v773_v46 = vpop.xlane.xlu1 %772 }
 0x23c   : > { %v783_v47 = vsub.f32 %v691_v35, %v773_v46 }
 0x23e   : > { %v5773_v48 = vpop.eup %5772  ;;  %v787_v49 = vmul.f32 1.442695, %v783_v47 }
 0x23f   : > { %v5775_v50 = vpop.eup %5774  ;;  %v804_v51 = vsel %vm666_vm5, %v5773_v48, 0.0 }
 0x240   : > { %5778 = vpow2.f32 %v787_v49  ;;  %805 = vadd.xlane.f32.xlu0 %v804_v51  ;;  %v801_v52 = vsel %vm666_vm5, %v5775_v50, 0.0  ;;  %v6280_v53 = vpop.eup %5776  ;;  %v419_v49 = vld [vmem:[%s7698_s3] sm:$0xff] }
 0x241   : > { %802 = vadd.xlane.f32.xlu2 %v801_v52  ;;  %v798_v56 = vsel %vm666_vm5, %v6280_v53, 0.0  ;;  %977 = vmatpush.msrb.mxu0 %v419_v49 }
 0x246   : > { %v6282_v54 = vpop.eup %5778 }
 0x247   : > { %v795_v55 = vsel %vm666_vm5, %v6282_v54, 0.0 }
 0x248   : > { %796 = vadd.xlane.f32.xlu1 %v795_v55 }
 0x249   : > { %799 = vadd.xlane.f32.xlu2 %v798_v56 }
 0x2b3   : > { %v806_v58 = vpop.xlane.xlu0 %805 }
 0x2b4   : > { %5780 = vrcp.f32 %v806_v58  ;;  %v803_v59 = vpop.xlane.xlu2 %802  ;;  %v863_v4 = vand.u32 2147483648, %v806_v58  ;;  %v861_v7 = vand.u32 2147483647, %v806_v58  ;;  %vm857_vm8 = vweird.f32 %v806_v58 }
 0x2b5   : > { %5782 = vrcp.f32 %v803_v59  ;;  %v848_v8 = vand.u32 2147483648, %v803_v59  ;;  %v846_v10 = vand.u32 2147483647, %v803_v59  ;;  %vm842_vm10 = vweird.f32 %v803_v59 }
 0x2b6   : > { %v864_v13 = vor.u32 1.1754944e-38, %v863_v4  ;;  %vm862_vm11 = vcmp.eq.f32.partialorder %v861_v7, 8.507059e+37  ;;  %v1084_v7 = vld [vmem:[%s7699_s4 + $0x10] sm:$0xff] }
 0x2b7   : > { %v849_v17 = vor.u32 1.1754944e-38, %v848_v8  ;;  %vm847_vm13 = vcmp.eq.f32.partialorder %v846_v10, 8.507059e+37  ;;  %v1082_v8 = vld [vmem:[%s7699_s4] sm:$0xff] }
 0x2ba   : > { %v5781_v60 = vpop.eup %5780 }
 0x2bb   : > { %v5783_v61 = vpop.eup %5782  ;;  %v853_v62 = vmul.f32 %v5781_v60, %v806_v58  ;;  %v797_v63 = vpop.xlane.xlu1 %796  ;;  %vm858_vm6 = vweird.f32 %v5781_v60 }
 0x2bc   : > { %v838_v1 = vmul.f32 %v5783_v61, %v803_v59  ;;  %v800_v2 = vpop.xlane.xlu2 %799  ;;  %5784 = vrcp.f32 %v797_v63  ;;  %vm843_vm7 = vweird.f32 %v5783_v61  ;;  %vm859_vm9 = vmor %vm857_vm8, %vm858_vm6  ;;  %v818_v29 = vand.u32 2147483648, %v797_v63 }
 0x2bd   : > { %v854_v3 = vsub.f32 1.0, %v853_v62  ;;  %5786 = vrcp.f32 %v800_v2  ;;  %vm844_vm12 = vmor %vm842_vm10, %vm843_vm7  ;;  %v833_v32 = vand.u32 2147483648, %v800_v2  ;;  %v816_v35 = vand.u32 2147483647, %v797_v63 }
 0x2be   : > { %v839_v5 = vsub.f32 1.0, %v838_v1  ;;  %v831_v37 = vand.u32 2147483647, %v800_v2  ;;  %vm812_vm1 = vweird.f32 %v797_v63  ;;  %vm827_vm2 = vweird.f32 %v800_v2 }
 0x2bf   : > { %v855_v6 = vmul.f32 %v5781_v60, %v854_v3  ;;  %v819_v40 = vor.u32 1.1754944e-38, %v818_v29  ;;  %v834_v41 = vor.u32 1.1754944e-38, %v833_v32  ;;  %vm817_vm6 = vcmp.eq.f32.partialorder %v816_v35, 8.507059e+37  ;;  %v1089_v29 = vld [vmem:[%s7700_s5 + $0x18] sm:$0xff]  ;;  %v1087_v32 = vld [vmem:[%s7700_s5 + $0x8] sm:$0xff] }
 0x2c0   : > { %v840_v9 = vmul.f32 %v5783_v61, %v839_v5  ;;  %vm832_vm7 = vcmp.eq.f32.partialorder %v831_v37, 8.507059e+37 }
 0x2c1   : > { %v856_v11 = vadd.f32 %v5781_v60, %v855_v6  ;;  %v1085_v6 = vld [vmem:[%s7699_s4 + $0x18] sm:$0xff] }
 0x2c2   : > { %v5785_v12 = vpop.eup %5784  ;;  %v841_v14 = vadd.f32 %v5783_v61, %v840_v9 }
 0x2c3   : > { %v5787_v15 = vpop.eup %5786  ;;  %v860_v16 = vsel %vm859_vm9, %v5781_v60, %v856_v11  ;;  %v808_v18 = vmul.f32 %v5785_v12, %v797_v63  ;;  %vm813_vm14 = vweird.f32 %v5785_v12 }
 0x2c4   : > { %v865_v19 = vsel %vm862_vm11, %v864_v13, %v860_v16  ;;  %v845_v21 = vsel %vm844_vm12, %v5783_v61, %v841_v14  ;;  %v823_v22 = vmul.f32 %v5787_v15, %v800_v2  ;;  %vm828_vm15 = vweird.f32 %v5787_v15  ;;  %vm814_vm3 = vmor %vm812_vm1, %vm813_vm14 }
 0x2c5   : > { %v850_v23 = vsel %vm847_vm13, %v849_v17, %v845_v21  ;;  %v809_v26 = vsub.f32 1.0, %v808_v18  ;;  %v866_v27 = vmul.f32 %v5773_v48, %v865_v19  ;;  %vm829_vm4 = vmor %vm827_vm2, %vm828_vm15  ;;  %v422_v48 = vld [vmem:[%s7698_s3 + $0x18] sm:$0xff]  ;;  %v5757_v18 = vld [vmem:[%s7701_s6 + $0x2] ss:$0 sm:$0xff]  ;;  %vm1131_vm11 = vcmask 523264  }
 0x2c6   : > { %v824_v28 = vsub.f32 1.0, %v823_v22  ;;  %v851_v30 = vmul.f32 %v5775_v50, %v850_v23  ;;  %1046 = vmatpush.msrb.mxu3 %v422_v48  ;;  %v420_v50 = vld [vmem:[%s7698_s3 + $0x8] sm:$0xff]  ;;  %v1093_v23 = vld [vmem:[%s7700_s5 + $0x38] sm:$0xff] }
 0x2c7   : > { %v810_v34 = vmul.f32 %v5785_v12, %v809_v26  ;;  %5248 = vmatmul.msk.f32.vlgmr.msra.gmra.mxu3 %vm666_vm5, %v866_v27  ;;  %1000 = vmatpush.msrb.mxu1 %v420_v50  ;;  %v1092_v26 = vld [vmem:[%s7700_s5 + $0x30] sm:$0xff]  ;;  %v1091_v27 = vld [vmem:[%s7700_s5 + $0x28] sm:$0xff] }
 0x2c8   : > { %v825_v36 = vmul.f32 %v5787_v15, %v824_v28  ;;  %5247 = vmatmul.msk.f32.vlgmr.msra.gmra.mxu2 %vm666_vm5, %v851_v30  ;;  %v1090_v28 = vld [vmem:[%s7700_s5 + $0x20] sm:$0xff]  ;;  %v1088_v30 = vld [vmem:[%s7700_s5 + $0x10] sm:$0xff] }
 0x2c9   : > { %v811_v38 = vadd.f32 %v5785_v12, %v810_v34 }
 0x2ca   : > { %v826_v39 = vadd.f32 %v5787_v15, %v825_v36  ;;  %v1086_v36 = vld [vmem:[%s7700_s5] sm:$0xff] }
 0x2cb   : > { %v815_v42 = vsel %vm814_vm3, %v5785_v12, %v811_v38 }
 0x2cc   : > { %v830_v43 = vsel %vm829_vm4, %v5787_v15, %v826_v39  ;;  %v820_v44 = vsel %vm817_vm6, %v819_v40, %v815_v42 }
 0x2cd   : > { %v835_v45 = vsel %vm832_vm7, %v834_v41, %v830_v43  ;;  %v821_v46 = vmul.f32 %v6282_v54, %v820_v44 }
 0x2ce   : > { %v836_v47 = vmul.f32 %v6280_v53, %v835_v45 }
 0x2cf   : > { %5245 = vmatmul.msk.f32.vlgmr.msra.gmra.mxu0 %vm666_vm5, %v821_v46 }
 0x2d0   : > { %5246 = vmatmul.msk.f32.vlgmr.msra.gmra.mxu1 %vm666_vm5, %v836_v47  ;;  %1109 = vmatpush.msra.mxu0 %v1085_v6  ;;  %v5280_v6 = vld [vmem:[%s7697_s2 + $0x238] sm:$0xff] }
 0x2d1   : > { %1143 = vmatpush.msra.mxu1 %v1093_v23 }
 0x2d2   : > { %1110 = vmatpush.msra.mxu0 %v1084_v7  ;;  %v5300_v7 = vld [vmem:[%s7697_s2 + $0x2d8] sm:$0xff] }
 0x2d3   : > { %1144 = vmatpush.msra.mxu1 %v1092_v26 }
 0x2d5   : > { %1145 = vmatpush.msra.mxu1 %v1091_v27 }
 0x2d7   : > { %1146 = vmatpush.msra.mxu1 %v1090_v28 }
 0x2d9   : > { %1147 = vmatpush.msra.mxu1 %v1089_v29 }
 0x2db   : > { %1148 = vmatpush.msra.mxu1 %v1088_v30 }
 0x2dd   : > { %1149 = vmatpush.msra.mxu1 %v1087_v32  ;;  %v5758_v32 = vld [vmem:[%s7701_s6 + $0x1] ss:$0 sm:$0xff] }
 0x2df   : > { %1150 = vmatpush.msra.mxu1 %v1086_v36 }
 0x34a   : > { %v956_v51 = vpop.f32.mrf.mxu3 }
 0x34b   : > { %v933_v52 = vpop.f32.mrf.mxu2  ;;  %5252 = vmatmul.msk.f32.vlgmr.msrb.gmra.mxu3 %vm666_vm5, %v956_v51  ;;  %v5260_v51 = vld [vmem:[%s7697_s2 + $0x198] sm:$0xff] }
 0x34c   : > { %5251 = vmatmul.msk.f32.vlgmr.msrb.gmra.mxu2 %vm666_vm5, %v933_v52  ;;  %v887_v53 = vpop.f32.mrf.mxu0  ;;  %v5264_v52 = vld [vmem:[%s7697_s2 + $0x1b8] sm:$0xff] }
 0x34d   : > { %v910_v54 = vpop.f32.mrf.mxu1  ;;  %5249 = vmatmul.msk.f32.vlgmr.msrb.gmra.mxu0 %vm666_vm5, %v887_v53  ;;  %v5268_v53 = vld [vmem:[%s7697_s2 + $0x1d8] sm:$0xff]  ;;  %1250 = vmatpush.msra.mxu2 %v5260_v51  ;;  %v5303_v51 = vld [vmem:[%s7697_s2 + $0x2f0] sm:$0xff] }
 0x34e   : > { %5250 = vmatmul.msk.f32.vlgmr.msrb.gmra.mxu1 %vm666_vm5, %v910_v54  ;;  %1270 = vmatpush.msra.mxu3 %v5264_v52  ;;  %v5284_v54 = vld [vmem:[%s7697_s2 + $0x258] sm:$0xff]  ;;  %v5302_v52 = vld [vmem:[%s7697_s2 + $0x2e8] sm:$0xff] }
 0x34f   : > { %1370 = vmatpush.msrb.mxu1 %v5284_v54 }
 0x3ca   : > { %v979_v55 = vpop.f32.mrf.mxu0 }
 0x3cb   : > { %v1002_v56 = vpop.f32.mrf.mxu1  ;;  %v1051_v57 = vsel %vm341_vm0, %v979_v55, 0.0  ;;  %v5259_v55 = vld [vmem:[%s7697_s2 + $0x190] sm:$0xff] }
 0x3cc   : > { %v1052_v58 = vsel %vm341_vm0, %v1002_v56, 0.0  ;;  %v5263_v56 = vld [vmem:[%s7697_s2 + $0x1b0] sm:$0xff]  ;;  %1251 = vmatpush.msra.mxu2 %v5259_v55 }
 0x3cd   : > { %v1053_v59 = vadd.f32 %v1052_v58, %v1051_v57  ;;  %v5267_v57 = vld [vmem:[%s7697_s2 + $0x1d0] sm:$0xff]  ;;  %1271 = vmatpush.msra.mxu3 %v5263_v56 }
 0x3ce   : > { %v1048_v61 = vpop.f32.mrf.mxu3  ;;  %v5283_v58 = vld [vmem:[%s7697_s2 + $0x250] sm:$0xff] }
 0x3cf   : > { %v1025_v60 = vpop.f32.mrf.mxu2  ;;  %v1056_v1 = vsel %vm341_vm0, %v1048_v61, 0.0  ;;  %1371 = vmatpush.msrb.mxu1 %v5283_v58  ;;  %v5266_v61 = vld [vmem:[%s7697_s2 + $0x1c8] sm:$0xff] }
 0x3d0   : > { %v1054_v62 = vsel %vm341_vm0, %v1025_v60, 0.0  ;;  %v5262_v60 = vld [vmem:[%s7697_s2 + $0x1a8] sm:$0xff] }
 0x3d1   : > { %v1055_v63 = vadd.f32 %v1054_v62, %v1053_v59  ;;  %v5258_v59 = vld [vmem:[%s7697_s2 + $0x188] sm:$0xff]  ;;  %1272 = vmatpush.msra.mxu3 %v5262_v60 }
 0x3d2   : > { %1252 = vmatpush.msra.mxu2 %v5258_v59  ;;  %v5282_v62 = vld [vmem:[%s7697_s2 + $0x248] sm:$0xff] }
 0x3d3   : > { %v1057_v2 = vadd.f32 %v1056_v1, %v1055_v63  ;;  %v5257_v63 = vld [vmem:[%s7697_s2 + $0x180] sm:$0xff]  ;;  %1372 = vmatpush.msrb.mxu1 %v5282_v62 }
 0x3d4   : > { %v5261_v1 = vld [vmem:[%s7697_s2 + $0x1a0] sm:$0xff]  ;;  %1253 = vmatpush.msra.mxu2 %v5257_v63 }
 0x3d5   : > { %v6315_v3 = vadd.f32 %v1057_v2, %v6076_v0  ;;  %v1083_v0 = vld [vmem:[%s7699_s4 + $0x8] sm:$0xff]  ;;  %v5265_v2 = vld [vmem:[%s7697_s2 + $0x1c0] sm:$0xff]  ;;  %1273 = vmatpush.msra.mxu3 %v5261_v1 }
 0x3d6   : > { %1111 = vmatpush.msra.mxu0 %v1083_v0  ;;  %v5271_v0 = vld [vmem:[%s7697_s2 + $0x1f0] sm:$0xff] }
 0x3d7   : > { %v1061_v4 = vmul.f32 %v6315_v3, %v6315_v3 }
 0x3d8   : > { %1112 = vmatpush.msra.mxu0 %v1082_v8  ;;  %v5275_v8 = vld [vmem:[%s7697_s2 + $0x210] sm:$0xff] }
 0x3d9   : > { %v1062_v5 = vsel %vm341_vm0, %v1061_v4, 0.0  ;;  %v5272_v4 = vld [vmem:[%s7697_s2 + $0x1f8] sm:$0xff] }
 0x3da   : > { %1063 = vadd.xlane.f32.xlu0 %v1062_v5  ;;  %1290 = vmatpush.msrb.mxu0 %v5268_v53  ;;  %v5276_v5 = vld [vmem:[%s7697_s2 + $0x218] sm:$0xff]  ;;  %v5301_v53 = vld [vmem:[%s7697_s2 + $0x2e0] sm:$0xff] }
 0x3db   : > { %1310 = vmatpush.msrb.mxu2 %v5272_v4  ;;  %1330 = vmatpush.msrb.mxu3 %v5276_v5 }
 0x3dc   : > { %1291 = vmatpush.msrb.mxu0 %v5267_v57 }
 0x3dd   : > { %1311 = vmatpush.msrb.mxu2 %v5271_v0  ;;  %1331 = vmatpush.msrb.mxu3 %v5275_v8 }
 0x3de   : > { %1292 = vmatpush.msrb.mxu0 %v5266_v61 }
 0x3e0   : > { %1293 = vmatpush.msrb.mxu0 %v5265_v2 }
 0x44d   : > { %v1064_v9 = vpop.xlane.xlu0 %1063 }
 0x44e   : > { %v1065_v10 = vmul.f32 %v1064_v9, %v6147_v31  ;;  %v5279_v9 = vld [vmem:[%s7697_s2 + $0x230] sm:$0xff] }
 0x450   : > { %v1066_v11 = vadd.f32 1e-06, %v1065_v10  ;;  %v5299_v10 = vld [vmem:[%s7697_s2 + $0x2d0] sm:$0xff] }
 0x452   : > { %5788 = vrsqrt.f32 %v1066_v11  ;;  %vm1073_vm9 = vweird.f32 %v1066_v11 }
 0x458   : > { %v5789_v12 = vpop.eup %5788 }
 0x459   : > { %v1068_v13 = vmul.f32 %v5789_v12, %v1066_v11  ;;  %vm1074_vm8 = vweird.f32 %v5789_v12  ;;  %v5270_v11 = vld [vmem:[%s7697_s2 + $0x1e8] sm:$0xff] }
 0x45a   : > { %vm1075_vm10 = vmor %vm1073_vm9, %vm1074_vm8  ;;  %1312 = vmatpush.msrb.mxu2 %v5270_v11 }
 0x45b   : > { %v1069_v14 = vmul.f32 %v5789_v12, %v1068_v13  ;;  %v5278_v13 = vld [vmem:[%s7697_s2 + $0x228] sm:$0xff] }
 0x45d   : > { %v1070_v15 = vmul.f32 0.5, %v1069_v14  ;;  %v5298_v14 = vld [vmem:[%s7697_s2 + $0x2c8] sm:$0xff] }
 0x45f   : > { %v1071_v16 = vsub.f32 1.5, %v1070_v15 }
 0x461   : > { %v1072_v17 = vmul.f32 %v5789_v12, %v1071_v16  ;;  %v5269_v16 = vld [vmem:[%s7697_s2 + $0x1e0] sm:$0xff] }
 0x462   : > { %1313 = vmatpush.msrb.mxu2 %v5269_v16 }
 0x463   : > { %v1076_v19 = vsel %vm1075_vm10, %v5789_v12, %v1072_v17  ;;  %v5274_v12 = vld [vmem:[%s7697_s2 + $0x208] sm:$0xff]  ;;  %v5273_v17 = vld [vmem:[%s7697_s2 + $0x200] sm:$0xff] }
 0x464   : > { %v1077_v21 = vmul.f32 %v1076_v19, %v6315_v3  ;;  %1332 = vmatpush.msrb.mxu3 %v5274_v12  ;;  %v5277_v19 = vld [vmem:[%s7697_s2 + $0x220] sm:$0xff] }
 0x466   : > { %v1081_v22 = vmul.f32 %v5757_v18, %v1077_v21  ;;  %v5297_v21 = vld [vmem:[%s7697_s2 + $0x2c0] sm:$0xff]  ;;  %1333 = vmatpush.msrb.mxu3 %v5273_v17 }
 0x468   : > { %5254 = vmatmul.msk.f32.vlgmr.msra.gmra.mxu0 %vm341_vm0, %v1081_v22 }
 0x469   : > { %1350 = vmatpush.msra.mxu0 %v5280_v6 }
 0x46b   : > { %1351 = vmatpush.msra.mxu0 %v5279_v9 }
 0x46d   : > { %1352 = vmatpush.msra.mxu0 %v5278_v13 }
 0x46f   : > { %1353 = vmatpush.msra.mxu0 %v5277_v19 }
 0x4e5   : > { %v1114_v34 = vpop.f32.mrf.mxu0 }
 0x4e6   : > { %1127 = vrot.lane.b32.xlu1 %v1114_v34, %s5971_s23  ;;  %v1118_v35 = vmul.f32 0.044715, %v1114_v34  ;;  %v1117_v43 = vmul.f32 0.5, %v1114_v34 }
 0x4e8   : > { %v1119_v37 = vmul.f32 %v1118_v35, %v1114_v34 }
 0x4ea   : > { %v1120_v38 = vmul.f32 %v1119_v37, %v1114_v34  ;;  %v5288_v37 = vld [vmem:[%s7697_s2 + $0x278] sm:$0xff] }
 0x4ec   : > { %v1121_v39 = vadd.f32 %v1120_v38, %v1114_v34  ;;  %v5292_v38 = vld [vmem:[%s7697_s2 + $0x298] sm:$0xff] }
 0x4ee   : > { %v1122_v40 = vmul.f32 0.7978846, %v1121_v39  ;;  %v5296_v39 = vld [vmem:[%s7697_s2 + $0x2b8] sm:$0xff] }
 0x4f0   : > { %5790 = vtanh.f32 %v1122_v40  ;;  %v5287_v40 = vld [vmem:[%s7697_s2 + $0x270] sm:$0xff] }
 0x4f6   : > { %v5791_v41 = vpop.eup %5790 }
 0x4f7   : > { %v1124_v42 = vadd.f32 1.0, %v5791_v41  ;;  %v5291_v41 = vld [vmem:[%s7697_s2 + $0x290] sm:$0xff] }
 0x4f9   : > { %v1125_v44 = vmul.f32 %v1124_v42, %v1117_v43  ;;  %v5295_v42 = vld [vmem:[%s7697_s2 + $0x2b0] sm:$0xff]  ;;  %v5286_v43 = vld [vmem:[%s7697_s2 + $0x268] sm:$0xff] }
 0x558   : > { %v1128_v45 = vpop.permute.xlu1 %1127 }
 0x559   : > { %v1130_v46 = vmul.f32 %v1128_v45, %v1125_v44  ;;  %v5290_v44 = vld [vmem:[%s7697_s2 + $0x288] sm:$0xff] }
 0x55a   : > { %v5294_v45 = vld [vmem:[%s7697_s2 + $0x2a8] sm:$0xff] }
 0x55b   : > { %5255 = vmatmul.msk.f32.vlgmr.msra.gmra.mxu1 %vm1131_vm11, %v1130_v46  ;;  %v5285_v46 = vld [vmem:[%s7697_s2 + $0x260] sm:$0xff] }
 0x5d8   : > { %v1152_v47 = vpop.f32.mrf.mxu1 }
 0x5d9   : > { %v6365_v48 = vadd.f32 %v1152_v47, %v6315_v3  ;;  %v5281_v3 = vld [vmem:[%s7697_s2 + $0x240] sm:$0xff] }
 0x5da   : > { %1373 = vmatpush.msrb.mxu1 %v5281_v3  ;;  %v5289_v47 = vld [vmem:[%s7697_s2 + $0x280] sm:$0xff] }
 0x5db   : > { %v1158_v49 = vmul.f32 %v6365_v48, %v6365_v48 }
 0x5dc   : > { %1450 = vmatpush.msra.mxu1 %v5300_v7 }
 0x5dd   : > { %v1159_v50 = vsel %vm341_vm0, %v1158_v49, 0.0  ;;  %v5293_v49 = vld [vmem:[%s7697_s2 + $0x2a0] sm:$0xff] }
 0x5de   : > { %1160 = vadd.xlane.f32.xlu2 %v1159_v50  ;;  %1451 = vmatpush.msra.mxu1 %v5299_v10  ;;  %v5304_v50 = vld [vmem:[%s7697_s2 + $0x2f8] sm:$0xff] }
 0x5e0   : > { %1452 = vmatpush.msra.mxu1 %v5298_v14 }
 0x5e2   : > { %1453 = vmatpush.msra.mxu1 %v5297_v21 }
 0x651   : > { %v1161_v15 = vpop.xlane.xlu2 %1160 }
 0x652   : > { %v1162_v18 = vmul.f32 %v1161_v15, %v6147_v31 }
 0x654   : > { %v1163_v22 = vadd.f32 1e-06, %v1162_v18 }
 0x656   : > { %5792 = vrsqrt.f32 %v1163_v22  ;;  %vm1170_vm13 = vweird.f32 %v1163_v22 }
 0x65c   : > { %v5793_v23 = vpop.eup %5792 }
 0x65d   : > { %v1165_v26 = vmul.f32 %v5793_v23, %v1163_v22  ;;  %vm1171_vm12 = vweird.f32 %v5793_v23 }
 0x65e   : > { %vm1172_vm14 = vmor %vm1170_vm13, %vm1171_vm12 }
 0x65f   : > { %v1166_v27 = vmul.f32 %v5793_v23, %v1165_v26 }
 0x661   : > { %v1167_v28 = vmul.f32 0.5, %v1166_v27 }
 0x663   : > { %v1168_v29 = vsub.f32 1.5, %v1167_v28 }
 0x665   : > { %v1169_v30 = vmul.f32 %v5793_v23, %v1168_v29 }
 0x667   : > { %v1173_v34 = vsel %vm1172_vm14, %v5793_v23, %v1169_v30 }
 0x668   : > { %v1174_v35 = vmul.f32 %v1173_v34, %v6365_v48 }
 0x66a   : > { %v1178_v36 = vmul.f32 %v5758_v32, %v1174_v35 }
 0x66c   : > { %5309 = vmatmul.msk.f32.vlgmr.msra.gmra.mxu2 %vm341_vm0, %v1178_v36  ;;  %5310 = vmatmul.msk.f32.vlgmr.msra.gmra.mxu3 %vm341_vm0, %v1178_v36 }
 0x66d   : > { %5311 = vmatmul.msk.f32.vlgmr.msrb.gmra.mxu0 %vm341_vm0, %v1178_v36  ;;  %5315 = vmatmul.msk.f32.vlgmr.msrb.gmra.mxu1 %vm341_vm0, %v1178_v36 }
 0x66e   : > { %1390 = vmatpush.msra.mxu2 %v5288_v37  ;;  %1410 = vmatpush.msra.mxu3 %v5292_v38 }
 0x66f   : > { %1430 = vmatpush.msrb.mxu0 %v5296_v39 }
 0x670   : > { %1391 = vmatpush.msra.mxu2 %v5287_v40  ;;  %1411 = vmatpush.msra.mxu3 %v5291_v41 }
 0x671   : > { %1431 = vmatpush.msrb.mxu0 %v5295_v42 }
 0x672   : > { %1392 = vmatpush.msra.mxu2 %v5286_v43  ;;  %1412 = vmatpush.msra.mxu3 %v5290_v44 }
 0x673   : > { %1432 = vmatpush.msrb.mxu0 %v5294_v45 }
 0x674   : > { %5312 = vmatmul.msk.f32.vlgmr.msrb.gmra.mxu2 %vm341_vm0, %v1178_v36  ;;  %5313 = vmatmul.msk.f32.vlgmr.msrb.gmra.mxu3 %vm341_vm0, %v1178_v36 }
 0x675   : > { %5314 = vmatmul.msk.f32.vlgmr.msra.gmra.mxu0 %vm341_vm0, %v1178_v36  ;;  %5319 = vmatmul.msk.f32.vlgmr.msra.gmra.mxu1 %vm341_vm0, %v1178_v36 }
 0x676   : > { %1393 = vmatpush.msra.mxu2 %v5285_v46  ;;  %1413 = vmatpush.msra.mxu3 %v5289_v47 }
 0x677   : > { %1433 = vmatpush.msrb.mxu0 %v5293_v49 }
 0x678   : > { %1470 = vmatpush.msrb.mxu2 %v5304_v50 }
 0x67a   : > { %1471 = vmatpush.msrb.mxu2 %v5303_v51 }
 0x67c   : > { %1472 = vmatpush.msrb.mxu2 %v5302_v52  ;;  %5317 = vmatmul.msk.f32.vlgmr.msra.gmra.mxu3 %vm341_vm0, %v1178_v36 }
 0x67d   : > { %5316 = vmatmul.msk.f32.vlgmr.msra.gmra.mxu2 %vm341_vm0, %v1178_v36  ;;  %5318 = vmatmul.msk.f32.vlgmr.msrb.gmra.mxu0 %vm341_vm0, %v1178_v36 }
 0x67e   : > { %1473 = vmatpush.msrb.mxu2 %v5301_v53 }
 0x685   : > { %5320 = vmatmul.msk.f32.vlgmr.msrb.gmra.mxu2 %vm341_vm0, %v1178_v36 }
 0x6ea   : > { %v1295_v54 = vpop.f32.mrf.mxu0  ;;  %v1375_v55 = vpop.f32.mrf.mxu1 }
 0x6eb   : > { %5325 = vmatpush.xpose.msk.msrb.mxu1 %vm666_vm5, %v1375_v55 }
 0x6ee   : > { %5326 = vmatmul.msk.f32.vlgmr.msrb.gmra.mxu1 %vm666_vm5, %v1295_v54 }
 0x6ef   : > { %v1255_v56 = vpop.f32.mrf.mxu2  ;;  %v1275_v57 = vpop.f32.mrf.mxu3 }
 0x6f2   : > { %v1355_v58 = vpop.f32.mrf.mxu0  ;;  %v1455_v59 = vpop.f32.mrf.mxu1 }
 0x6f3   : > { %5323 = vmatpush.xpose.msk.msra.mxu0 %vm666_vm5, %v1355_v58  ;;  %1742 = vmatpush.msra.mxu1 %v1455_v59 }
 0x6f6   : > { %5324 = vmatmul.msk.f32.vlgmr.msra.gmra.mxu0 %vm666_vm5, %v1275_v57 }
 0x6f7   : > { %v1315_v60 = vpop.f32.mrf.mxu2  ;;  %v1335_v61 = vpop.f32.mrf.mxu3 }
 0x6f8   : > { %5321 = vmatpush.xpose.msk.msrb.mxu3 %vm666_vm5, %v1335_v61 }
 0x6fa   : > { %v1435_v62 = vpop.f32.mrf.mxu0 }
 0x6fb   : > { %1719 = vmatpush.msrb.mxu0 %v1435_v62  ;;  %5322 = vmatmul.msk.f32.vlgmr.msrb.gmra.mxu3 %vm666_vm5, %v1255_v56 }
 0x6ff   : > { %v1415_v1 = vpop.f32.mrf.mxu3 }
 0x700   : > { %v1395_v63 = vpop.f32.mrf.mxu2  ;;  %1696 = vmatpush.msra.mxu3 %v1415_v1 }
 0x701   : > { %5327 = vmatpush.xpose.msk.msra.mxu2 %vm666_vm5, %v1395_v63 }
 0x704   : > { %5328 = vmatmul.msk.f32.vlgmr.msra.gmra.mxu2 %vm666_vm5, %v1315_v60 }
 0x708   : > { %v1475_v2 = vpop.f32.mrf.mxu2 }
 0x709   : > { %1765 = vmatpush.msrb.mxu2 %v1475_v2 }
 0x76b   : > { %v1553_v11 = vpop.f32.mrf.mxu1 }
 0x76c   : > { %v1554_v12 = vadd.f32 %v1553_v11, %v6264_v24 }
 0x773   : > { %v1527_v6 = vpop.f32.mrf.mxu0 }
 0x774   : > { %v1528_v7 = vadd.f32 %v1527_v6, %v6259_v20 }
 0x776   : > { %v1585_v9 = vsel %vm666_vm5, %v1528_v7, -inf }
 0x77e   : > { %v1501_v3 = vpop.f32.mrf.mxu3 }
 0x77f   : > { %v1502_v4 = vadd.f32 %v1501_v3, %v6274_v33  ;;  %v1588_v33 = vsel %vm666_vm5, %v1554_v12, -inf }
 0x781   : > { %v1582_v5 = vsel %vm666_vm5, %v1502_v4, -inf }
 0x782   : > { %1583 = vmax.xlane.f32.xlu0 %v1582_v5 }
 0x787   : > { %v1579_v0 = vpop.f32.mrf.mxu2 }
 0x788   : > { %v1580_v8 = vadd.f32 %v1579_v0, %v6267_v25 }
 0x78a   : > { %v1591_v10 = vsel %vm666_vm5, %v1580_v8, -inf  ;;  %1586 = vmax.xlane.f32.xlu0 %v1585_v9 }
 0x78b   : > { %1592 = vmax.xlane.f32.xlu2 %v1591_v10 }
 0x793   : > { %1589 = vmax.xlane.f32.xlu2 %v1588_v33 }
 0x7f5   : > { %v1584_v13 = vpop.xlane.xlu0 %1583 }
 0x7f6   : > { %v1594_v14 = vsub.f32 %v1502_v4, %v1584_v13 }
 0x7f8   : > { %v1598_v15 = vmul.f32 1.442695, %v1594_v14 }
 0x7fa   : > { %5794 = vpow2.f32 %v1598_v15 }
 0x7fd   : > { %v1587_v20 = vpop.xlane.xlu0 %1586 }
 0x7fe   : > { %v1593_v16 = vpop.xlane.xlu2 %1592  ;;  %v1595_v17 = vsub.f32 %v1528_v7, %v1587_v20 }
 0x7ff   : > { %v1597_v25 = vsub.f32 %v1580_v8, %v1593_v16 }
 0x800   : > { %v5795_v18 = vpop.eup %5794  ;;  %v1600_v19 = vmul.f32 1.442695, %v1595_v17 }
 0x801   : > { %v1604_v21 = vmul.f32 1.442695, %v1597_v25  ;;  %v1606_v22 = vsel %vm666_vm5, %v5795_v18, 0.0  ;;  %v5305_v25 = vld [vmem:[%s7698_s3 + $0x20] sm:$0xff] }
 0x802   : > { %5796 = vpow2.f32 %v1600_v19  ;;  %1607 = vadd.xlane.f32.xlu0 %v1606_v22  ;;  %1788 = vmatpush.msrb.mxu3 %v5305_v25  ;;  %v5308_v19 = vld [vmem:[%s7698_s3 + $0x38] sm:$0xff]  ;;  %v6580_v22 = vld [vmem:[%s6073_s21 + $0x8] sm:$0xff]  ;;  %v5386_v25 = vld [vmem:[%s7697_s2 + $0x400] sm:$0xff]  ;;  %s5920_s21 = sshra.s32 %s5113_s18, 4  ;;  %s5921_s21 = int_to_ptr.hbm [resolvable:$true] %s5920_s21 }
 0x803   : > { %5798 = vpow2.f32 %v1604_v21  ;;  %1857 = vmatpush.msra.mxu2 %v5308_v19  ;;  %v5307_v21 = vld [vmem:[%s7698_s3 + $0x30] sm:$0xff]  ;;  %v5362_v19 = vld [vmem:[%s7697_s2 + $0x340] sm:$0xff]  ;;  %s5922_s20 = scalar_lea.hbm %s5921_s21, 8  ;;  %p5927_p0 = scmp.lt.s32.totalorder %s5921_s21, %s7703_s8 }
 0x804   : > { %1834 = vmatpush.msrb.mxu1 %v5307_v21  ;;  %p5923_p11 = scmp.ne.s32.totalorder %s5921_s21, %s5922_s20 }
 0x806   : > { %v1590_v24 = vpop.xlane.xlu2 %1589  ;;  %p5924_p12 = pnand %p5923_p11, %p6055_p5 }
 0x807   : > { %v1596_v23 = vsub.f32 %v1554_v12, %v1590_v24  ;;  %v1993_v24 = vmul.f32 %v6580_v22, %v6580_v22 }
 0x808   : > { %v6548_v26 = vpop.eup %5796  ;;  %p5925_p13 = pneg %p5924_p12 }
 0x809   : > { %v1602_v27 = vmul.f32 1.442695, %v1596_v23  ;;  %v6550_v28 = vpop.eup %5798  ;;  %v1609_v29 = vsel %vm666_vm5, %v6548_v26, 0.0  ;;  %v1994_v23 = vsel %vm341_vm0, %v1993_v24, 0.0  ;;  %v5366_v24 = vld [vmem:[%s7697_s2 + $0x360] sm:$0xff] }
 0x80a   : > { %1610 = vadd.xlane.f32.xlu1 %v1609_v29  ;;  %v1615_v30 = vsel %vm666_vm5, %v6550_v28, 0.0 }
 0x80b   : > { %5800 = vpow2.f32 %v1602_v27  ;;  %1616 = vadd.xlane.f32.xlu2 %v1615_v30 }
 0x811   : > { %v6556_v32 = vpop.eup %5800 }
 0x812   : > { %v1612_v34 = vsel %vm666_vm5, %v6556_v32, 0.0 }
 0x813   : > { %1613 = vadd.xlane.f32.xlu0 %v1612_v34  ;;  %v5360_v34 = vld [vmem:[%s7697_s2 + $0x330] sm:$0xff] }
 0x81b   : > { %1995 = vadd.xlane.f32.xlu0 %v1994_v23 }
 0x875   : > { %v1608_v35 = vpop.xlane.xlu0 %1607 }
 0x876   : > { %5802 = vrcp.f32 %v1608_v35  ;;  %v1629_v41 = vand.u32 2147483648, %v1608_v35  ;;  %v1627_v43 = vand.u32 2147483647, %v1608_v35  ;;  %vm1623_vm1 = vweird.f32 %v1608_v35 }
 0x878   : > { %v1630_v46 = vor.u32 1.1754944e-38, %v1629_v41  ;;  %vm1628_vm3 = vcmp.eq.f32.partialorder %v1627_v43, 8.507059e+37  ;;  %v5373_v41 = vld [vmem:[%s7697_s2 + $0x398] sm:$0xff]  ;;  %v5372_v43 = vld [vmem:[%s7697_s2 + $0x390] sm:$0xff] }
 0x87c   : > { %v5803_v36 = vpop.eup %5802 }
 0x87d   : > { %v1619_v37 = vmul.f32 %v5803_v36, %v1608_v35  ;;  %v1611_v38 = vpop.xlane.xlu1 %1610  ;;  %vm1624_vm15 = vweird.f32 %v5803_v36 }
 0x87e   : > { %5804 = vrcp.f32 %v1611_v38  ;;  %v1617_v39 = vpop.xlane.xlu2 %1616  ;;  %vm1625_vm2 = vmor %vm1623_vm1, %vm1624_vm15  ;;  %v1644_v55 = vand.u32 2147483648, %v1611_v38  ;;  %v1642_v59 = vand.u32 2147483647, %v1611_v38  ;;  %vm1638_vm7 = vweird.f32 %v1611_v38 }
 0x87f   : > { %v1620_v40 = vsub.f32 1.0, %v1619_v37  ;;  %5806 = vrcp.f32 %v1617_v39  ;;  %v1674_v60 = vand.u32 2147483648, %v1617_v39  ;;  %v1672_v62 = vand.u32 2147483647, %v1617_v39 }
 0x880   : > { %v1645_v2 = vor.u32 1.1754944e-38, %v1644_v55  ;;  %vm1668_vm9 = vweird.f32 %v1617_v39  ;;  %vm1643_vm10 = vcmp.eq.f32.partialorder %v1642_v59, 8.507059e+37 }
 0x881   : > { %v1621_v42 = vmul.f32 %v5803_v36, %v1620_v40  ;;  %v1675_v5 = vor.u32 1.1754944e-38, %v1674_v60  ;;  %vm1673_vm13 = vcmp.eq.f32.partialorder %v1672_v62, 8.507059e+37  ;;  %v5358_v40 = vld [vmem:[%s7697_s2 + $0x320] sm:$0xff] }
 0x883   : > { %v1622_v44 = vadd.f32 %v5803_v36, %v1621_v42  ;;  %v5355_v42 = vld [vmem:[%s7697_s2 + $0x308] sm:$0xff] }
 0x884   : > { %v5805_v45 = vpop.eup %5804 }
 0x885   : > { %v5807_v47 = vpop.eup %5806  ;;  %v1626_v49 = vsel %vm1625_vm2, %v5803_v36, %v1622_v44  ;;  %v1634_v50 = vmul.f32 %v5805_v45, %v1611_v38  ;;  %vm1639_vm4 = vweird.f32 %v5805_v45  ;;  %v5359_v36 = vld [vmem:[%s7697_s2 + $0x328] sm:$0xff]  ;;  %v5357_v38 = vld [vmem:[%s7697_s2 + $0x318] sm:$0xff]  ;;  %v5354_v44 = vld [vmem:[%s7697_s2 + $0x300] sm:$0xff] }
 0x886   : > { %v1614_v51 = vpop.xlane.xlu0 %1613  ;;  %v1631_v52 = vsel %vm1628_vm3, %v1630_v46, %v1626_v49  ;;  %v1664_v53 = vmul.f32 %v5807_v47, %v1617_v39  ;;  %vm1669_vm6 = vweird.f32 %v5807_v47  ;;  %vm1640_vm8 = vmor %vm1638_vm7, %vm1639_vm4  ;;  %v5356_v39 = vld [vmem:[%s7697_s2 + $0x310] sm:$0xff] }
 0x887   : > { %5808 = vrcp.f32 %v1614_v51  ;;  %v1635_v54 = vsub.f32 1.0, %v1634_v50  ;;  %v1632_v57 = vmul.f32 %v5795_v18, %v1631_v52  ;;  %vm1670_vm12 = vmor %vm1668_vm9, %vm1669_vm6  ;;  %v1659_v11 = vand.u32 2147483648, %v1614_v51  ;;  %v5306_v18 = vld [vmem:[%s7698_s3 + $0x28] sm:$0xff] }
 0x888   : > { %v1665_v56 = vsub.f32 1.0, %v1664_v53  ;;  %v1657_v13 = vand.u32 2147483647, %v1614_v51  ;;  %vm1653_vm15 = vweird.f32 %v1614_v51  ;;  %1811 = vmatpush.msra.mxu0 %v5306_v18 }
 0x889   : > { %v1636_v58 = vmul.f32 %v5805_v45, %v1635_v54  ;;  %5329 = vmatmul.msk.f32.vlgmr.msra.gmra.mxu3 %vm666_vm5, %v1632_v57  ;;  %v1660_v15 = vor.u32 1.1754944e-38, %v1659_v11  ;;  %v5389_v11 = vld [vmem:[%s7697_s2 + $0x418] sm:$0xff] }
 0x88a   : > { %v1666_v61 = vmul.f32 %v5807_v47, %v1665_v56  ;;  %vm1658_vm2 = vcmp.eq.f32.partialorder %v1657_v13, 8.507059e+37  ;;  %v5369_v13 = vld [vmem:[%s7697_s2 + $0x378] sm:$0xff] }
 0x88b   : > { %v1637_v63 = vadd.f32 %v5805_v45, %v1636_v58 }
 0x88c   : > { %v1667_v3 = vadd.f32 %v5807_v47, %v1666_v61  ;;  %v5759_v61 = vld [vmem:[%s7701_s6 + $0x5] ss:$0 sm:$0xff] }
 0x88d   : > { %v5809_v1 = vpop.eup %5808  ;;  %v1641_v4 = vsel %vm1640_vm8, %v5805_v45, %v1637_v63  ;;  %v5371_v45 = vld [vmem:[%s7697_s2 + $0x388] sm:$0xff] }
 0x88e   : > { %v1649_v6 = vmul.f32 %v5809_v1, %v1614_v51  ;;  %v1646_v7 = vsel %vm1643_vm10, %v1645_v2, %v1641_v4  ;;  %v1671_v0 = vsel %vm1670_vm12, %v5807_v47, %v1667_v3  ;;  %vm1654_vm14 = vweird.f32 %v5809_v1  ;;  %v1996_v30 = vpop.xlane.xlu0 %1995  ;;  %v5370_v47 = vld [vmem:[%s7697_s2 + $0x380] sm:$0xff] }
 0x88f   : > { %v1676_v8 = vsel %vm1673_vm13, %v1675_v5, %v1671_v0  ;;  %v1647_v10 = vmul.f32 %v6548_v26, %v1646_v7  ;;  %vm1655_vm1 = vmor %vm1653_vm15, %vm1654_vm14  ;;  %v1997_v35 = vmul.f32 %v1996_v30, %v6147_v31 }
 0x890   : > { %v1650_v9 = vsub.f32 1.0, %v1649_v6  ;;  %v1677_v12 = vmul.f32 %v6550_v28, %v1676_v8  ;;  %v5340_v8 = vld [vmem:[%s7699_s4 + $0x30] sm:$0xff] }
 0x891   : > { %5330 = vmatmul.msk.f32.vlgmr.msrb.gmra.mxu0 %vm666_vm5, %v1647_v10  ;;  %v1998_v37 = vadd.f32 1e-06, %v1997_v35  ;;  %v5338_v10 = vld [vmem:[%s7699_s4 + $0x20] sm:$0xff] }
 0x892   : > { %v1651_v33 = vmul.f32 %v5809_v1, %v1650_v9  ;;  %5332 = vmatmul.msk.f32.vlgmr.msrb.gmra.mxu2 %vm666_vm5, %v1677_v12  ;;  %v5339_v9 = vld [vmem:[%s7699_s4 + $0x28] sm:$0xff]  ;;  %v5388_v12 = vld [vmem:[%s7697_s2 + $0x410] sm:$0xff] }
 0x893   : > { %5810 = vrsqrt.f32 %v1998_v37  ;;  %vm2005_vm3 = vweird.f32 %v1998_v37 }
 0x894   : > { %v1652_v14 = vadd.f32 %v5809_v1, %v1651_v33  ;;  %v5365_v33 = vld [vmem:[%s7697_s2 + $0x358] sm:$0xff] }
 0x896   : > { %v1656_v20 = vsel %vm1655_vm1, %v5809_v1, %v1652_v14  ;;  %v5387_v14 = vld [vmem:[%s7697_s2 + $0x408] sm:$0xff] }
 0x897   : > { %v1661_v16 = vsel %vm1658_vm2, %v1660_v15, %v1656_v20  ;;  %v5364_v15 = vld [vmem:[%s7697_s2 + $0x350] sm:$0xff] }
 0x898   : > { %v1662_v17 = vmul.f32 %v6556_v32, %v1661_v16  ;;  %v5361_v32 = vld [vmem:[%s7697_s2 + $0x338] sm:$0xff]  ;;  %v5368_v20 = vld [vmem:[%s7697_s2 + $0x370] sm:$0xff]  ;;  %v5363_v16 = vld [vmem:[%s7697_s2 + $0x348] sm:$0xff] }
 0x899   : > { %2105 = vmatpush.msrb.mxu2 %v5361_v32  ;;  %v5811_v46 = vpop.eup %5810 }
 0x89a   : > { %5331 = vmatmul.msk.f32.vlgmr.msra.gmra.mxu1 %vm666_vm5, %v1662_v17  ;;  %v2000_v49 = vmul.f32 %v5811_v46, %v1998_v37  ;;  %vm2006_vm4 = vweird.f32 %v5811_v46  ;;  %v5367_v17 = vld [vmem:[%s7697_s2 + $0x368] sm:$0xff] }
 0x89b   : > { %2106 = vmatpush.msrb.mxu2 %v5360_v34  ;;  %2085 = vmatpush.msra.mxu1 %v5357_v38  ;;  %vm2007_vm6 = vmor %vm2005_vm3, %vm2006_vm4 }
 0x89c   : > { %v2001_v50 = vmul.f32 %v5811_v46, %v2000_v49  ;;  %v5374_v49 = vld [vmem:[%s7697_s2 + $0x3a0] sm:$0xff] }
 0x89d   : > { %2107 = vmatpush.msrb.mxu2 %v5359_v36  ;;  %2086 = vmatpush.msra.mxu1 %v5356_v39 }
 0x89e   : > { %v2002_v52 = vmul.f32 0.5, %v2001_v50  ;;  %v5393_v50 = vld [vmem:[%s7697_s2 + $0x438] sm:$0xff] }
 0x89f   : > { %2108 = vmatpush.msrb.mxu2 %v5358_v40  ;;  %2087 = vmatpush.msra.mxu1 %v5355_v42 }
 0x8a0   : > { %v2003_v56 = vsub.f32 1.5, %v2002_v52  ;;  %v5392_v52 = vld [vmem:[%s7697_s2 + $0x430] sm:$0xff] }
 0x8a1   : > { %2088 = vmatpush.msra.mxu1 %v5354_v44 }
 0x8a2   : > { %v2004_v59 = vmul.f32 %v5811_v46, %v2003_v56 }
 0x8a4   : > { %v2008_v62 = vsel %vm2007_vm6, %v5811_v46, %v2004_v59  ;;  %v5376_v46 = vld [vmem:[%s7697_s2 + $0x3b0] sm:$0xff] }
 0x8a5   : > { %v2009_v2 = vmul.f32 %v6580_v22, %v2008_v62  ;;  %v5348_v62 = vld [vmem:[%s7700_s5 + $0x70] sm:$0xff] }
 0x8a7   : > { %v6634_v5 = vmul.f32 %v5759_v61, %v2009_v2  ;;  %v5349_v61 = vld [vmem:[%s7700_s5 + $0x78] sm:$0xff]  ;;  %v331_v2 = vld [vmem:[%s6256_s24 + $0x20] sm:$0xff] }
 0x8a8   : > { %1955 = vmatpush.msrb.mxu0 %v5349_v61 }
 0x8aa   : > { %1956 = vmatpush.msrb.mxu0 %v5348_v62 }
 0x90c   : > { %v1698_v26 = vpop.f32.mrf.mxu3 }
 0x90d   : > { %5333 = vmatmul.msk.f32.vlgmr.msrb.gmra.mxu3 %vm666_vm5, %v1698_v26  ;;  %v5385_v26 = vld [vmem:[%s7697_s2 + $0x3f8] sm:$0xff] }
 0x90e   : > { %v1721_v27 = vpop.f32.mrf.mxu0 }
 0x90f   : > { %5334 = vmatmul.msk.f32.vlgmr.msra.gmra.mxu0 %vm666_vm5, %v1721_v27  ;;  %v5384_v27 = vld [vmem:[%s7697_s2 + $0x3f0] sm:$0xff] }
 0x915   : > { %v1767_v28 = vpop.f32.mrf.mxu2 }
 0x916   : > { %5336 = vmatmul.msk.f32.vlgmr.msra.gmra.mxu2 %vm666_vm5, %v1767_v28  ;;  %v5383_v28 = vld [vmem:[%s7697_s2 + $0x3e8] sm:$0xff] }
 0x917   : > { %v1744_v29 = vpop.f32.mrf.mxu1  ;;  %2165 = vmatpush.msra.mxu2 %v5373_v41  ;;  %v5760_v41 = vld [vmem:[%s7701_s6 + $0x3] ss:$0 sm:$0xff] }
 0x918   : > { %5335 = vmatmul.msk.f32.vlgmr.msrb.gmra.mxu1 %vm666_vm5, %v1744_v29  ;;  %v5382_v29 = vld [vmem:[%s7697_s2 + $0x3e0] sm:$0xff] }
 0x919   : > { %2166 = vmatpush.msra.mxu2 %v5372_v43  ;;  %2145 = vmatpush.msrb.mxu1 %v5369_v13 }
 0x91b   : > { %2167 = vmatpush.msra.mxu2 %v5371_v45  ;;  %2146 = vmatpush.msrb.mxu1 %v5368_v20  ;;  %v5377_v45 = vld [vmem:[%s7697_s2 + $0x3b8] sm:$0xff]  ;;  %v5379_v20 = vld [vmem:[%s7697_s2 + $0x3c8] sm:$0xff] }
 0x91d   : > { %2168 = vmatpush.msra.mxu2 %v5370_v47  ;;  %2147 = vmatpush.msrb.mxu1 %v5367_v17  ;;  %v5375_v47 = vld [vmem:[%s7697_s2 + $0x3a8] sm:$0xff]  ;;  %v5378_v17 = vld [vmem:[%s7697_s2 + $0x3c0] sm:$0xff] }
 0x91e   : > { %5407 = vmatmul.msk.f32.vlgmr.msrb.gmra.mxu2 %vm341_vm0, %v6634_v5 }
 0x91f   : > { %2245 = vmatpush.msrb.mxu2 %v5389_v11  ;;  %2148 = vmatpush.msrb.mxu1 %v5366_v24 }
 0x920   : > { %5406 = vmatmul.msk.f32.vlgmr.msra.gmra.mxu1 %vm341_vm0, %v6634_v5 }
 0x921   : > { %2246 = vmatpush.msrb.mxu2 %v5388_v12  ;;  %2225 = vmatpush.msra.mxu1 %v5385_v26 }
 0x923   : > { %2247 = vmatpush.msrb.mxu2 %v5387_v14  ;;  %2226 = vmatpush.msra.mxu1 %v5384_v27  ;;  %v5381_v14 = vld [vmem:[%s7697_s2 + $0x3d8] sm:$0xff] }
 0x925   : > { %2248 = vmatpush.msrb.mxu2 %v5386_v25  ;;  %2227 = vmatpush.msra.mxu1 %v5383_v28  ;;  %v5397_v28 = vld [vmem:[%s7697_s2 + $0x458] sm:$0xff] }
 0x926   : > { %5410 = vmatmul.msk.f32.vlgmr.msra.gmra.mxu2 %vm341_vm0, %v6634_v5 }
 0x927   : > { %2228 = vmatpush.msra.mxu1 %v5382_v29  ;;  %v5396_v29 = vld [vmem:[%s7697_s2 + $0x450] sm:$0xff] }
 0x928   : > { %5409 = vmatmul.msk.f32.vlgmr.msrb.gmra.mxu1 %vm341_vm0, %v6634_v5 }
 0x92e   : > { %5414 = vmatmul.msk.f32.vlgmr.msrb.gmra.mxu2 %vm341_vm0, %v6634_v5 }
 0x930   : > { %5413 = vmatmul.msk.f32.vlgmr.msra.gmra.mxu1 %vm341_vm0, %v6634_v5 }
 0x98c   : > { %v1813_v53 = vpop.f32.mrf.mxu0 }
 0x98d   : > { %v1863_v57 = vsel %vm341_vm0, %v1813_v53, 0.0  ;;  %v5400_v53 = vld [vmem:[%s7697_s2 + $0x470] sm:$0xff] }
 0x990   : > { %v1790_v51 = vpop.f32.mrf.mxu3 }
 0x991   : > { %v1862_v54 = vsel %vm341_vm0, %v1790_v51, 0.0  ;;  %v5401_v51 = vld [vmem:[%s7697_s2 + $0x478] sm:$0xff] }
 0x992   : > { %v1864_v60 = vadd.f32 %v1863_v57, %v1862_v54  ;;  %2305 = vmatpush.msrb.mxu1 %v5401_v51  ;;  %v5391_v54 = vld [vmem:[%s7697_s2 + $0x428] sm:$0xff]  ;;  %v5390_v57 = vld [vmem:[%s7697_s2 + $0x420] sm:$0xff] }
 0x994   : > { %2306 = vmatpush.msrb.mxu1 %v5400_v53 }
 0x995   : > { %v1836_v55 = vpop.f32.mrf.mxu1 }
 0x996   : > { %v1865_v58 = vsel %vm341_vm0, %v1836_v55, 0.0  ;;  %v5399_v55 = vld [vmem:[%s7697_s2 + $0x468] sm:$0xff] }
 0x997   : > { %v1866_v63 = vadd.f32 %v1865_v58, %v1864_v60  ;;  %v5398_v58 = vld [vmem:[%s7697_s2 + $0x460] sm:$0xff]  ;;  %2307 = vmatpush.msrb.mxu1 %v5399_v55 }
 0x999   : > { %v1859_v1 = vpop.f32.mrf.mxu2  ;;  %2308 = vmatpush.msrb.mxu1 %v5398_v58 }
 0x99a   : > { %v1867_v3 = vsel %vm341_vm0, %v1859_v1, 0.0  ;;  %5417 = vmatmul.msk.f32.vlgmr.msrb.gmra.mxu1 %vm341_vm0, %v6634_v5  ;;  %v5346_v1 = vld [vmem:[%s7700_s5 + $0x60] sm:$0xff] }
 0x99b   : > { %v1868_v4 = vadd.f32 %v1867_v3, %v1866_v63  ;;  %v5347_v63 = vld [vmem:[%s7700_s5 + $0x68] sm:$0xff]  ;;  %v5345_v3 = vld [vmem:[%s7700_s5 + $0x58] sm:$0xff] }
 0x99c   : > { %1957 = vmatpush.msrb.mxu0 %v5347_v63 }
 0x99d   : > { %v6637_v6 = vadd.f32 %v1868_v4, %v6365_v48  ;;  %v5341_v48 = vld [vmem:[%s7699_s4 + $0x38] sm:$0xff]  ;;  %v2090_v40 = vpop.f32.mrf.mxu1 }
 0x99e   : > { %1922 = vmatpush.msra.mxu3 %v5341_v48  ;;  %1958 = vmatpush.msrb.mxu0 %v5346_v1  ;;  %v5343_v48 = vld [vmem:[%s7700_s5 + $0x48] sm:$0xff] }
 0x99f   : > { %v1872_v7 = vmul.f32 %v6637_v6, %v6637_v6 }
 0x9a0   : > { %1923 = vmatpush.msra.mxu3 %v5340_v8  ;;  %1959 = vmatpush.msrb.mxu0 %v5345_v3 }
 0x9a1   : > { %v1873_v0 = vsel %vm341_vm0, %v1872_v7, 0.0  ;;  %v6713_v32 = vpop.f32.mrf.mxu2  ;;  %v5344_v7 = vld [vmem:[%s7700_s5 + $0x50] sm:$0xff] }
 0x9a2   : > { %1874 = vadd.xlane.f32.xlu2 %v1873_v0  ;;  %1924 = vmatpush.msra.mxu3 %v5339_v9 }
 0x9a3   : > { %1960 = vmatpush.msrb.mxu0 %v5344_v7 }
 0x9a4   : > { %1925 = vmatpush.msra.mxu3 %v5338_v10 }
 0x9a5   : > { %v2150_v56 = vpop.f32.mrf.mxu1  ;;  %1961 = vmatpush.msrb.mxu0 %v5343_v48 }
 0x9a6   : > { %2125 = vmatpush.msrb.mxu3 %v5365_v33  ;;  %v5342_v33 = vld [vmem:[%s7700_s5 + $0x40] sm:$0xff] }
 0x9a7   : > { %1962 = vmatpush.msrb.mxu0 %v5342_v33 }
 0x9a8   : > { %2126 = vmatpush.msrb.mxu3 %v5364_v15  ;;  %v5380_v15 = vld [vmem:[%s7697_s2 + $0x3d0] sm:$0xff] }
 0x9a9   : > { %v2170_v38 = vpop.f32.mrf.mxu2  ;;  %2205 = vmatpush.msra.mxu0 %v5381_v14 }
 0x9aa   : > { %2127 = vmatpush.msrb.mxu3 %v5363_v16  ;;  %5418 = vmatpush.xpose.msk.msra.mxu2 %vm666_vm5, %v2170_v38 }
 0x9ab   : > { %2206 = vmatpush.msra.mxu0 %v5380_v15 }
 0x9ac   : > { %2128 = vmatpush.msrb.mxu3 %v5362_v19 }
 0x9ad   : > { %5419 = vmatmul.msk.f32.vlgmr.msra.gmra.mxu2 %vm666_vm5, %v2090_v40  ;;  %v2230_v60 = vpop.f32.mrf.mxu1  ;;  %2207 = vmatpush.msra.mxu0 %v5379_v20 }
 0x9ae   : > { %5424 = vmatpush.xpose.msk.msra.mxu1 %vm666_vm5, %v2230_v60 }
 0x9af   : > { %2208 = vmatpush.msra.mxu0 %v5378_v17 }
 0x9b1   : > { %v2250_v59 = vpop.f32.mrf.mxu2  ;;  %5425 = vmatmul.msk.f32.vlgmr.msra.gmra.mxu1 %vm666_vm5, %v2150_v56 }
 0x9b2   : > { %2531 = vmatpush.msrb.mxu2 %v2250_v59 }
 0xa15   : > { %v1875_v18 = vpop.xlane.xlu2 %1874 }
 0xa16   : > { %v1876_v21 = vmul.f32 %v1875_v18, %v6147_v31 }
 0xa18   : > { %v1877_v23 = vadd.f32 1e-06, %v1876_v21 }
 0xa1a   : > { %5812 = vrsqrt.f32 %v1877_v23  ;;  %vm1884_vm8 = vweird.f32 %v1877_v23 }
 0xa20   : > { %v5813_v30 = vpop.eup %5812 }
 0xa21   : > { %v1879_v34 = vmul.f32 %v5813_v30, %v1877_v23  ;;  %vm1885_vm7 = vweird.f32 %v5813_v30 }
 0xa22   : > { %vm1886_vm9 = vmor %vm1884_vm8, %vm1885_vm7 }
 0xa23   : > { %v1880_v35 = vmul.f32 %v5813_v30, %v1879_v34  ;;  %v2310_v34 = vpop.f32.mrf.mxu1 }
 0xa24   : > { %2600 = vmatpush.msrb.mxu1 %v2310_v34 }
 0xa25   : > { %v1881_v36 = vmul.f32 0.5, %v1880_v35 }
 0xa27   : > { %v1882_v37 = vsub.f32 1.5, %v1881_v36  ;;  %v334_v36 = vld [vmem:[%s6256_s24 + $0x38] sm:$0xff] }
 0xa29   : > { %v1883_v39 = vmul.f32 %v5813_v30, %v1882_v37 }
 0xa2b   : > { %v1887_v42 = vsel %vm1886_vm9, %v5813_v30, %v1883_v39  ;;  %v5395_v30 = vld [vmem:[%s7697_s2 + $0x448] sm:$0xff] }
 0xa2c   : > { %v1888_v43 = vmul.f32 %v1887_v42, %v6637_v6 }
 0xa2e   : > { %v1892_v44 = vmul.f32 %v5760_v41, %v1888_v43  ;;  %v2414_v37 = vpop.f32.mrf.mxu1 }
 0xa2f   : > { %v2415_v38 = vadd.f32 %v2414_v37, %v334_v36 }
 0xa30   : > { %5350 = vmatmul.msk.f32.vlgmr.msra.gmra.mxu3 %vm341_vm0, %v1892_v44  ;;  %v2336_v4 = vpop.f32.mrf.mxu2 }
 0xa31   : > { %2185 = vmatpush.msra.mxu3 %v5377_v45  ;;  %v2337_v0 = vadd.f32 %v2336_v4, %v331_v2  ;;  %v2426_v39 = vsel %vm666_vm5, %v2415_v38, -inf  ;;  %v332_v45 = vld [vmem:[%s6256_s24 + $0x28] sm:$0xff]  ;;  %v333_v4 = vld [vmem:[%s6256_s24 + $0x30] sm:$0xff] }
 0xa33   : > { %2186 = vmatpush.msra.mxu3 %v5376_v46  ;;  %v2417_v8 = vsel %vm666_vm5, %v2337_v0, -inf }
 0xa34   : > { %2418 = vmax.xlane.f32.xlu0 %v2417_v8 }
 0xa35   : > { %2187 = vmatpush.msra.mxu3 %v5375_v47 }
 0xa37   : > { %2188 = vmatpush.msra.mxu3 %v5374_v49 }
 0xa38   : > { %5408 = vmatmul.msk.f32.vlgmr.msrb.gmra.mxu3 %vm341_vm0, %v6634_v5 }
 0xa39   : > { %2265 = vmatpush.msrb.mxu3 %v5393_v50 }
 0xa3b   : > { %2266 = vmatpush.msrb.mxu3 %v5392_v52 }
 0xa3d   : > { %2267 = vmatpush.msrb.mxu3 %v5391_v54 }
 0xa3f   : > { %2268 = vmatpush.msrb.mxu3 %v5390_v57 }
 0xa40   : > { %5411 = vmatmul.msk.f32.vlgmr.msra.gmra.mxu3 %vm341_vm0, %v6634_v5 }
 0xa48   : > { %5415 = vmatmul.msk.f32.vlgmr.msrb.gmra.mxu3 %vm341_vm0, %v6634_v5 }
 0xaa7   : > { %v2419_v40 = vpop.xlane.xlu0 %2418 }
 0xaa8   : > { %v2429_v41 = vsub.f32 %v2337_v0, %v2419_v40 }
 0xaaa   : > { %v2433_v42 = vmul.f32 1.442695, %v2429_v41 }
 0xab3   : > { %v1927_v9 = vpop.f32.mrf.mxu3 }
 0xab4   : > { %1940 = vrot.lane.b32.xlu2 %v1927_v9, %s5971_s23  ;;  %v1931_v12 = vmul.f32 0.044715, %v1927_v9  ;;  %v1930_v24 = vmul.f32 0.5, %v1927_v9 }
 0xab6   : > { %v1932_v13 = vmul.f32 %v1931_v12, %v1927_v9 }
 0xab8   : > { %v1933_v16 = vmul.f32 %v1932_v13, %v1927_v9 }
 0xaba   : > { %v1934_v25 = vadd.f32 %v1933_v16, %v1927_v9 }
 0xabb   : > { %v2130_v10 = vpop.f32.mrf.mxu3 }
 0xabc   : > { %v1935_v18 = vmul.f32 0.7978846, %v1934_v25 }
 0xabe   : > { %5814 = vtanh.f32 %v1935_v18 }
 0xabf   : > { %5816 = vpow2.f32 %v2433_v42 }
 0xac3   : > { %v2190_v11 = vpop.f32.mrf.mxu3 }
 0xac4   : > { %5420 = vmatpush.xpose.msk.msra.mxu3 %vm666_vm5, %v2190_v11  ;;  %v5815_v19 = vpop.eup %5814  ;;  %v5402_v11 = vld [vmem:[%s7698_s3 + $0x40] sm:$0xff] }
 0xac5   : > { %v1937_v21 = vadd.f32 1.0, %v5815_v19  ;;  %v5817_v43 = vpop.eup %5816  ;;  %2623 = vmatpush.msra.mxu2 %v5402_v11 }
 0xac6   : > { %v2441_v44 = vsel %vm666_vm5, %v5817_v43, 0.0 }
 0xac7   : > { %5421 = vmatmul.msk.f32.vlgmr.msra.gmra.mxu3 %vm666_vm5, %v6713_v32  ;;  %v1938_v23 = vmul.f32 %v1937_v21, %v1930_v24  ;;  %v5394_v32 = vld [vmem:[%s7697_s2 + $0x440] sm:$0xff]  ;;  %2442 = vadd.xlane.f32.xlu1 %v2441_v44 }
 0xacb   : > { %v2270_v35 = vpop.f32.mrf.mxu3 }
 0xacc   : > { %2554 = vmatpush.msrb.mxu3 %v2270_v35 }
 0xadd   : > { %2427 = vmax.xlane.f32.xlu2 %v2426_v39 }
 0xb0e   : > { %v1941_v26 = vpop.permute.xlu2 %1940 }
 0xb0f   : > { %v1943_v27 = vmul.f32 %v1941_v26, %v1938_v23 }
 0xb11   : > { %5351 = vmatmul.msk.f32.vlgmr.msrb.gmra.mxu0 %vm1131_vm11, %v1943_v27 }
 0xb12   : > { %2285 = vmatpush.msrb.mxu0 %v5397_v28 }
 0xb14   : > { %2286 = vmatpush.msrb.mxu0 %v5396_v29 }
 0xb16   : > { %2287 = vmatpush.msrb.mxu0 %v5395_v30 }
 0xb18   : > { %2288 = vmatpush.msrb.mxu0 %v5394_v32 }
 0xb19   : > { %5412 = vmatmul.msk.f32.vlgmr.msra.gmra.mxu0 %vm341_vm0, %v6634_v5 }
 0xb21   : > { %5416 = vmatmul.msk.f32.vlgmr.msrb.gmra.mxu0 %vm341_vm0, %v6634_v5 }
 0xb3a   : > { %v2443_v52 = vpop.xlane.xlu1 %2442 }
 0xb3b   : > { %5818 = vrcp.f32 %v2443_v52  ;;  %v2464_v55 = vand.u32 2147483648, %v2443_v52  ;;  %vm2458_vm10 = vweird.f32 %v2443_v52  ;;  %v2462_v57 = vand.u32 2147483647, %v2443_v52 }
 0xb3d   : > { %v2465_v59 = vor.u32 1.1754944e-38, %v2464_v55  ;;  %vm2463_vm14 = vcmp.eq.f32.partialorder %v2462_v57, 8.507059e+37 }
 0xb41   : > { %v5819_v53 = vpop.eup %5818 }
 0xb42   : > { %v2454_v54 = vmul.f32 %v5819_v53, %v2443_v52  ;;  %vm2459_vm12 = vweird.f32 %v5819_v53  ;;  %v5405_v52 = vld [vmem:[%s7698_s3 + $0x58] sm:$0xff] }
 0xb43   : > { %vm2460_vm13 = vmor %vm2458_vm10, %vm2459_vm12  ;;  %2692 = vmatpush.msra.mxu1 %v5405_v52  ;;  %v5451_v52 = vld [vmem:[%s7697_s2 + $0x700] sm:$0xff] }
 0xb44   : > { %v2455_v56 = vsub.f32 1.0, %v2454_v54 }
 0xb46   : > { %v2456_v58 = vmul.f32 %v5819_v53, %v2455_v56 }
 0xb48   : > { %v2457_v60 = vadd.f32 %v5819_v53, %v2456_v58 }
 0xb4a   : > { %v2362_v46 = vpop.f32.mrf.mxu3  ;;  %v2461_v61 = vsel %vm2460_vm13, %v5819_v53, %v2457_v60  ;;  %v5404_v53 = vld [vmem:[%s7698_s3 + $0x50] sm:$0xff] }
 0xb4b   : > { %v2363_v47 = vadd.f32 %v2362_v46, %v332_v45  ;;  %v2466_v62 = vsel %vm2463_vm14, %v2465_v59, %v2461_v61 }
 0xb4c   : > { %v2467_v63 = vmul.f32 %v5817_v43, %v2466_v62 }
 0xb4d   : > { %v2420_v49 = vsel %vm666_vm5, %v2363_v47, -inf }
 0xb4e   : > { %2421 = vmax.xlane.f32.xlu0 %v2420_v49  ;;  %5426 = vmatmul.msk.f32.vlgmr.msrb.gmra.mxu2 %vm666_vm5, %v2467_v63 }
 0xb50   : > { %v2428_v7 = vpop.xlane.xlu2 %2427 }
 0xb51   : > { %v2432_v8 = vsub.f32 %v2415_v38, %v2428_v7 }
 0xb8e   : > { %v1964_v5 = vpop.f32.mrf.mxu0 }
 0xb8f   : > { %v6844_v14 = vadd.f32 %v1964_v5, %v6637_v6 }
 0xb91   : > { %v1970_v20 = vmul.f32 %v6844_v14, %v6844_v14 }
 0xb93   : > { %v1971_v16 = vsel %vm341_vm0, %v1970_v20, 0.0 }
 0xb96   : > { %v2210_v50 = vpop.f32.mrf.mxu0 }
 0xb97   : > { %5422 = vmatpush.xpose.msk.msra.mxu0 %vm666_vm5, %v2210_v50  ;;  %v5403_v50 = vld [vmem:[%s7698_s3 + $0x48] sm:$0xff] }
 0xb98   : > { %2646 = vmatpush.msra.mxu3 %v5403_v50  ;;  %v5464_v50 = vld [vmem:[%s7697_s2 + $0x768] sm:$0xff] }
 0xb9a   : > { %5423 = vmatmul.msk.f32.vlgmr.msra.gmra.mxu0 %vm666_vm5, %v2130_v10  ;;  %v2439_v10 = vmul.f32 1.442695, %v2432_v8 }
 0xb9e   : > { %v2290_v51 = vpop.f32.mrf.mxu0 }
 0xb9f   : > { %2577 = vmatpush.msrb.mxu0 %v2290_v51 }
 0xba1   : > { %2669 = vmatpush.msra.mxu0 %v5404_v53  ;;  %v5455_v53 = vld [vmem:[%s7697_s2 + $0x720] sm:$0xff] }
 0xbc1   : > { %v2422_v1 = vpop.xlane.xlu0 %2421 }
 0xbc2   : > { %v2430_v2 = vsub.f32 %v2363_v47, %v2422_v1 }
 0xbc4   : > { %v2435_v3 = vmul.f32 1.442695, %v2430_v2 }
 0xbc6   : > { %5820 = vpow2.f32 %v2435_v3 }
 0xbc7   : > { %5822 = vpow2.f32 %v2439_v10 }
 0xbcc   : > { %v5821_v12 = vpop.eup %5820 }
 0xbcd   : > { %v2444_v33 = vsel %vm666_vm5, %v5821_v12, 0.0  ;;  %v5823_v13 = vpop.eup %5822 }
 0xbce   : > { %v2450_v15 = vsel %vm666_vm5, %v5823_v13, 0.0 }
 0xbd1   : > { %v2533_v17 = vpop.f32.mrf.mxu2 }
 0xbd2   : > { %5430 = vmatmul.msk.f32.vlgmr.msra.gmra.mxu2 %vm666_vm5, %v2533_v17 }
 0xc17   : > { %v2388_v0 = vpop.f32.mrf.mxu0 }
 0xc18   : > { %v2389_v48 = vadd.f32 %v2388_v0, %v333_v4 }
 0xc1a   : > { %v2423_v9 = vsel %vm666_vm5, %v2389_v48, -inf }
 0xc1b   : > { %2424 = vmax.xlane.f32.xlu0 %v2423_v9 }
 0xc23   : > { %2445 = vadd.xlane.f32.xlu0 %v2444_v33 }
 0xc2b   : > { %2451 = vadd.xlane.f32.xlu0 %v2450_v15 }
 0xc33   : > { %1972 = vadd.xlane.f32.xlu0 %v1971_v16 }
 0xc55   : > { %v2625_v0 = vpop.f32.mrf.mxu2 }
 0xc56   : > { %v2697_v8 = vsel %vm341_vm0, %v2625_v0, 0.0  ;;  %v5762_v0 = vld [vmem:[%s7701_s6 + $0x7] ss:$0 sm:$0xff] }
 0xc8e   : > { %v2425_v25 = vpop.xlane.xlu0 %2424 }
 0xc8f   : > { %v2431_v18 = vsub.f32 %v2389_v48, %v2425_v25 }
 0xc91   : > { %v2437_v19 = vmul.f32 1.442695, %v2431_v18  ;;  %v5438_v18 = vld [vmem:[%s7697_s2 + $0x618] sm:$0xff] }
 0xc92   : > { %2799 = vmatpush.msrb.mxu2 %v5438_v18 }
 0xc93   : > { %5824 = vpow2.f32 %v2437_v19  ;;  %v5442_v19 = vld [vmem:[%s7697_s2 + $0x638] sm:$0xff] }
 0xc96   : > { %v2446_v21 = vpop.xlane.xlu0 %2445 }
 0xc97   : > { %5826 = vrcp.f32 %v2446_v21  ;;  %v2479_v29 = vand.u32 2147483648, %v2446_v21  ;;  %v2477_v32 = vand.u32 2147483647, %v2446_v21  ;;  %vm2473_vm1 = vweird.f32 %v2446_v21 }
 0xc99   : > { %v5825_v6 = vpop.eup %5824  ;;  %v2480_v36 = vor.u32 1.1754944e-38, %v2479_v29  ;;  %vm2478_vm3 = vcmp.eq.f32.partialorder %v2477_v32, 8.507059e+37  ;;  %v5440_v29 = vld [vmem:[%s7697_s2 + $0x628] sm:$0xff] }
 0xc9a   : > { %v2447_v24 = vsel %vm666_vm5, %v5825_v6, 0.0 }
 0xc9b   : > { %2448 = vadd.xlane.f32.xlu1 %v2447_v24  ;;  %v5437_v24 = vld [vmem:[%s7697_s2 + $0x610] sm:$0xff] }
 0xc9c   : > { %2800 = vmatpush.msrb.mxu2 %v5437_v24  ;;  %v5480_v24 = vld [vmem:[%s7697_s2 + $0x7e8] sm:$0xff] }
 0xc9d   : > { %v5827_v23 = vpop.eup %5826 }
 0xc9e   : > { %v2469_v26 = vmul.f32 %v5827_v23, %v2446_v21  ;;  %v2452_v27 = vpop.xlane.xlu0 %2451  ;;  %vm2474_vm15 = vweird.f32 %v5827_v23 }
 0xc9f   : > { %5828 = vrcp.f32 %v2452_v27  ;;  %vm2475_vm2 = vmor %vm2473_vm1, %vm2474_vm15  ;;  %v2509_v42 = vand.u32 2147483648, %v2452_v27  ;;  %v2507_v44 = vand.u32 2147483647, %v2452_v27  ;;  %vm2503_vm6 = vweird.f32 %v2452_v27 }
 0xca0   : > { %v2470_v28 = vsub.f32 1.0, %v2469_v26  ;;  %v5445_v26 = vld [vmem:[%s7697_s2 + $0x650] sm:$0xff] }
 0xca1   : > { %v2510_v46 = vor.u32 1.1754944e-38, %v2509_v42  ;;  %vm2508_vm8 = vcmp.eq.f32.partialorder %v2507_v44, 8.507059e+37  ;;  %v5466_v42 = vld [vmem:[%s7697_s2 + $0x778] sm:$0xff]  ;;  %v5457_v44 = vld [vmem:[%s7697_s2 + $0x730] sm:$0xff] }
 0xca2   : > { %v2471_v30 = vmul.f32 %v5827_v23, %v2470_v28  ;;  %v5436_v28 = vld [vmem:[%s7697_s2 + $0x608] sm:$0xff] }
 0xca3   : > { %2801 = vmatpush.msrb.mxu2 %v5436_v28  ;;  %v5475_v28 = vld [vmem:[%s7697_s2 + $0x7c0] sm:$0xff] }
 0xca4   : > { %v2472_v34 = vadd.f32 %v5827_v23, %v2471_v30  ;;  %v5444_v30 = vld [vmem:[%s7697_s2 + $0x648] sm:$0xff] }
 0xca5   : > { %v5829_v35 = vpop.eup %5828 }
 0xca6   : > { %v2476_v37 = vsel %vm2475_vm2, %v5827_v23, %v2472_v34  ;;  %v2499_v38 = vmul.f32 %v5829_v35, %v2452_v27  ;;  %vm2504_vm4 = vweird.f32 %v5829_v35  ;;  %v1973_v25 = vpop.xlane.xlu0 %1972  ;;  %v5441_v23 = vld [vmem:[%s7697_s2 + $0x630] sm:$0xff]  ;;  %v5448_v34 = vld [vmem:[%s7697_s2 + $0x668] sm:$0xff] }
 0xca7   : > { %v2481_v39 = vsel %vm2478_vm3, %v2480_v36, %v2476_v37  ;;  %vm2505_vm7 = vmor %vm2503_vm6, %vm2504_vm4  ;;  %v1974_v21 = vmul.f32 %v1973_v25, %v6147_v31  ;;  %v5449_v27 = vld [vmem:[%s7697_s2 + $0x670] sm:$0xff]  ;;  %v5439_v36 = vld [vmem:[%s7697_s2 + $0x620] sm:$0xff] }
 0xca8   : > { %v2500_v40 = vsub.f32 1.0, %v2499_v38  ;;  %v2482_v41 = vmul.f32 %v5821_v12, %v2481_v39  ;;  %v5443_v37 = vld [vmem:[%s7697_s2 + $0x640] sm:$0xff]  ;;  %v5454_v39 = vld [vmem:[%s7697_s2 + $0x718] sm:$0xff] }
 0xca9   : > { %v6911_v32 = vadd.f32 1e-06, %v1974_v21  ;;  %v5447_v38 = vld [vmem:[%s7697_s2 + $0x660] sm:$0xff]  ;;  %v5468_v21 = vld [vmem:[%s7697_s2 + $0x788] sm:$0xff] }
 0xcaa   : > { %v2501_v43 = vmul.f32 %v5829_v35, %v2500_v40  ;;  %5427 = vmatmul.msk.f32.vlgmr.msrb.gmra.mxu3 %vm666_vm5, %v2482_v41  ;;  %v5458_v40 = vld [vmem:[%s7697_s2 + $0x738] sm:$0xff]  ;;  %v5761_v25 = vld [vmem:[%s7701_s6 + $0x4] ss:$0 sm:$0xff] }
 0xcab   : > { %2819 = vmatpush.msrb.mxu3 %v5442_v19  ;;  %v5462_v41 = vld [vmem:[%s7697_s2 + $0x758] sm:$0xff]  ;;  %vm1982_vm3 = vweird.f32 %v6911_v32  ;;  %v5477_v19 = vld [vmem:[%s7697_s2 + $0x7d0] sm:$0xff] }
 0xcac   : > { %v2502_v45 = vadd.f32 %v5829_v35, %v2501_v43  ;;  %v5453_v43 = vld [vmem:[%s7697_s2 + $0x710] sm:$0xff] }
 0xcad   : > { %2820 = vmatpush.msrb.mxu3 %v5441_v23 }
 0xcae   : > { %v2506_v47 = vsel %vm2505_vm7, %v5829_v35, %v2502_v45  ;;  %v5435_v35 = vld [vmem:[%s7697_s2 + $0x600] sm:$0xff]  ;;  %v5461_v45 = vld [vmem:[%s7697_s2 + $0x750] sm:$0xff] }
 0xcaf   : > { %v2511_v49 = vsel %vm2508_vm8, %v2510_v46, %v2506_v47  ;;  %2821 = vmatpush.msrb.mxu3 %v5440_v29  ;;  %2802 = vmatpush.msrb.mxu2 %v5435_v35  ;;  %v5465_v46 = vld [vmem:[%s7697_s2 + $0x770] sm:$0xff]  ;;  %v5452_v47 = vld [vmem:[%s7697_s2 + $0x708] sm:$0xff]  ;;  %v5479_v29 = vld [vmem:[%s7697_s2 + $0x7e0] sm:$0xff] }
 0xcb0   : > { %v2512_v5 = vmul.f32 %v5823_v13, %v2511_v49  ;;  %v5456_v49 = vld [vmem:[%s7697_s2 + $0x728] sm:$0xff] }
 0xcb1   : > { %2822 = vmatpush.msrb.mxu3 %v5439_v36  ;;  %2882 = vmatpush.msra.mxu2 %v5454_v39 }
 0xcb2   : > { %5429 = vmatmul.msk.f32.vlgmr.msrb.gmra.mxu1 %vm666_vm5, %v2512_v5  ;;  %v5460_v5 = vld [vmem:[%s7697_s2 + $0x748] sm:$0xff] }
 0xcb3   : > { %2883 = vmatpush.msra.mxu2 %v5453_v43 }
 0xcb5   : > { %2884 = vmatpush.msra.mxu2 %v5452_v47 }
 0xcb7   : > { %2885 = vmatpush.msra.mxu2 %v5451_v52  ;;  %v337_v52 = vld [vmem:[%s6256_s24 + $0x50] sm:$0xff] }
 0xd0e   : > { %v2449_v51 = vpop.xlane.xlu1 %2448 }
 0xd0f   : > { %5830 = vrcp.f32 %v2449_v51  ;;  %v2494_v57 = vand.u32 2147483648, %v2449_v51  ;;  %v2492_v59 = vand.u32 2147483647, %v2449_v51  ;;  %vm2488_vm10 = vweird.f32 %v2449_v51 }
 0xd10   : > { %5832 = vrsqrt.f32 %v6911_v32 }
 0xd11   : > { %v2495_v61 = vor.u32 1.1754944e-38, %v2494_v57  ;;  %vm2493_vm13 = vcmp.eq.f32.partialorder %v2492_v59, 8.507059e+37 }
 0xd15   : > { %v5831_v54 = vpop.eup %5830 }
 0xd16   : > { %v2484_v55 = vmul.f32 %v5831_v54, %v2449_v51  ;;  %vm2489_vm9 = vweird.f32 %v5831_v54  ;;  %v5833_v57 = vpop.eup %5832 }
 0xd17   : > { %vm2490_vm12 = vmor %vm2488_vm10, %vm2489_vm9  ;;  %v1977_v59 = vmul.f32 %v5833_v57, %v6911_v32  ;;  %vm1983_vm2 = vweird.f32 %v5833_v57 }
 0xd18   : > { %v2485_v56 = vsub.f32 1.0, %v2484_v55  ;;  %v5459_v55 = vld [vmem:[%s7697_s2 + $0x740] sm:$0xff]  ;;  %vm1984_vm4 = vmor %vm1982_vm3, %vm1983_vm2 }
 0xd1a   : > { %v2486_v58 = vmul.f32 %v5831_v54, %v2485_v56  ;;  %v5463_v56 = vld [vmem:[%s7697_s2 + $0x760] sm:$0xff] }
 0xd1c   : > { %v2487_v60 = vadd.f32 %v5831_v54, %v2486_v58 }
 0xd1e   : > { %v2491_v62 = vsel %vm2490_vm12, %v5831_v54, %v2487_v60  ;;  %v1978_v60 = vmul.f32 %v5833_v57, %v1977_v59 }
 0xd1f   : > { %v2496_v63 = vsel %vm2493_vm13, %v2495_v61, %v2491_v62 }
 0xd20   : > { %v2497_v1 = vmul.f32 %v5825_v6, %v2496_v63  ;;  %v5450_v6 = vld [vmem:[%s7697_s2 + $0x678] sm:$0xff]  ;;  %v1979_v63 = vmul.f32 0.5, %v1978_v60 }
 0xd21   : > { %2859 = vmatpush.msrb.mxu1 %v5450_v6  ;;  %v5476_v6 = vld [vmem:[%s7697_s2 + $0x7c8] sm:$0xff] }
 0xd22   : > { %5428 = vmatmul.msk.f32.vlgmr.msrb.gmra.mxu0 %vm666_vm5, %v2497_v1 }
 0xd23   : > { %2860 = vmatpush.msrb.mxu1 %v5449_v27  ;;  %v5471_v27 = vld [vmem:[%s7697_s2 + $0x7a0] sm:$0xff] }
 0xd25   : > { %2861 = vmatpush.msrb.mxu1 %v5448_v34 }
 0xd27   : > { %2862 = vmatpush.msrb.mxu1 %v5447_v38 }
 0xd2d   : > { %v2556_v2 = vpop.f32.mrf.mxu3 }
 0xd2e   : > { %5431 = vmatmul.msk.f32.vlgmr.msra.gmra.mxu3 %vm666_vm5, %v2556_v2 }
 0xd2f   : > { %v2602_v3 = vpop.f32.mrf.mxu1  ;;  %2902 = vmatpush.msra.mxu3 %v5458_v40 }
 0xd30   : > { %5433 = vmatmul.msk.f32.vlgmr.msra.gmra.mxu1 %vm666_vm5, %v2602_v3  ;;  %v1980_v3 = vsub.f32 1.5, %v1979_v63 }
 0xd31   : > { %2942 = vmatpush.msra.mxu1 %v5466_v42  ;;  %2903 = vmatpush.msra.mxu3 %v5457_v44  ;;  %v335_v44 = vld [vmem:[%s6256_s24 + $0x40] sm:$0xff] }
 0xd33   : > { %2943 = vmatpush.msra.mxu1 %v5465_v46  ;;  %2904 = vmatpush.msra.mxu3 %v5456_v49 }
 0xd35   : > { %2944 = vmatpush.msra.mxu1 %v5464_v50  ;;  %2905 = vmatpush.msra.mxu3 %v5455_v53 }
 0xd37   : > { %2945 = vmatpush.msra.mxu1 %v5463_v56 }
 0xd9f   : > { %v2579_v4 = vpop.f32.mrf.mxu0 }
 0xda0   : > { %5432 = vmatmul.msk.f32.vlgmr.msra.gmra.mxu0 %vm666_vm5, %v2579_v4 }
 0xdad   : > { %v2694_v9 = vpop.f32.mrf.mxu1 }
 0xdae   : > { %v2702_v13 = vsel %vm341_vm0, %v2694_v9, 0.0 }
 0xdb1   : > { %v2648_v7 = vpop.f32.mrf.mxu3 }
 0xdb2   : > { %v2698_v48 = vsel %vm341_vm0, %v2648_v7, 0.0 }
 0xdb3   : > { %v2699_v10 = vadd.f32 %v2698_v48, %v2697_v8  ;;  %v1981_v48 = vmul.f32 %v5833_v57, %v1980_v3 }
 0xe1d   : > { %v2671_v11 = vpop.f32.mrf.mxu0 }
 0xe1e   : > { %v2700_v12 = vsel %vm341_vm0, %v2671_v11, 0.0  ;;  %v1985_v11 = vsel %vm1984_vm4, %v5833_v57, %v1981_v48 }
 0xe1f   : > { %v2701_v33 = vadd.f32 %v2700_v12, %v2699_v10  ;;  %v5470_v12 = vld [vmem:[%s7697_s2 + $0x798] sm:$0xff]  ;;  %v1986_v18 = vmul.f32 %v1985_v11, %v6844_v14  ;;  %v5472_v14 = vld [vmem:[%s7697_s2 + $0x7a8] sm:$0xff] }
 0xe21   : > { %v2703_v15 = vadd.f32 %v2702_v13, %v2701_v33  ;;  %v5474_v33 = vld [vmem:[%s7697_s2 + $0x7b8] sm:$0xff]  ;;  %v7028_v23 = vmul.f32 %v5761_v25, %v1986_v18  ;;  %v5484_v25 = vld [vmem:[%s7698_s3 + $0x88] sm:$0xff] }
 0xe22   : > { %v5478_v13 = vld [vmem:[%s7697_s2 + $0x7d8] sm:$0xff] }
 0xe23   : > { %v6872_v20 = vadd.f32 %v6580_v22, %v2703_v15  ;;  %v5446_v22 = vld [vmem:[%s7697_s2 + $0x658] sm:$0xff] }
 0xe24   : > { %2839 = vmatpush.msrb.mxu0 %v5446_v22  ;;  %v5482_v15 = vld [vmem:[%s7697_s2 + $0x7f8] sm:$0xff]  ;;  %v5481_v22 = vld [vmem:[%s7697_s2 + $0x7f0] sm:$0xff] }
 0xe25   : > { %v2707_v16 = vmul.f32 %v6872_v20, %v6872_v20 }
 0xe26   : > { %2840 = vmatpush.msrb.mxu0 %v5445_v26  ;;  %v5467_v26 = vld [vmem:[%s7697_s2 + $0x780] sm:$0xff] }
 0xe27   : > { %v2708_v17 = vsel %vm341_vm0, %v2707_v16, 0.0  ;;  %v5469_v16 = vld [vmem:[%s7697_s2 + $0x790] sm:$0xff] }
 0xe28   : > { %2709 = vadd.xlane.f32.xlu1 %v2708_v17  ;;  %2841 = vmatpush.msrb.mxu0 %v5444_v30  ;;  %v5473_v17 = vld [vmem:[%s7697_s2 + $0x7b0] sm:$0xff] }
 0xe2a   : > { %2842 = vmatpush.msrb.mxu0 %v5443_v37 }
 0xe2c   : > { %2922 = vmatpush.msra.mxu0 %v5462_v41 }
 0xe2e   : > { %2923 = vmatpush.msra.mxu0 %v5461_v45  ;;  %v336_v45 = vld [vmem:[%s6256_s24 + $0x48] sm:$0xff] }
 0xe30   : > { %2924 = vmatpush.msra.mxu0 %v5460_v5 }
 0xe32   : > { %2925 = vmatpush.msra.mxu0 %v5459_v55 }
 0xe9b   : > { %v2710_v51 = vpop.xlane.xlu1 %2709 }
 0xe9c   : > { %v2711_v54 = vmul.f32 %v2710_v51, %v6147_v31 }
 0xe9e   : > { %v2712_v58 = vadd.f32 1e-06, %v2711_v54  ;;  %v338_v54 = vld [vmem:[%s6256_s24 + $0x58] sm:$0xff] }
 0xea0   : > { %5834 = vrsqrt.f32 %v2712_v58  ;;  %vm2719_vm15 = vweird.f32 %v2712_v58 }
 0xea6   : > { %v5835_v61 = vpop.eup %5834 }
 0xea7   : > { %v2714_v62 = vmul.f32 %v5835_v61, %v2712_v58  ;;  %vm2720_vm14 = vweird.f32 %v5835_v61 }
 0xea8   : > { %vm2721_vm1 = vmor %vm2719_vm15, %vm2720_vm14 }
 0xea9   : > { %v2715_v1 = vmul.f32 %v5835_v61, %v2714_v62 }
 0xeab   : > { %v2716_v2 = vmul.f32 0.5, %v2715_v1 }
 0xead   : > { %v2717_v4 = vsub.f32 1.5, %v2716_v2 }
 0xeaf   : > { %v2718_v7 = vmul.f32 %v5835_v61, %v2717_v4 }
 0xeb1   : > { %v2722_v8 = vsel %vm2721_vm1, %v5835_v61, %v2718_v7 }
 0xeb2   : > { %v2723_v9 = vmul.f32 %v2722_v8, %v6872_v20 }
 0xeb4   : > { %v2727_v10 = vmul.f32 %v5762_v0, %v2723_v9 }
 0xeb6   : > { %5487 = vmatmul.msk.f32.vlgmr.msrb.gmra.mxu2 %vm341_vm0, %v2727_v10  ;;  %5488 = vmatmul.msk.f32.vlgmr.msrb.gmra.mxu3 %vm341_vm0, %v2727_v10 }
 0xeb7   : > { %5489 = vmatmul.msk.f32.vlgmr.msrb.gmra.mxu0 %vm341_vm0, %v2727_v10  ;;  %5490 = vmatmul.msk.f32.vlgmr.msrb.gmra.mxu1 %vm341_vm0, %v2727_v10 }
 0xeb8   : > { %2962 = vmatpush.msrb.mxu2 %v5470_v12  ;;  %2982 = vmatpush.msrb.mxu3 %v5474_v33 }
 0xeb9   : > { %3002 = vmatpush.msrb.mxu0 %v5478_v13  ;;  %3022 = vmatpush.msrb.mxu1 %v5482_v15 }
 0xeba   : > { %2963 = vmatpush.msrb.mxu2 %v5469_v16  ;;  %2983 = vmatpush.msrb.mxu3 %v5473_v17  ;;  %v5483_v17 = vld [vmem:[%s7698_s3 + $0x80] sm:$0xff] }
 0xebb   : > { %3003 = vmatpush.msrb.mxu0 %v5477_v19  ;;  %3023 = vmatpush.msrb.mxu1 %v5481_v22 }
 0xebc   : > { %2964 = vmatpush.msrb.mxu2 %v5468_v21  ;;  %2984 = vmatpush.msrb.mxu3 %v5472_v14 }
 0xebd   : > { %3004 = vmatpush.msrb.mxu0 %v5476_v6  ;;  %3024 = vmatpush.msrb.mxu1 %v5480_v24 }
 0xebe   : > { %5491 = vmatmul.msk.f32.vlgmr.msra.gmra.mxu2 %vm341_vm0, %v7028_v23  ;;  %5492 = vmatmul.msk.f32.vlgmr.msra.gmra.mxu3 %vm341_vm0, %v7028_v23 }
 0xebf   : > { %5493 = vmatmul.msk.f32.vlgmr.msra.gmra.mxu0 %vm341_vm0, %v7028_v23  ;;  %5494 = vmatmul.msk.f32.vlgmr.msra.gmra.mxu1 %vm341_vm0, %v7028_v23 }
 0xec0   : > { %2965 = vmatpush.msrb.mxu2 %v5467_v26  ;;  %2985 = vmatpush.msrb.mxu3 %v5471_v27 }
 0xec1   : > { %3005 = vmatpush.msrb.mxu0 %v5475_v28  ;;  %3025 = vmatpush.msrb.mxu1 %v5479_v29 }
 0xec6   : > { %5495 = vmatmul.msk.f32.vlgmr.msrb.gmra.mxu2 %vm341_vm0, %v7028_v23  ;;  %5496 = vmatmul.msk.f32.vlgmr.msrb.gmra.mxu3 %vm341_vm0, %v7028_v23 }
 0xec7   : > { %5497 = vmatmul.msk.f32.vlgmr.msrb.gmra.mxu0 %vm341_vm0, %v7028_v23  ;;  %5498 = vmatmul.msk.f32.vlgmr.msrb.gmra.mxu1 %vm341_vm0, %v7028_v23 }
 0xf34   : > { %v2844_v30 = vpop.f32.mrf.mxu0  ;;  %v2864_v32 = vpop.f32.mrf.mxu1 }
 0xf39   : > { %v2804_v34 = vpop.f32.mrf.mxu2  ;;  %v2824_v35 = vpop.f32.mrf.mxu3 }
 0xf3c   : > { %v2927_v36 = vpop.f32.mrf.mxu0  ;;  %v2947_v37 = vpop.f32.mrf.mxu1 }
 0xf3d   : > { %5503 = vmatpush.xpose.msk.msra.mxu0 %vm666_vm5, %v2927_v36  ;;  %5505 = vmatpush.xpose.msk.msra.mxu1 %vm666_vm5, %v2947_v37 }
 0xf40   : > { %5504 = vmatmul.msk.f32.vlgmr.msra.gmra.mxu0 %vm666_vm5, %v2844_v30  ;;  %5506 = vmatmul.msk.f32.vlgmr.msra.gmra.mxu1 %vm666_vm5, %v2864_v32 }
 0xf41   : > { %v2887_v38 = vpop.f32.mrf.mxu2  ;;  %v2907_v39 = vpop.f32.mrf.mxu3 }
 0xf42   : > { %5499 = vmatpush.xpose.msk.msra.mxu2 %vm666_vm5, %v2887_v38  ;;  %5501 = vmatpush.xpose.msk.msra.mxu3 %vm666_vm5, %v2907_v39 }
 0xf44   : > { %v3007_v40 = vpop.f32.mrf.mxu0  ;;  %v3027_v41 = vpop.f32.mrf.mxu1 }
 0xf45   : > { %3294 = vmatpush.msrb.mxu0 %v3007_v40  ;;  %3317 = vmatpush.msrb.mxu1 %v3027_v41 }
 0xf46   : > { %5500 = vmatmul.msk.f32.vlgmr.msra.gmra.mxu2 %vm666_vm5, %v2804_v34  ;;  %5502 = vmatmul.msk.f32.vlgmr.msra.gmra.mxu3 %vm666_vm5, %v2824_v35 }
 0xf49   : > { %v2967_v42 = vpop.f32.mrf.mxu2  ;;  %v2987_v43 = vpop.f32.mrf.mxu3 }
 0xf4a   : > { %3248 = vmatpush.msrb.mxu2 %v2967_v42  ;;  %3271 = vmatpush.msrb.mxu3 %v2987_v43 }
 0xf4c   : > { %3340 = vmatpush.msra.mxu2 %v5483_v17  ;;  %3363 = vmatpush.msra.mxu3 %v5484_v25 }
 0xfbd   : > { %v3105_v53 = vpop.f32.mrf.mxu0  ;;  %v3131_v55 = vpop.f32.mrf.mxu1 }
 0xfbe   : > { %v3106_v56 = vadd.f32 %v3105_v53, %v337_v52  ;;  %v3132_v57 = vadd.f32 %v3131_v55, %v338_v54 }
 0xfc0   : > { %v3143_v58 = vsel %vm666_vm5, %v3132_v57, -inf  ;;  %v3140_v59 = vsel %vm666_vm5, %v3106_v56, -inf }
 0xfc9   : > { %v3053_v46 = vpop.f32.mrf.mxu2  ;;  %v3079_v47 = vpop.f32.mrf.mxu3 }
 0xfca   : > { %v3054_v49 = vadd.f32 %v3053_v46, %v335_v44  ;;  %v3080_v5 = vadd.f32 %v3079_v47, %v336_v45 }
 0xfcc   : > { %v3137_v50 = vsel %vm666_vm5, %v3080_v5, -inf  ;;  %v3134_v51 = vsel %vm666_vm5, %v3054_v49, -inf }
 0xfcd   : > { %3138 = vmax.xlane.f32.xlu0 %v3137_v50  ;;  %3135 = vmax.xlane.f32.xlu1 %v3134_v51 }
 0xfd5   : > { %3144 = vmax.xlane.f32.xlu0 %v3143_v58  ;;  %3141 = vmax.xlane.f32.xlu1 %v3140_v59 }
0x1040   : > { %v3139_v60 = vpop.xlane.xlu0 %3138  ;;  %v3136_v61 = vpop.xlane.xlu1 %3135 }
0x1041   : > { %v3147_v62 = vsub.f32 %v3080_v5, %v3139_v60  ;;  %v3146_v63 = vsub.f32 %v3054_v49, %v3136_v61 }
0x1043   : > { %v3152_v1 = vmul.f32 1.442695, %v3147_v62  ;;  %v3150_v2 = vmul.f32 1.442695, %v3146_v63 }
0x1045   : > { %5836 = vpow2.f32 %v3152_v1 }
0x1046   : > { %5838 = vpow2.f32 %v3150_v2 }
0x1048   : > { %v3145_v3 = vpop.xlane.xlu0 %3144  ;;  %v3142_v4 = vpop.xlane.xlu1 %3141 }
0x1049   : > { %v3149_v7 = vsub.f32 %v3132_v57, %v3145_v3  ;;  %v3148_v0 = vsub.f32 %v3106_v56, %v3142_v4 }
0x104b   : > { %v5837_v48 = vpop.eup %5836  ;;  %v3156_v8 = vmul.f32 1.442695, %v3149_v7  ;;  %v3154_v9 = vmul.f32 1.442695, %v3148_v0  ;;  %v5485_v0 = vld [vmem:[%s7698_s3 + $0x90] sm:$0xff] }
0x104c   : > { %v5839_v10 = vpop.eup %5838  ;;  %v3161_v11 = vsel %vm666_vm5, %v5837_v48, 0.0  ;;  %3386 = vmatpush.msra.mxu0 %v5485_v0  ;;  %v5538_v0 = vld [vmem:[%s7697_s2 + $0x4b8] sm:$0xff] }
0x104d   : > { %5840 = vpow2.f32 %v3156_v8  ;;  %3162 = vadd.xlane.f32.xlu1 %v3161_v11  ;;  %v3158_v12 = vsel %vm666_vm5, %v5839_v10, 0.0 }
0x104e   : > { %5842 = vpow2.f32 %v3154_v9  ;;  %3159 = vadd.xlane.f32.xlu2 %v3158_v12 }
0x1053   : > { %v7076_v33 = vpop.eup %5840 }
0x1054   : > { %v7078_v13 = vpop.eup %5842  ;;  %v3167_v15 = vsel %vm666_vm5, %v7076_v33, 0.0 }
0x1055   : > { %v3164_v16 = vsel %vm666_vm5, %v7078_v13, 0.0 }
0x1056   : > { %3168 = vadd.xlane.f32.xlu2 %v3167_v15  ;;  %3165 = vadd.xlane.f32.xlu0 %v3164_v16 }
0x10c0   : > { %v3163_v18 = vpop.xlane.xlu1 %3162 }
0x10c1   : > { %v3160_v19 = vpop.xlane.xlu2 %3159  ;;  %5844 = vrcp.f32 %v3163_v18  ;;  %v3196_v29 = vand.u32 2147483648, %v3163_v18  ;;  %v3194_v34 = vand.u32 2147483647, %v3163_v18  ;;  %vm3190_vm8 = vweird.f32 %v3163_v18 }
0x10c2   : > { %5846 = vrcp.f32 %v3160_v19  ;;  %v3181_v30 = vand.u32 2147483648, %v3160_v19  ;;  %v3179_v36 = vand.u32 2147483647, %v3160_v19  ;;  %vm3175_vm9 = vweird.f32 %v3160_v19 }
0x10c3   : > { %v3197_v39 = vor.u32 1.1754944e-38, %v3196_v29  ;;  %vm3195_vm13 = vcmp.eq.f32.partialorder %v3194_v34, 8.507059e+37 }
0x10c4   : > { %v3182_v41 = vor.u32 1.1754944e-38, %v3181_v30  ;;  %vm3180_vm14 = vcmp.eq.f32.partialorder %v3179_v36, 8.507059e+37 }
0x10c7   : > { %v5845_v22 = vpop.eup %5844 }
0x10c8   : > { %v5847_v21 = vpop.eup %5846  ;;  %v3186_v14 = vmul.f32 %v5845_v22, %v3163_v18  ;;  %vm3191_vm6 = vweird.f32 %v5845_v22 }
0x10c9   : > { %v3171_v6 = vmul.f32 %v5847_v21, %v3160_v19  ;;  %v3169_v24 = vpop.xlane.xlu2 %3168  ;;  %v3166_v26 = vpop.xlane.xlu0 %3165  ;;  %vm3176_vm7 = vweird.f32 %v5847_v21  ;;  %vm3192_vm10 = vmor %vm3190_vm8, %vm3191_vm6 }
0x10ca   : > { %v3187_v27 = vsub.f32 1.0, %v3186_v14  ;;  %5848 = vrcp.f32 %v3169_v24  ;;  %vm3177_vm12 = vmor %vm3175_vm9, %vm3176_vm7  ;;  %v3226_v52 = vand.u32 2147483648, %v3169_v24  ;;  %v3224_v55 = vand.u32 2147483647, %v3169_v24 }
0x10cb   : > { %v3172_v28 = vsub.f32 1.0, %v3171_v6  ;;  %5850 = vrcp.f32 %v3166_v26  ;;  %v3211_v56 = vand.u32 2147483648, %v3166_v26  ;;  %v3209_v58 = vand.u32 2147483647, %v3166_v26 }
0x10cc   : > { %v3188_v32 = vmul.f32 %v5845_v22, %v3187_v27  ;;  %vm3220_vm2 = vweird.f32 %v3169_v24  ;;  %v3227_v60 = vor.u32 1.1754944e-38, %v3226_v52  ;;  %vm3205_vm4 = vweird.f32 %v3166_v26  ;;  %v5518_v27 = vld [vmem:[%s7699_s4 + $0x50] sm:$0xff] }
0x10cd   : > { %v3173_v35 = vmul.f32 %v5847_v21, %v3172_v28  ;;  %vm3225_vm6 = vcmp.eq.f32.partialorder %v3224_v55, 8.507059e+37  ;;  %v3212_v63 = vor.u32 1.1754944e-38, %v3211_v56  ;;  %vm3210_vm8 = vcmp.eq.f32.partialorder %v3209_v58, 8.507059e+37  ;;  %v5517_v28 = vld [vmem:[%s7699_s4 + $0x48] sm:$0xff] }
0x10ce   : > { %v3189_v37 = vadd.f32 %v5845_v22, %v3188_v32 }
0x10cf   : > { %v3174_v38 = vadd.f32 %v5847_v21, %v3173_v35 }
0x10d0   : > { %v5849_v40 = vpop.eup %5848  ;;  %v3193_v42 = vsel %vm3192_vm10, %v5845_v22, %v3189_v37 }
0x10d1   : > { %v5851_v43 = vpop.eup %5850  ;;  %v3178_v44 = vsel %vm3177_vm12, %v5847_v21, %v3174_v38  ;;  %v3198_v45 = vsel %vm3195_vm13, %v3197_v39, %v3193_v42  ;;  %v3216_v46 = vmul.f32 %v5849_v40, %v3169_v24  ;;  %vm3221_vm15 = vweird.f32 %v5849_v40 }
0x10d2   : > { %v3183_v47 = vsel %vm3180_vm14, %v3182_v41, %v3178_v44  ;;  %v3201_v49 = vmul.f32 %v5851_v43, %v3166_v26  ;;  %v3199_v5 = vmul.f32 %v5837_v48, %v3198_v45  ;;  %vm3206_vm1 = vweird.f32 %v5851_v43  ;;  %vm3222_vm3 = vmor %vm3220_vm2, %vm3221_vm15  ;;  %v5486_v48 = vld [vmem:[%s7698_s3 + $0x98] sm:$0xff]  ;;  %v5526_v45 = vld [vmem:[%s7700_s5 + $0xb0] sm:$0xff] }
0x10d3   : > { %v3217_v50 = vsub.f32 1.0, %v3216_v46  ;;  %v3184_v51 = vmul.f32 %v5839_v10, %v3183_v47  ;;  %vm3207_vm7 = vmor %vm3205_vm4, %vm3206_vm1  ;;  %3409 = vmatpush.msra.mxu1 %v5486_v48  ;;  %v5519_v26 = vld [vmem:[%s7699_s4 + $0x58] sm:$0xff]  ;;  %v5525_v46 = vld [vmem:[%s7700_s5 + $0xa8] sm:$0xff] }
0x10d4   : > { %v3202_v53 = vsub.f32 1.0, %v3201_v49  ;;  %5508 = vmatmul.msk.f32.vlgmr.msrb.gmra.mxu3 %vm666_vm5, %v3199_v5  ;;  %v5527_v44 = vld [vmem:[%s7700_s5 + $0xb8] sm:$0xff]  ;;  %v5524_v47 = vld [vmem:[%s7700_s5 + $0xa0] sm:$0xff]  ;;  %v5522_v5 = vld [vmem:[%s7700_s5 + $0x90] sm:$0xff] }
0x10d5   : > { %v3218_v54 = vmul.f32 %v5849_v40, %v3217_v50  ;;  %5507 = vmatmul.msk.f32.vlgmr.msrb.gmra.mxu2 %vm666_vm5, %v3184_v51  ;;  %3507 = vmatpush.msrb.mxu3 %v5527_v44  ;;  %v5523_v49 = vld [vmem:[%s7700_s5 + $0x98] sm:$0xff]  ;;  %v5521_v50 = vld [vmem:[%s7700_s5 + $0x88] sm:$0xff] }
0x10d6   : > { %v3203_v57 = vmul.f32 %v5851_v43, %v3202_v53  ;;  %3474 = vmatpush.msrb.mxu2 %v5519_v26  ;;  %v5520_v53 = vld [vmem:[%s7700_s5 + $0x80] sm:$0xff]  ;;  %v5542_v48 = vld [vmem:[%s7697_s2 + $0x4d8] sm:$0xff]  ;;  %v5549_v26 = vld [vmem:[%s7697_s2 + $0x510] sm:$0xff] }
0x10d7   : > { %v3219_v59 = vadd.f32 %v5849_v40, %v3218_v54  ;;  %3508 = vmatpush.msrb.mxu3 %v5526_v45 }
0x10d8   : > { %v3204_v61 = vadd.f32 %v5851_v43, %v3203_v57  ;;  %3475 = vmatpush.msrb.mxu2 %v5518_v27  ;;  %v5553_v27 = vld [vmem:[%s7697_s2 + $0x530] sm:$0xff] }
0x10d9   : > { %v3223_v62 = vsel %vm3222_vm3, %v5849_v40, %v3219_v59  ;;  %v5763_v40 = vld [vmem:[%s7701_s6 + $0x9] ss:$0 sm:$0xff]  ;;  %3509 = vmatpush.msrb.mxu3 %v5525_v46 }
0x10da   : > { %v3228_v1 = vsel %vm3225_vm6, %v3227_v60, %v3223_v62  ;;  %v3208_v2 = vsel %vm3207_vm7, %v5851_v43, %v3204_v61  ;;  %3476 = vmatpush.msrb.mxu2 %v5517_v28  ;;  %v5573_v28 = vld [vmem:[%s7697_s2 + $0x5d0] sm:$0xff] }
0x10db   : > { %v3213_v3 = vsel %vm3210_vm8, %v3212_v63, %v3208_v2  ;;  %v3229_v4 = vmul.f32 %v7076_v33, %v3228_v1  ;;  %3510 = vmatpush.msrb.mxu3 %v5524_v47  ;;  %v5764_v47 = vld [vmem:[%s7701_s6 + $0x6] ss:$0 sm:$0xff] }
0x10dc   : > { %v3214_v7 = vmul.f32 %v7078_v13, %v3213_v3 }
0x10dd   : > { %5510 = vmatmul.msk.f32.vlgmr.msrb.gmra.mxu1 %vm666_vm5, %v3229_v4  ;;  %3511 = vmatpush.msrb.mxu3 %v5523_v49 }
0x10de   : > { %5509 = vmatmul.msk.f32.vlgmr.msrb.gmra.mxu0 %vm666_vm5, %v3214_v7  ;;  %v5534_v7 = vld [vmem:[%s7697_s2 + $0x498] sm:$0xff]  ;;  %3634 = vmatpush.msrb.mxu1 %v5538_v0 }
0x10df   : > { %3512 = vmatpush.msrb.mxu3 %v5522_v5  ;;  %3614 = vmatpush.msrb.mxu0 %v5534_v7 }
0x10e1   : > { %3513 = vmatpush.msrb.mxu3 %v5521_v50 }
0x10e3   : > { %3514 = vmatpush.msrb.mxu3 %v5520_v53  ;;  %v5570_v53 = vld [vmem:[%s7697_s2 + $0x5b8] sm:$0xff] }
0x1157   : > { %v3273_v8 = vpop.f32.mrf.mxu3 }
0x1158   : > { %v3250_v9 = vpop.f32.mrf.mxu2  ;;  %5512 = vmatmul.msk.f32.vlgmr.msra.gmra.mxu3 %vm666_vm5, %v3273_v8  ;;  %v5558_v8 = vld [vmem:[%s7697_s2 + $0x558] sm:$0xff] }
0x1159   : > { %5511 = vmatmul.msk.f32.vlgmr.msra.gmra.mxu2 %vm666_vm5, %v3250_v9  ;;  %3734 = vmatpush.msra.mxu3 %v5558_v8  ;;  %v5533_v9 = vld [vmem:[%s7697_s2 + $0x490] sm:$0xff] }
0x115a   : > { %v3319_v10 = vpop.f32.mrf.mxu1  ;;  %3615 = vmatpush.msrb.mxu0 %v5533_v9 }
0x115b   : > { %v3296_v11 = vpop.f32.mrf.mxu0  ;;  %5514 = vmatmul.msk.f32.vlgmr.msra.gmra.mxu1 %vm666_vm5, %v3319_v10  ;;  %v5537_v10 = vld [vmem:[%s7697_s2 + $0x4b0] sm:$0xff] }
0x115c   : > { %5513 = vmatmul.msk.f32.vlgmr.msra.gmra.mxu0 %vm666_vm5, %v3296_v11  ;;  %v5541_v11 = vld [vmem:[%s7697_s2 + $0x4d0] sm:$0xff]  ;;  %3635 = vmatpush.msrb.mxu1 %v5537_v10 }
0x11d8   : > { %v3411_v17 = vpop.f32.mrf.mxu1 }
0x11d9   : > { %v3388_v33 = vpop.f32.mrf.mxu0  ;;  %v3419_v22 = vsel %vm341_vm0, %v3411_v17, 0.0  ;;  %v5531_v17 = vld [vmem:[%s7697_s2 + $0x480] sm:$0xff] }
0x11da   : > { %v3417_v18 = vsel %vm341_vm0, %v3388_v33, 0.0  ;;  %v5532_v33 = vld [vmem:[%s7697_s2 + $0x488] sm:$0xff] }
0x11db   : > { %v3365_v12 = vpop.f32.mrf.mxu3  ;;  %3616 = vmatpush.msrb.mxu0 %v5532_v33 }
0x11dc   : > { %v3342_v13 = vpop.f32.mrf.mxu2  ;;  %v3415_v15 = vsel %vm341_vm0, %v3365_v12, 0.0  ;;  %v5557_v12 = vld [vmem:[%s7697_s2 + $0x550] sm:$0xff] }
0x11dd   : > { %v3414_v16 = vsel %vm341_vm0, %v3342_v13, 0.0  ;;  %3735 = vmatpush.msra.mxu3 %v5557_v12  ;;  %v5536_v13 = vld [vmem:[%s7697_s2 + $0x4a8] sm:$0xff]  ;;  %3617 = vmatpush.msrb.mxu0 %v5531_v17 }
0x11de   : > { %v3416_v25 = vadd.f32 %v3415_v15, %v3414_v16  ;;  %v5540_v15 = vld [vmem:[%s7697_s2 + $0x4c8] sm:$0xff]  ;;  %3636 = vmatpush.msrb.mxu1 %v5536_v13 }
0x11df   : > { %v5556_v16 = vld [vmem:[%s7697_s2 + $0x548] sm:$0xff] }
0x11e0   : > { %v3418_v19 = vadd.f32 %v3417_v18, %v3416_v25  ;;  %v5535_v25 = vld [vmem:[%s7697_s2 + $0x4a0] sm:$0xff]  ;;  %3736 = vmatpush.msra.mxu3 %v5556_v16 }
0x11e1   : > { %v5539_v18 = vld [vmem:[%s7697_s2 + $0x4c0] sm:$0xff]  ;;  %3637 = vmatpush.msrb.mxu1 %v5535_v25  ;;  %v5898_v25 = vld [vmem:[%s6256_s24 + $0x30] sm:$0xff] }
0x11e2   : > { %v3420_v21 = vadd.f32 %v3419_v22, %v3418_v19  ;;  %v5555_v19 = vld [vmem:[%s7697_s2 + $0x540] sm:$0xff]  ;;  %v5546_v22 = vld [vmem:[%s7697_s2 + $0x4f8] sm:$0xff] }
0x11e3   : > { %3737 = vmatpush.msra.mxu3 %v5555_v19  ;;  %3674 = vmatpush.msra.mxu0 %v5546_v22 }
0x11e4   : > { %v3421_v14 = vadd.f32 %v3420_v21, %v6872_v20  ;;  %v5516_v20 = vld [vmem:[%s7699_s4 + $0x40] sm:$0xff]  ;;  %v5550_v21 = vld [vmem:[%s7697_s2 + $0x518] sm:$0xff] }
0x11e5   : > { %3477 = vmatpush.msrb.mxu2 %v5516_v20  ;;  %3694 = vmatpush.msra.mxu1 %v5550_v21  ;;  %v5544_v20 = vld [vmem:[%s7697_s2 + $0x4e8] sm:$0xff]  ;;  %v5899_v21 = vld [vmem:[%s6256_s24 + $0x38] sm:$0xff] }
0x11e6   : > { %v3424_v6 = vmul.f32 %v3421_v14, %v3421_v14 }
0x11e7   : > { %3654 = vmatpush.msra.mxu2 %v5542_v48  ;;  %3695 = vmatpush.msra.mxu1 %v5549_v26 }
0x11e8   : > { %v3425_v24 = vsel %vm341_vm0, %v3424_v6, 0.0  ;;  %v5574_v6 = vld [vmem:[%s7697_s2 + $0x5d8] sm:$0xff] }
0x11e9   : > { %3426 = vadd.xlane.f32.xlu1 %v3425_v24  ;;  %3655 = vmatpush.msra.mxu2 %v5541_v11  ;;  %v5545_v24 = vld [vmem:[%s7697_s2 + $0x4f0] sm:$0xff] }
0x11ea   : > { %3675 = vmatpush.msra.mxu0 %v5545_v24  ;;  %v5900_v24 = vld [vmem:[%s6256_s24 + $0x28] sm:$0xff] }
0x11eb   : > { %3656 = vmatpush.msra.mxu2 %v5540_v15 }
0x11ec   : > { %3676 = vmatpush.msra.mxu0 %v5544_v20 }
0x11ed   : > { %3657 = vmatpush.msra.mxu2 %v5539_v18 }
0x125c   : > { %v3427_v29 = vpop.xlane.xlu1 %3426 }
0x125d   : > { %v3428_v30 = vmul.f32 %v3427_v29, %v6147_v31  ;;  %v5548_v29 = vld [vmem:[%s7697_s2 + $0x508] sm:$0xff] }
0x125e   : > { %3696 = vmatpush.msra.mxu1 %v5548_v29  ;;  %v5901_v29 = vld [vmem:[%s6256_s24 + $0x20] sm:$0xff] }
0x125f   : > { %v3429_v32 = vadd.f32 1e-06, %v3428_v30 }
0x1261   : > { %5852 = vrsqrt.f32 %v3429_v32  ;;  %vm3436_vm10 = vweird.f32 %v3429_v32 }
0x1267   : > { %v5853_v34 = vpop.eup %5852 }
0x1268   : > { %v3431_v35 = vmul.f32 %v5853_v34, %v3429_v32  ;;  %vm3437_vm9 = vweird.f32 %v5853_v34  ;;  %v5552_v32 = vld [vmem:[%s7697_s2 + $0x528] sm:$0xff] }
0x1269   : > { %vm3438_vm12 = vmor %vm3436_vm10, %vm3437_vm9 }
0x126a   : > { %v3432_v36 = vmul.f32 %v5853_v34, %v3431_v35 }
0x126c   : > { %v3433_v37 = vmul.f32 0.5, %v3432_v36  ;;  %v5543_v36 = vld [vmem:[%s7697_s2 + $0x4e0] sm:$0xff] }
0x126d   : > { %3677 = vmatpush.msra.mxu0 %v5543_v36 }
0x126e   : > { %v3434_v38 = vsub.f32 1.5, %v3433_v37  ;;  %v5547_v37 = vld [vmem:[%s7697_s2 + $0x500] sm:$0xff] }
0x126f   : > { %3697 = vmatpush.msra.mxu1 %v5547_v37 }
0x1270   : > { %v3435_v39 = vmul.f32 %v5853_v34, %v3434_v38  ;;  %v5551_v38 = vld [vmem:[%s7697_s2 + $0x520] sm:$0xff] }
0x1272   : > { %v3439_v41 = vsel %vm3438_vm12, %v5853_v34, %v3435_v39  ;;  %v5572_v34 = vld [vmem:[%s7697_s2 + $0x5c8] sm:$0xff]  ;;  %v5571_v39 = vld [vmem:[%s7697_s2 + $0x5c0] sm:$0xff] }
0x1273   : > { %v3440_v42 = vmul.f32 %v3439_v41, %v3421_v14 }
0x1275   : > { %v3444_v43 = vmul.f32 %v5763_v40, %v3440_v42 }
0x1277   : > { %5528 = vmatmul.msk.f32.vlgmr.msrb.gmra.mxu2 %vm341_vm0, %v3444_v43 }
0x12fa   : > { %v3479_v51 = vpop.f32.mrf.mxu2 }
0x12fb   : > { %3492 = vrot.lane.b32.xlu0 %v3479_v51, %s5971_s23  ;;  %v3483_v52 = vmul.f32 0.044715, %v3479_v51  ;;  %v3482_v60 = vmul.f32 0.5, %v3479_v51 }
0x12fd   : > { %v3484_v54 = vmul.f32 %v3483_v52, %v3479_v51  ;;  %v5566_v52 = vld [vmem:[%s7697_s2 + $0x598] sm:$0xff] }
0x12ff   : > { %v3485_v55 = vmul.f32 %v3484_v54, %v3479_v51  ;;  %v5561_v54 = vld [vmem:[%s7697_s2 + $0x570] sm:$0xff] }
0x1301   : > { %v3486_v56 = vadd.f32 %v3485_v55, %v3479_v51  ;;  %v5562_v51 = vld [vmem:[%s7697_s2 + $0x578] sm:$0xff]  ;;  %v5565_v55 = vld [vmem:[%s7697_s2 + $0x590] sm:$0xff] }
0x1303   : > { %v3487_v57 = vmul.f32 0.7978846, %v3486_v56  ;;  %v5569_v56 = vld [vmem:[%s7697_s2 + $0x5b0] sm:$0xff] }
0x1305   : > { %5854 = vtanh.f32 %v3487_v57  ;;  %v5560_v57 = vld [vmem:[%s7697_s2 + $0x568] sm:$0xff] }
0x130b   : > { %v5855_v58 = vpop.eup %5854 }
0x130c   : > { %v3489_v59 = vadd.f32 1.0, %v5855_v58  ;;  %v5564_v58 = vld [vmem:[%s7697_s2 + $0x588] sm:$0xff] }
0x130e   : > { %v3490_v61 = vmul.f32 %v3489_v59, %v3482_v60  ;;  %v5568_v59 = vld [vmem:[%s7697_s2 + $0x5a8] sm:$0xff]  ;;  %v5559_v60 = vld [vmem:[%s7697_s2 + $0x560] sm:$0xff] }
0x136d   : > { %v3493_v62 = vpop.permute.xlu0 %3492 }
0x136e   : > { %v3495_v63 = vmul.f32 %v3493_v62, %v3490_v61  ;;  %v5563_v61 = vld [vmem:[%s7697_s2 + $0x580] sm:$0xff] }
0x136f   : > { %v5567_v62 = vld [vmem:[%s7697_s2 + $0x5a0] sm:$0xff] }
0x1370   : > { %5529 = vmatmul.msk.f32.vlgmr.msrb.gmra.mxu3 %vm1131_vm11, %v3495_v63  ;;  %v5578_v63 = vld [vmem:[%s7697_s2 + $0x5f8] sm:$0xff] }
0x1371   : > { %3814 = vmatpush.msrb.mxu3 %v5574_v6 }
0x1373   : > { %3815 = vmatpush.msrb.mxu3 %v5573_v28 }
0x1375   : > { %3816 = vmatpush.msrb.mxu3 %v5572_v34 }
0x1377   : > { %3817 = vmatpush.msrb.mxu3 %v5571_v39 }
0x13f3   : > { %v3516_v1 = vpop.f32.mrf.mxu3 }
0x13f4   : > { %v7155_v2 = vadd.f32 %v3516_v1, %v3421_v14  ;;  %v5554_v14 = vld [vmem:[%s7697_s2 + $0x538] sm:$0xff]  ;;  %v5577_v1 = vld [vmem:[%s7697_s2 + $0x5f0] sm:$0xff] }
0x13f5   : > { %3714 = vmatpush.msrb.mxu2 %v5554_v14 }
0x13f6   : > { %v3522_v3 = vmul.f32 %v7155_v2, %v7155_v2 }
0x13f7   : > { %3715 = vmatpush.msrb.mxu2 %v5553_v27 }
0x13f8   : > { %v3523_v4 = vsel %vm341_vm0, %v3522_v3, 0.0  ;;  %v5576_v3 = vld [vmem:[%s7697_s2 + $0x5e8] sm:$0xff] }
0x13f9   : > { %3524 = vadd.xlane.f32.xlu2 %v3523_v4  ;;  %3716 = vmatpush.msrb.mxu2 %v5552_v32  ;;  %v5575_v4 = vld [vmem:[%s7697_s2 + $0x5e0] sm:$0xff] }
0x13fb   : > { %3717 = vmatpush.msrb.mxu2 %v5551_v38 }
0x146c   : > { %v3525_v30 = vpop.xlane.xlu2 %3524 }
0x146d   : > { %v3526_v35 = vmul.f32 %v3525_v30, %v6147_v31 }
0x146f   : > { %v3527_v40 = vadd.f32 1e-06, %v3526_v35 }
0x1471   : > { %5856 = vrsqrt.f32 %v3527_v40  ;;  %vm3534_vm14 = vweird.f32 %v3527_v40 }
0x1477   : > { %v5857_v41 = vpop.eup %5856 }
0x1478   : > { %v3529_v42 = vmul.f32 %v5857_v41, %v3527_v40  ;;  %vm3535_vm13 = vweird.f32 %v5857_v41 }
0x1479   : > { %vm3536_vm15 = vmor %vm3534_vm14, %vm3535_vm13 }
0x147a   : > { %v3530_v43 = vmul.f32 %v5857_v41, %v3529_v42 }
0x147c   : > { %v3531_v44 = vmul.f32 0.5, %v3530_v43 }
0x147e   : > { %v3532_v45 = vsub.f32 1.5, %v3531_v44 }
0x1480   : > { %v3533_v46 = vmul.f32 %v5857_v41, %v3532_v45 }
0x1482   : > { %v3537_v49 = vsel %vm3536_vm15, %v5857_v41, %v3533_v46 }
0x1483   : > { %v3538_v5 = vmul.f32 %v3537_v49, %v7155_v2 }
0x1485   : > { %v3542_v50 = vmul.f32 %v5764_v47, %v3538_v5 }
0x1487   : > { %5583 = vmatmul.msk.f32.vlgmr.msrb.gmra.mxu0 %vm341_vm0, %v3542_v50  ;;  %5584 = vmatmul.msk.f32.vlgmr.msrb.gmra.mxu1 %vm341_vm0, %v3542_v50 }
0x1488   : > { %5585 = vmatmul.msk.f32.vlgmr.msra.gmra.mxu2 %vm341_vm0, %v3542_v50  ;;  %5589 = vmatmul.msk.f32.vlgmr.msra.gmra.mxu3 %vm341_vm0, %v3542_v50 }
0x1489   : > { %3754 = vmatpush.msrb.mxu0 %v5562_v51  ;;  %3774 = vmatpush.msrb.mxu1 %v5566_v52 }
0x148a   : > { %3794 = vmatpush.msra.mxu2 %v5570_v53 }
0x148b   : > { %3755 = vmatpush.msrb.mxu0 %v5561_v54  ;;  %3775 = vmatpush.msrb.mxu1 %v5565_v55 }
0x148c   : > { %3795 = vmatpush.msra.mxu2 %v5569_v56 }
0x148d   : > { %3756 = vmatpush.msrb.mxu0 %v5560_v57  ;;  %3776 = vmatpush.msrb.mxu1 %v5564_v58 }
0x148e   : > { %3796 = vmatpush.msra.mxu2 %v5568_v59 }
0x148f   : > { %5586 = vmatmul.msk.f32.vlgmr.msra.gmra.mxu0 %vm341_vm0, %v3542_v50  ;;  %5587 = vmatmul.msk.f32.vlgmr.msra.gmra.mxu1 %vm341_vm0, %v3542_v50 }
0x1490   : > { %5588 = vmatmul.msk.f32.vlgmr.msrb.gmra.mxu2 %vm341_vm0, %v3542_v50  ;;  %5593 = vmatmul.msk.f32.vlgmr.msrb.gmra.mxu3 %vm341_vm0, %v3542_v50 }
0x1491   : > { %3757 = vmatpush.msrb.mxu0 %v5559_v60  ;;  %3777 = vmatpush.msrb.mxu1 %v5563_v61 }
0x1492   : > { %3797 = vmatpush.msra.mxu2 %v5567_v62 }
0x1493   : > { %3834 = vmatpush.msra.mxu0 %v5578_v63 }
0x1495   : > { %3835 = vmatpush.msra.mxu0 %v5577_v1 }
0x1497   : > { %3836 = vmatpush.msra.mxu0 %v5576_v3  ;;  %5591 = vmatmul.msk.f32.vlgmr.msrb.gmra.mxu1 %vm341_vm0, %v3542_v50 }
0x1498   : > { %5590 = vmatmul.msk.f32.vlgmr.msrb.gmra.mxu0 %vm341_vm0, %v3542_v50  ;;  %5592 = vmatmul.msk.f32.vlgmr.msra.gmra.mxu2 %vm341_vm0, %v3542_v50 }
0x1499   : > { %3837 = vmatpush.msra.mxu0 %v5575_v4 }
0x14a0   : > { %5594 = vmatmul.msk.f32.vlgmr.msra.gmra.mxu0 %vm341_vm0, %v3542_v50 }
0x1504   : > { %v3619_v7 = vpop.f32.mrf.mxu0  ;;  %v3639_v0 = vpop.f32.mrf.mxu1 }
0x150b   : > { %v3659_v48 = vpop.f32.mrf.mxu2  ;;  %v3739_v8 = vpop.f32.mrf.mxu3 }
0x150c   : > { %5599 = vmatpush.xpose.msk.msra.mxu3 %vm666_vm5, %v3739_v8  ;;  %v3679_v9 = vpop.f32.mrf.mxu0  ;;  %v3699_v10 = vpop.f32.mrf.mxu1 }
0x150d   : > { %5595 = vmatpush.xpose.msk.msra.mxu1 %vm666_vm5, %v3699_v10 }
0x150f   : > { %5600 = vmatmul.msk.f32.vlgmr.msra.gmra.mxu3 %vm666_vm5, %v3659_v48 }
0x1510   : > { %5596 = vmatmul.msk.f32.vlgmr.msra.gmra.mxu1 %vm666_vm5, %v3619_v7 }
0x1513   : > { %v3719_v11 = vpop.f32.mrf.mxu2  ;;  %v3819_v12 = vpop.f32.mrf.mxu3 }
0x1514   : > { %5597 = vmatpush.xpose.msk.msrb.mxu2 %vm666_vm5, %v3719_v11  ;;  %4106 = vmatpush.msrb.mxu3 %v3819_v12  ;;  %v3779_v13 = vpop.f32.mrf.mxu1 }
0x1515   : > { %v3759_v33 = vpop.f32.mrf.mxu0  ;;  %4060 = vmatpush.msrb.mxu1 %v3779_v13 }
0x1516   : > { %5601 = vmatpush.xpose.msk.msrb.mxu0 %vm666_vm5, %v3759_v33 }
0x1517   : > { %5598 = vmatmul.msk.f32.vlgmr.msrb.gmra.mxu2 %vm666_vm5, %v3639_v0 }
0x1519   : > { %5602 = vmatmul.msk.f32.vlgmr.msrb.gmra.mxu0 %vm666_vm5, %v3679_v9 }
0x151b   : > { %v3799_v15 = vpop.f32.mrf.mxu2 }
0x151c   : > { %4083 = vmatpush.msra.mxu2 %v3799_v15 }
0x151d   : > { %v3839_v16 = vpop.f32.mrf.mxu0 }
0x151e   : > { %4129 = vmatpush.msra.mxu0 %v3839_v16 }
0x158d   : > { %v3865_v20 = vpop.f32.mrf.mxu1 }
0x158e   : > { %v3866_v30 = vadd.f32 %v5901_v29, %v3865_v20 }
0x1590   : > { %v3946_v32 = vsel %vm666_vm5, %v3866_v30, -inf }
0x1592   : > { %v3917_v17 = vpop.f32.mrf.mxu3 }
0x1593   : > { %v3918_v18 = vadd.f32 %v5898_v25, %v3917_v17 }
0x1595   : > { %v3952_v19 = vsel %vm666_vm5, %v3918_v18, -inf }
0x1596   : > { %3953 = vmax.xlane.f32.xlu2 %v3952_v19  ;;  %v3943_v22 = vpop.f32.mrf.mxu0 }
0x1597   : > { %v3944_v14 = vadd.f32 %v5899_v21, %v3943_v22 }
0x1599   : > { %v3955_v28 = vsel %vm666_vm5, %v3944_v14, -inf }
0x159a   : > { %v3891_v6 = vpop.f32.mrf.mxu2 }
0x159b   : > { %v3892_v26 = vadd.f32 %v5900_v24, %v3891_v6 }
0x159d   : > { %v3949_v27 = vsel %vm666_vm5, %v3892_v26, -inf }
0x159e   : > { %3950 = vmax.xlane.f32.xlu1 %v3949_v27  ;;  %3956 = vmax.xlane.f32.xlu2 %v3955_v28 }
0x15a6   : > { %3947 = vmax.xlane.f32.xlu1 %v3946_v32 }
0x1609   : > { %v3954_v34 = vpop.xlane.xlu2 %3953 }
0x160a   : > { %v3960_v35 = vsub.f32 %v3918_v18, %v3954_v34 }
0x160c   : > { %v3966_v36 = vmul.f32 1.442695, %v3960_v35 }
0x160e   : > { %5858 = vpow2.f32 %v3966_v36 }
0x1611   : > { %v3951_v37 = vpop.xlane.xlu1 %3950  ;;  %v3957_v38 = vpop.xlane.xlu2 %3956 }
0x1612   : > { %v3959_v39 = vsub.f32 %v3892_v26, %v3951_v37  ;;  %v3961_v42 = vsub.f32 %v3944_v14, %v3957_v38 }
0x1614   : > { %v5859_v40 = vpop.eup %5858  ;;  %v3964_v41 = vmul.f32 1.442695, %v3959_v39  ;;  %v3968_v44 = vmul.f32 1.442695, %v3961_v42  ;;  %v5580_v42 = vld [vmem:[%s7698_s3 + $0x68] sm:$0xff] }
0x1615   : > { %v3976_v43 = vsel %vm666_vm5, %v5859_v40, 0.0  ;;  %4175 = vmatpush.msrb.mxu2 %v5580_v42  ;;  %v5765_v42 = vld [vmem:[%s7701_s6 + $0x8] ss:$0 sm:$0xff] }
0x1616   : > { %5860 = vpow2.f32 %v3964_v41  ;;  %3977 = vadd.xlane.f32.xlu0 %v3976_v43  ;;  %v5581_v41 = vld [vmem:[%s7698_s3 + $0x70] sm:$0xff]  ;;  %v5579_v43 = vld [vmem:[%s7698_s3 + $0x60] sm:$0xff] }
0x1617   : > { %5862 = vpow2.f32 %v3968_v44  ;;  %4198 = vmatpush.msra.mxu3 %v5581_v41  ;;  %v5582_v44 = vld [vmem:[%s7698_s3 + $0x78] sm:$0xff]  ;;  %4152 = vmatpush.msra.mxu1 %v5579_v43 }
0x1618   : > { %4221 = vmatpush.msrb.mxu0 %v5582_v44 }
0x1619   : > { %v3948_v45 = vpop.xlane.xlu1 %3947 }
0x161a   : > { %v3958_v46 = vsub.f32 %v3866_v30, %v3948_v45 }
0x161c   : > { %v5861_v47 = vpop.eup %5860  ;;  %v3962_v49 = vmul.f32 1.442695, %v3958_v46 }
0x161d   : > { %v3973_v5 = vsel %vm666_vm5, %v5861_v47, 0.0  ;;  %v7339_v50 = vpop.eup %5862 }
0x161e   : > { %5864 = vpow2.f32 %v3962_v49  ;;  %3974 = vadd.xlane.f32.xlu1 %v3973_v5  ;;  %v3979_v53 = vsel %vm666_vm5, %v7339_v50, 0.0 }
0x1624   : > { %v7341_v51 = vpop.eup %5864 }
0x1625   : > { %v3970_v52 = vsel %vm666_vm5, %v7341_v51, 0.0 }
0x1626   : > { %3971 = vadd.xlane.f32.xlu2 %v3970_v52  ;;  %3980 = vadd.xlane.f32.xlu1 %v3979_v53 }
0x1689   : > { %v3978_v54 = vpop.xlane.xlu0 %3977 }
0x168a   : > { %5866 = vrcp.f32 %v3978_v54  ;;  %v4023_v59 = vand.u32 2147483648, %v3978_v54  ;;  %v4021_v61 = vand.u32 2147483647, %v3978_v54  ;;  %vm4017_vm2 = vweird.f32 %v3978_v54 }
0x168c   : > { %v4024_v1 = vor.u32 1.1754944e-38, %v4023_v59  ;;  %vm4022_vm4 = vcmp.eq.f32.partialorder %v4021_v61, 8.507059e+37 }
0x1690   : > { %v5867_v55 = vpop.eup %5866 }
0x1691   : > { %v4013_v56 = vmul.f32 %v5867_v55, %v3978_v54  ;;  %v3975_v57 = vpop.xlane.xlu1 %3974  ;;  %vm4018_vm1 = vweird.f32 %v5867_v55 }
0x1692   : > { %5868 = vrcp.f32 %v3975_v57  ;;  %vm4019_vm3 = vmor %vm4017_vm2, %vm4018_vm1  ;;  %v4008_v10 = vand.u32 2147483648, %v3975_v57  ;;  %v4006_v12 = vand.u32 2147483647, %v3975_v57  ;;  %vm4002_vm7 = vweird.f32 %v3975_v57 }
0x1693   : > { %v4014_v58 = vsub.f32 1.0, %v4013_v56 }
0x1694   : > { %v4009_v15 = vor.u32 1.1754944e-38, %v4008_v10  ;;  %vm4007_vm9 = vcmp.eq.f32.partialorder %v4006_v12, 8.507059e+37  ;;  %v5621_v10 = vld [vmem:[%s7697_s2 + $0x6c8] sm:$0xff]  ;;  %v5612_v12 = vld [vmem:[%s7697_s2 + $0x680] sm:$0xff] }
0x1695   : > { %v4015_v60 = vmul.f32 %v5867_v55, %v4014_v58 }
0x1697   : > { %v4016_v62 = vadd.f32 %v5867_v55, %v4015_v60 }
0x1698   : > { %v5869_v63 = vpop.eup %5868 }
0x1699   : > { %v4020_v3 = vsel %vm4019_vm3, %v5867_v55, %v4016_v62  ;;  %v3998_v4 = vmul.f32 %v5869_v63, %v3975_v57  ;;  %v3981_v7 = vpop.xlane.xlu1 %3980  ;;  %v3972_v0 = vpop.xlane.xlu2 %3971  ;;  %vm4003_vm6 = vweird.f32 %v5869_v63 }
0x169a   : > { %v4025_v48 = vsel %vm4022_vm4, %v4024_v1, %v4020_v3  ;;  %5870 = vrcp.f32 %v3981_v7  ;;  %vm4004_vm8 = vmor %vm4002_vm7, %vm4003_vm6  ;;  %v4038_v14 = vand.u32 2147483648, %v3981_v7  ;;  %v4036_v26 = vand.u32 2147483647, %v3981_v7  ;;  %v5619_v1 = vld [vmem:[%s7697_s2 + $0x6b8] sm:$0xff] }
0x169b   : > { %v4026_v8 = vmul.f32 %v5859_v40, %v4025_v48  ;;  %v3999_v9 = vsub.f32 1.0, %v3998_v4  ;;  %5872 = vrcp.f32 %v3972_v0  ;;  %v3993_v27 = vand.u32 2147483648, %v3972_v0  ;;  %v5623_v3 = vld [vmem:[%s7697_s2 + $0x6d8] sm:$0xff]  ;;  %v5614_v4 = vld [vmem:[%s7697_s2 + $0x690] sm:$0xff] }
0x169c   : > { %v3991_v20 = vand.u32 2147483647, %v3972_v0  ;;  %vm4032_vm13 = vweird.f32 %v3981_v7  ;;  %v4039_v30 = vor.u32 1.1754944e-38, %v4038_v14  ;;  %vm3987_vm15 = vweird.f32 %v3972_v0  ;;  %v5626_v48 = vld [vmem:[%s7697_s2 + $0x6f0] sm:$0xff] }
0x169d   : > { %v4000_v11 = vmul.f32 %v5869_v63, %v3999_v9  ;;  %5605 = vmatmul.msk.f32.vlgmr.msrb.gmra.mxu3 %vm666_vm5, %v4026_v8  ;;  %vm4037_vm1 = vcmp.eq.f32.partialorder %v4036_v26, 8.507059e+37  ;;  %v3994_v35 = vor.u32 1.1754944e-38, %v3993_v27  ;;  %v5613_v8 = vld [vmem:[%s7697_s2 + $0x688] sm:$0xff]  ;;  %v5642_v14 = vld [vmem:[%s7697_s2 + $0x870] sm:$0xff] }
0x169e   : > { %vm3992_vm3 = vcmp.eq.f32.partialorder %v3991_v20, 8.507059e+37  ;;  %4368 = vmatpush.msrb.mxu3 %v5623_v3  ;;  %v5617_v9 = vld [vmem:[%s7697_s2 + $0x6a8] sm:$0xff] }
0x169f   : > { %v4001_v33 = vadd.f32 %v5869_v63, %v4000_v11  ;;  %v5625_v11 = vld [vmem:[%s7697_s2 + $0x6e8] sm:$0xff] }
0x16a0   : > { %v5871_v13 = vpop.eup %5870  ;;  %v5637_v27 = vld [vmem:[%s7697_s2 + $0x848] sm:$0xff] }
0x16a1   : > { %v5873_v16 = vpop.eup %5872  ;;  %v4005_v17 = vsel %vm4004_vm8, %v5869_v63, %v4001_v33  ;;  %v4028_v25 = vmul.f32 %v5871_v13, %v3981_v7  ;;  %vm4033_vm10 = vweird.f32 %v5871_v13  ;;  %v5615_v63 = vld [vmem:[%s7697_s2 + $0x698] sm:$0xff]  ;;  %v5618_v7 = vld [vmem:[%s7697_s2 + $0x6b0] sm:$0xff]  ;;  %v5616_v33 = vld [vmem:[%s7697_s2 + $0x6a0] sm:$0xff] }
0x16a2   : > { %v4010_v18 = vsel %vm4007_vm9, %v4009_v15, %v4005_v17  ;;  %v3983_v19 = vmul.f32 %v5873_v16, %v3972_v0  ;;  %vm3988_vm12 = vweird.f32 %v5873_v16  ;;  %vm4034_vm14 = vmor %vm4032_vm13, %vm4033_vm10  ;;  %v5622_v0 = vld [vmem:[%s7697_s2 + $0x6d0] sm:$0xff]  ;;  %v5624_v15 = vld [vmem:[%s7697_s2 + $0x6e0] sm:$0xff] }
0x16a3   : > { %v4011_v22 = vmul.f32 %v5861_v47, %v4010_v18  ;;  %v4029_v21 = vsub.f32 1.0, %v4028_v25  ;;  %vm3989_vm2 = vmor %vm3987_vm15, %vm3988_vm12  ;;  %4369 = vmatpush.msrb.mxu3 %v5622_v0  ;;  %v5635_v17 = vld [vmem:[%s7697_s2 + $0x838] sm:$0xff] }
0x16a4   : > { %v3984_v6 = vsub.f32 1.0, %v3983_v19  ;;  %v5639_v25 = vld [vmem:[%s7697_s2 + $0x858] sm:$0xff]  ;;  %v5630_v19 = vld [vmem:[%s7697_s2 + $0x810] sm:$0xff] }
0x16a5   : > { %v4030_v24 = vmul.f32 %v5871_v13, %v4029_v21  ;;  %5604 = vmatmul.msk.f32.vlgmr.msra.gmra.mxu2 %vm666_vm5, %v4011_v22  ;;  %4370 = vmatpush.msrb.mxu3 %v5621_v10  ;;  %v5643_v18 = vld [vmem:[%s7697_s2 + $0x878] sm:$0xff]  ;;  %v5634_v22 = vld [vmem:[%s7697_s2 + $0x830] sm:$0xff] }
0x16a6   : > { %v3985_v28 = vmul.f32 %v5873_v16, %v3984_v6  ;;  %4348 = vmatpush.msra.mxu2 %v5619_v1  ;;  %v5638_v21 = vld [vmem:[%s7697_s2 + $0x850] sm:$0xff]  ;;  %v5629_v6 = vld [vmem:[%s7697_s2 + $0x808] sm:$0xff] }
0x16a7   : > { %v4031_v29 = vadd.f32 %v5871_v13, %v4030_v24  ;;  %v5633_v24 = vld [vmem:[%s7697_s2 + $0x828] sm:$0xff] }
0x16a8   : > { %v3986_v32 = vadd.f32 %v5873_v16, %v3985_v28  ;;  %4349 = vmatpush.msra.mxu2 %v5618_v7  ;;  %v5641_v28 = vld [vmem:[%s7697_s2 + $0x868] sm:$0xff] }
0x16a9   : > { %v4035_v34 = vsel %vm4034_vm14, %v5871_v13, %v4031_v29  ;;  %v5620_v13 = vld [vmem:[%s7697_s2 + $0x6c0] sm:$0xff] }
0x16aa   : > { %v4040_v36 = vsel %vm4037_vm1, %v4039_v30, %v4035_v34  ;;  %v3990_v37 = vsel %vm3989_vm2, %v5873_v16, %v3986_v32  ;;  %4350 = vmatpush.msra.mxu2 %v5617_v9  ;;  %v5631_v16 = vld [vmem:[%s7697_s2 + $0x818] sm:$0xff]  ;;  %4371 = vmatpush.msrb.mxu3 %v5620_v13  ;;  %v5628_v29 = vld [vmem:[%s7697_s2 + $0x800] sm:$0xff] }
0x16ab   : > { %v4041_v38 = vmul.f32 %v7339_v50, %v4040_v36  ;;  %v3995_v39 = vsel %vm3992_vm3, %v3994_v35, %v3990_v37  ;;  %v5632_v30 = vld [vmem:[%s7697_s2 + $0x820] sm:$0xff] }
0x16ac   : > { %v3996_v40 = vmul.f32 %v7341_v51, %v3995_v39  ;;  %4351 = vmatpush.msra.mxu2 %v5616_v33  ;;  %v5636_v32 = vld [vmem:[%s7697_s2 + $0x840] sm:$0xff] }
0x16ad   : > { %5606 = vmatmul.msk.f32.vlgmr.msra.gmra.mxu0 %vm666_vm5, %v4041_v38  ;;  %v5640_v34 = vld [vmem:[%s7697_s2 + $0x860] sm:$0xff] }
0x16ae   : > { %5603 = vmatmul.msk.f32.vlgmr.msrb.gmra.mxu1 %vm666_vm5, %v3996_v40 }
0x16af   : > { %4328 = vmatpush.msrb.mxu1 %v5615_v63 }
0x16b1   : > { %4329 = vmatpush.msrb.mxu1 %v5614_v4 }
0x16b3   : > { %4330 = vmatpush.msrb.mxu1 %v5613_v8 }
0x16b5   : > { %4331 = vmatpush.msrb.mxu1 %v5612_v12  ;;  %v5902_v12 = vld [vmem:[%s6256_s24 + $0x48] sm:$0xff] }
0x1720   : > { %v4108_v45 = vpop.f32.mrf.mxu3 }
0x1721   : > { %5609 = vmatmul.msk.f32.vlgmr.msra.gmra.mxu3 %vm666_vm5, %v4108_v45 }
0x1722   : > { %4448 = vmatpush.msra.mxu3 %v5639_v25 }
0x1724   : > { %4449 = vmatpush.msra.mxu3 %v5638_v21 }
0x1726   : > { %4450 = vmatpush.msra.mxu3 %v5637_v27 }
0x1728   : > { %v4085_v46 = vpop.f32.mrf.mxu2  ;;  %4451 = vmatpush.msra.mxu3 %v5636_v32 }
0x1729   : > { %5608 = vmatmul.msk.f32.vlgmr.msrb.gmra.mxu2 %vm666_vm5, %v4085_v46  ;;  %v5647_v46 = vld [vmem:[%s7697_s2 + $0x898] sm:$0xff] }
0x172a   : > { %v4131_v47 = vpop.f32.mrf.mxu0  ;;  %4428 = vmatpush.msrb.mxu2 %v5635_v17 }
0x172b   : > { %v4062_v49 = vpop.f32.mrf.mxu1  ;;  %5610 = vmatmul.msk.f32.vlgmr.msrb.gmra.mxu0 %vm666_vm5, %v4131_v47  ;;  %v5651_v47 = vld [vmem:[%s7697_s2 + $0x8b8] sm:$0xff] }
0x172c   : > { %5607 = vmatmul.msk.f32.vlgmr.msra.gmra.mxu1 %vm666_vm5, %v4062_v49  ;;  %4429 = vmatpush.msrb.mxu2 %v5634_v22  ;;  %v5655_v49 = vld [vmem:[%s7697_s2 + $0x8d8] sm:$0xff]  ;;  %v5904_v22 = vld [vmem:[%s6256_s24 + $0x40] sm:$0xff] }
0x172d   : > { %4408 = vmatpush.msra.mxu1 %v5631_v16 }
0x172e   : > { %4430 = vmatpush.msrb.mxu2 %v5633_v24 }
0x172f   : > { %4409 = vmatpush.msra.mxu1 %v5630_v19 }
0x1730   : > { %4431 = vmatpush.msrb.mxu2 %v5632_v30 }
0x1731   : > { %4410 = vmatpush.msra.mxu1 %v5629_v6 }
0x1733   : > { %4411 = vmatpush.msra.mxu1 %v5628_v29 }
0x17a4   : > { %v4200_v50 = vpop.f32.mrf.mxu3 }
0x17a5   : > { %v4229_v56 = vsel %vm341_vm0, %v4200_v50, 0.0  ;;  %v5646_v50 = vld [vmem:[%s7697_s2 + $0x890] sm:$0xff] }
0x17a8   : > { %v4223_v54 = vpop.f32.mrf.mxu0 }
0x17a9   : > { %v4154_v5 = vpop.f32.mrf.mxu1  ;;  %v4231_v58 = vsel %vm341_vm0, %v4223_v54, 0.0  ;;  %v5645_v54 = vld [vmem:[%s7697_s2 + $0x888] sm:$0xff] }
0x17aa   : > { %v4226_v52 = vsel %vm341_vm0, %v4154_v5, 0.0  ;;  %v5659_v5 = vld [vmem:[%s7697_s2 + $0x8f8] sm:$0xff] }
0x17ac   : > { %v4177_v51 = vpop.f32.mrf.mxu2 }
0x17ad   : > { %v4227_v53 = vsel %vm341_vm0, %v4177_v51, 0.0  ;;  %v5650_v51 = vld [vmem:[%s7697_s2 + $0x8b0] sm:$0xff] }
0x17ae   : > { %v4228_v55 = vadd.f32 %v4227_v53, %v4226_v52  ;;  %v5654_v52 = vld [vmem:[%s7697_s2 + $0x8d0] sm:$0xff] }
0x17af   : > { %v5658_v53 = vld [vmem:[%s7697_s2 + $0x8f0] sm:$0xff] }
0x17b0   : > { %v4230_v57 = vadd.f32 %v4229_v56, %v4228_v55  ;;  %v5649_v55 = vld [vmem:[%s7697_s2 + $0x8a8] sm:$0xff] }
0x17b1   : > { %v5653_v56 = vld [vmem:[%s7697_s2 + $0x8c8] sm:$0xff] }
0x17b2   : > { %v4232_v59 = vadd.f32 %v4231_v58, %v4230_v57  ;;  %v5657_v57 = vld [vmem:[%s7697_s2 + $0x8e8] sm:$0xff]  ;;  %v5644_v58 = vld [vmem:[%s7697_s2 + $0x880] sm:$0xff] }
0x17b4   : > { %v7374_v60 = vadd.f32 %v4232_v59, %v7155_v2  ;;  %v5627_v2 = vld [vmem:[%s7697_s2 + $0x6f8] sm:$0xff]  ;;  %v5648_v59 = vld [vmem:[%s7697_s2 + $0x8a0] sm:$0xff] }
0x17b5   : > { %4388 = vmatpush.msra.mxu0 %v5627_v2 }
0x17b6   : > { %v4236_v61 = vmul.f32 %v7374_v60, %v7374_v60 }
0x17b7   : > { %4389 = vmatpush.msra.mxu0 %v5626_v48 }
0x17b8   : > { %v4237_v62 = vsel %vm341_vm0, %v4236_v61, 0.0  ;;  %v5652_v61 = vld [vmem:[%s7697_s2 + $0x8c0] sm:$0xff] }
0x17b9   : > { %4238 = vadd.xlane.f32.xlu2 %v4237_v62  ;;  %4390 = vmatpush.msra.mxu0 %v5625_v11  ;;  %v5656_v62 = vld [vmem:[%s7697_s2 + $0x8e0] sm:$0xff] }
0x17bb   : > { %4391 = vmatpush.msra.mxu0 %v5624_v15  ;;  %v5903_v15 = vld [vmem:[%s6256_s24 + $0x50] sm:$0xff] }
0x17bd   : > { %4468 = vmatpush.msrb.mxu0 %v5643_v18 }
0x17bf   : > { %4469 = vmatpush.msrb.mxu0 %v5642_v14  ;;  %v5905_v14 = vld [vmem:[%s6256_s24 + $0x58] sm:$0xff]  ;;  %s313_s24 = scalar_lea.vmem [#allocation2], %s5188_s25 }
0x17c0   : > { %s5110_s13 = sshll.u32 %s313_s24, 4  ;;  %s5111_s13 = int_to_ptr.vmem [resolvable:$true] %s5110_s13 }
0x17c1   : > { %4470 = vmatpush.msrb.mxu0 %v5641_v28 }
0x17c3   : > { %4471 = vmatpush.msrb.mxu0 %v5640_v34 }
0x182c   : > { %v4239_v26 = vpop.xlane.xlu2 %4238 }
0x182d   : > { %v4240_v20 = vmul.f32 %v4239_v26, %v6147_v31 }
0x182f   : > { %v4241_v35 = vadd.f32 1e-06, %v4240_v20 }
0x1831   : > { %5874 = vrsqrt.f32 %v4241_v35  ;;  %vm4248_vm6 = vweird.f32 %v4241_v35 }
0x1837   : > { %v5875_v36 = vpop.eup %5874 }
0x1838   : > { %v4243_v37 = vmul.f32 %v5875_v36, %v4241_v35  ;;  %vm4249_vm4 = vweird.f32 %v5875_v36 }
0x1839   : > { %vm4250_vm7 = vmor %vm4248_vm6, %vm4249_vm4 }
0x183a   : > { %v4244_v38 = vmul.f32 %v5875_v36, %v4243_v37 }
0x183c   : > { %v4245_v39 = vmul.f32 0.5, %v4244_v38 }
0x183e   : > { %v4246_v40 = vsub.f32 1.5, %v4245_v39 }
0x1840   : > { %v4247_v41 = vmul.f32 %v5875_v36, %v4246_v40 }
0x1842   : > { %v4251_v43 = vsel %vm4250_vm7, %v5875_v36, %v4247_v41 }
0x1843   : > { %v4252_v44 = vmul.f32 %v4251_v43, %v7374_v60 }
0x1845   : > { %v4256_v45 = vmul.f32 %v5765_v42, %v4252_v44 }
0x1847   : > { %5664 = vmatmul.msk.f32.vlgmr.msrb.gmra.mxu1 %vm341_vm0, %v4256_v45  ;;  %5665 = vmatmul.msk.f32.vlgmr.msra.gmra.mxu2 %vm341_vm0, %v4256_v45 }
0x1848   : > { %5666 = vmatmul.msk.f32.vlgmr.msrb.gmra.mxu3 %vm341_vm0, %v4256_v45  ;;  %5667 = vmatmul.msk.f32.vlgmr.msra.gmra.mxu0 %vm341_vm0, %v4256_v45 }
0x1849   : > { %4488 = vmatpush.msrb.mxu1 %v5647_v46  ;;  %4508 = vmatpush.msra.mxu2 %v5651_v47 }
0x184a   : > { %4528 = vmatpush.msrb.mxu3 %v5655_v49  ;;  %4548 = vmatpush.msra.mxu0 %v5659_v5  ;;  %v5661_v49 = vld [vmem:[%s7698_s3 + $0xa8] sm:$0xff] }
0x184b   : > { %4489 = vmatpush.msrb.mxu1 %v5646_v50  ;;  %4509 = vmatpush.msra.mxu2 %v5650_v51 }
0x184c   : > { %4529 = vmatpush.msrb.mxu3 %v5654_v52  ;;  %4549 = vmatpush.msra.mxu0 %v5658_v53 }
0x184d   : > { %4490 = vmatpush.msrb.mxu1 %v5645_v54  ;;  %4510 = vmatpush.msra.mxu2 %v5649_v55 }
0x184e   : > { %4530 = vmatpush.msrb.mxu3 %v5653_v56  ;;  %4550 = vmatpush.msra.mxu0 %v5657_v57 }
0x184f   : > { %5668 = vmatmul.msk.f32.vlgmr.msra.gmra.mxu1 %vm341_vm0, %v7028_v23  ;;  %5669 = vmatmul.msk.f32.vlgmr.msrb.gmra.mxu2 %vm341_vm0, %v7028_v23 }
0x1850   : > { %5670 = vmatmul.msk.f32.vlgmr.msra.gmra.mxu3 %vm341_vm0, %v7028_v23  ;;  %5671 = vmatmul.msk.f32.vlgmr.msrb.gmra.mxu0 %vm341_vm0, %v7028_v23 }
0x1851   : > { %4491 = vmatpush.msrb.mxu1 %v5644_v58  ;;  %4511 = vmatpush.msra.mxu2 %v5648_v59 }
0x1852   : > { %4531 = vmatpush.msrb.mxu3 %v5652_v61  ;;  %4551 = vmatpush.msra.mxu0 %v5656_v62 }
0x1857   : > { %5672 = vmatmul.msk.f32.vlgmr.msrb.gmra.mxu1 %vm341_vm0, %v7028_v23  ;;  %5673 = vmatmul.msk.f32.vlgmr.msra.gmra.mxu2 %vm341_vm0, %v7028_v23 }
0x1858   : > { %5674 = vmatmul.msk.f32.vlgmr.msrb.gmra.mxu3 %vm341_vm0, %v7028_v23  ;;  %5675 = vmatmul.msk.f32.vlgmr.msra.gmra.mxu0 %vm341_vm0, %v7028_v23 }
0x18c4   : > { %v4333_v63 = vpop.f32.mrf.mxu1 }
0x18c5   : > { %v4393_v1 = vpop.f32.mrf.mxu0 }
0x18ca   : > { %v4353_v3 = vpop.f32.mrf.mxu2 }
0x18cb   : > { %v4373_v2 = vpop.f32.mrf.mxu3 }
0x18cc   : > { %v4413_v4 = vpop.f32.mrf.mxu1 }
0x18cd   : > { %v4473_v7 = vpop.f32.mrf.mxu0  ;;  %5676 = vmatpush.xpose.msk.msra.mxu1 %vm666_vm5, %v4413_v4 }
0x18ce   : > { %5682 = vmatpush.xpose.msk.msrb.mxu0 %vm666_vm5, %v4473_v7 }
0x18d0   : > { %5677 = vmatmul.msk.f32.vlgmr.msra.gmra.mxu1 %vm666_vm5, %v4333_v63 }
0x18d1   : > { %5683 = vmatmul.msk.f32.vlgmr.msrb.gmra.mxu0 %vm666_vm5, %v4393_v1 }
0x18d2   : > { %v4433_v0 = vpop.f32.mrf.mxu2 }
0x18d3   : > { %v4453_v48 = vpop.f32.mrf.mxu3  ;;  %5678 = vmatpush.xpose.msk.msrb.mxu2 %vm666_vm5, %v4433_v0 }
0x18d4   : > { %5680 = vmatpush.xpose.msk.msra.mxu3 %vm666_vm5, %v4453_v48  ;;  %v4493_v23 = vpop.f32.mrf.mxu1 }
0x18d5   : > { %v4553_v8 = vpop.f32.mrf.mxu0  ;;  %4774 = vmatpush.msrb.mxu1 %v4493_v23 }
0x18d6   : > { %4843 = vmatpush.msra.mxu0 %v4553_v8  ;;  %5679 = vmatmul.msk.f32.vlgmr.msrb.gmra.mxu2 %vm666_vm5, %v4353_v3 }
0x18d7   : > { %5681 = vmatmul.msk.f32.vlgmr.msra.gmra.mxu3 %vm666_vm5, %v4373_v2 }
0x18da   : > { %v4513_v9 = vpop.f32.mrf.mxu2 }
0x18db   : > { %v4533_v10 = vpop.f32.mrf.mxu3  ;;  %4797 = vmatpush.msra.mxu2 %v4513_v9 }
0x18dc   : > { %4820 = vmatpush.msrb.mxu3 %v4533_v10 }
0x18dd   : > { %4889 = vmatpush.msrb.mxu2 %v5661_v49 }
0x194d   : > { %v4579_v25 = vpop.f32.mrf.mxu1 }
0x194e   : > { %v4657_v19 = vpop.f32.mrf.mxu0  ;;  %v4580_v21 = vadd.f32 %v5904_v22, %v4579_v25 }
0x194f   : > { %v4658_v6 = vadd.f32 %v5905_v14, %v4657_v19 }
0x1950   : > { %v4660_v24 = vsel %vm666_vm5, %v4580_v21, -inf }
0x1951   : > { %v4669_v26 = vsel %vm666_vm5, %v4658_v6, -inf }
0x1959   : > { %v4605_v11 = vpop.f32.mrf.mxu2 }
0x195a   : > { %v4606_v33 = vadd.f32 %v5902_v12, %v4605_v11  ;;  %v4631_v13 = vpop.f32.mrf.mxu3 }
0x195b   : > { %v4632_v16 = vadd.f32 %v5903_v15, %v4631_v13 }
0x195c   : > { %v4663_v17 = vsel %vm666_vm5, %v4606_v33, -inf }
0x195d   : > { %v4666_v18 = vsel %vm666_vm5, %v4632_v16, -inf  ;;  %4664 = vmax.xlane.f32.xlu1 %v4663_v17 }
0x195e   : > { %4667 = vmax.xlane.f32.xlu2 %v4666_v18 }
0x1965   : > { %4661 = vmax.xlane.f32.xlu1 %v4660_v24 }
0x1966   : > { %4670 = vmax.xlane.f32.xlu2 %v4669_v26 }
0x19d0   : > { %v4665_v27 = vpop.xlane.xlu1 %4664 }
0x19d1   : > { %v4668_v28 = vpop.xlane.xlu2 %4667  ;;  %v4673_v20 = vsub.f32 %v4606_v33, %v4665_v27 }
0x19d2   : > { %v4674_v29 = vsub.f32 %v4632_v16, %v4668_v28 }
0x19d3   : > { %v4678_v30 = vmul.f32 1.442695, %v4673_v20 }
0x19d4   : > { %v4680_v32 = vmul.f32 1.442695, %v4674_v29 }
0x19d5   : > { %5876 = vpow2.f32 %v4678_v30 }
0x19d6   : > { %5878 = vpow2.f32 %v4680_v32 }
0x19d8   : > { %v4662_v34 = vpop.xlane.xlu1 %4661 }
0x19d9   : > { %v4671_v35 = vpop.xlane.xlu2 %4670  ;;  %v4672_v36 = vsub.f32 %v4580_v21, %v4662_v34 }
0x19da   : > { %v4675_v37 = vsub.f32 %v4658_v6, %v4671_v35  ;;  %v5662_v35 = vld [vmem:[%s7698_s3 + $0xb0] sm:$0xff] }
0x19db   : > { %v5877_v38 = vpop.eup %5876  ;;  %v4676_v39 = vmul.f32 1.442695, %v4672_v36  ;;  %4912 = vmatpush.msra.mxu3 %v5662_v35  ;;  %v5660_v36 = vld [vmem:[%s7698_s3 + $0xa0] sm:$0xff]  ;;  %v5071_v35 = vld [vmem:[%s7702_s7 + $0x10] sm:$0xff] }
0x19dc   : > { %v5879_v40 = vpop.eup %5878  ;;  %v4682_v41 = vmul.f32 1.442695, %v4675_v37  ;;  %v4687_v42 = vsel %vm666_vm5, %v5877_v38, 0.0  ;;  %v5663_v37 = vld [vmem:[%s7698_s3 + $0xb8] sm:$0xff]  ;;  %4866 = vmatpush.msra.mxu1 %v5660_v36  ;;  %v5070_v36 = vld [vmem:[%s7702_s7 + $0x8] sm:$0xff] }
0x19dd   : > { %5880 = vpow2.f32 %v4676_v39  ;;  %v4690_v43 = vsel %vm666_vm5, %v5879_v40, 0.0  ;;  %4688 = vadd.xlane.f32.xlu1 %v4687_v42  ;;  %4935 = vmatpush.msrb.mxu0 %v5663_v37  ;;  %v5069_v37 = vld [vmem:[%s7702_s7] sm:$0xff] }
0x19de   : > { %5882 = vpow2.f32 %v4682_v41  ;;  %4691 = vadd.xlane.f32.xlu2 %v4690_v43 }
0x19e3   : > { %v7566_v44 = vpop.eup %5880 }
0x19e4   : > { %v7568_v45 = vpop.eup %5882  ;;  %v4684_v46 = vsel %vm666_vm5, %v7566_v44, 0.0 }
0x19e5   : > { %v4693_v47 = vsel %vm666_vm5, %v7568_v45, 0.0  ;;  %4685 = vadd.xlane.f32.xlu1 %v4684_v46 }
0x19e6   : > { %4694 = vadd.xlane.f32.xlu0 %v4693_v47 }
0x1a50   : > { %v4689_v5 = vpop.xlane.xlu1 %4688 }
0x1a51   : > { %v4692_v50 = vpop.xlane.xlu2 %4691  ;;  %5884 = vrcp.f32 %v4689_v5  ;;  %v4722_v59 = vand.u32 2147483648, %v4689_v5  ;;  %v4720_v63 = vand.u32 2147483647, %v4689_v5  ;;  %vm4716_vm10 = vweird.f32 %v4689_v5 }
0x1a52   : > { %5886 = vrcp.f32 %v4692_v50  ;;  %v4737_v61 = vand.u32 2147483648, %v4692_v50  ;;  %v4735_v3 = vand.u32 2147483647, %v4692_v50  ;;  %vm4731_vm12 = vweird.f32 %v4692_v50 }
0x1a53   : > { %v4723_v0 = vor.u32 1.1754944e-38, %v4722_v59  ;;  %vm4721_vm15 = vcmp.eq.f32.partialorder %v4720_v63, 8.507059e+37 }
0x1a54   : > { %v4738_v23 = vor.u32 1.1754944e-38, %v4737_v61  ;;  %vm4736_vm1 = vcmp.eq.f32.partialorder %v4735_v3, 8.507059e+37 }
0x1a57   : > { %v5885_v51 = vpop.eup %5884 }
0x1a58   : > { %v5887_v52 = vpop.eup %5886  ;;  %v4712_v53 = vmul.f32 %v5885_v51, %v4689_v5  ;;  %v4686_v54 = vpop.xlane.xlu1 %4685  ;;  %vm4717_vm8 = vweird.f32 %v5885_v51 }
0x1a59   : > { %v4727_v55 = vmul.f32 %v5887_v52, %v4692_v50  ;;  %v4695_v56 = vpop.xlane.xlu0 %4694  ;;  %5888 = vrcp.f32 %v4686_v54  ;;  %vm4732_vm9 = vweird.f32 %v5887_v52  ;;  %vm4718_vm13 = vmor %vm4716_vm10, %vm4717_vm8  ;;  %v4707_v25 = vand.u32 2147483648, %v4686_v54 }
0x1a5a   : > { %v4713_v57 = vsub.f32 1.0, %v4712_v53  ;;  %5890 = vrcp.f32 %v4695_v56  ;;  %vm4733_vm14 = vmor %vm4731_vm12, %vm4732_vm9  ;;  %v4752_v18 = vand.u32 2147483648, %v4695_v56  ;;  %v4705_v22 = vand.u32 2147483647, %v4686_v54 }
0x1a5b   : > { %v4728_v58 = vsub.f32 1.0, %v4727_v55  ;;  %v4750_v14 = vand.u32 2147483647, %v4695_v56  ;;  %vm4701_vm4 = vweird.f32 %v4686_v54  ;;  %vm4746_vm6 = vweird.f32 %v4695_v56 }
0x1a5c   : > { %v4714_v62 = vmul.f32 %v5885_v51, %v4713_v57  ;;  %v4708_v26 = vor.u32 1.1754944e-38, %v4707_v25  ;;  %v4753_v27 = vor.u32 1.1754944e-38, %v4752_v18  ;;  %vm4706_vm9 = vcmp.eq.f32.partialorder %v4705_v22, 8.507059e+37  ;;  %v5695_v57 = vld [vmem:[%s7699_s4 + $0x70] sm:$0xff]  ;;  %v5697_v25 = vld [vmem:[%s7700_s5 + $0xc0] sm:$0xff] }
0x1a5d   : > { %v4729_v1 = vmul.f32 %v5887_v52, %v4728_v58  ;;  %vm4751_vm10 = vcmp.eq.f32.partialorder %v4750_v14, 8.507059e+37  ;;  %v5694_v58 = vld [vmem:[%s7699_s4 + $0x68] sm:$0xff] }
0x1a5e   : > { %v4715_v2 = vadd.f32 %v5885_v51, %v4714_v62 }
0x1a5f   : > { %v5889_v4 = vpop.eup %5888  ;;  %v4730_v7 = vadd.f32 %v5887_v52, %v4729_v1 }
0x1a60   : > { %v5891_v48 = vpop.eup %5890  ;;  %v4719_v8 = vsel %vm4718_vm13, %v5885_v51, %v4715_v2  ;;  %v4697_v9 = vmul.f32 %v5889_v4, %v4686_v54  ;;  %vm4702_vm2 = vweird.f32 %v5889_v4 }
0x1a61   : > { %v4734_v10 = vsel %vm4733_vm14, %v5887_v52, %v4730_v7  ;;  %v4724_v11 = vsel %vm4721_vm15, %v4723_v0, %v4719_v8  ;;  %v4742_v12 = vmul.f32 %v5891_v48, %v4695_v56  ;;  %vm4747_vm3 = vweird.f32 %v5891_v48  ;;  %vm4703_vm7 = vmor %vm4701_vm4, %vm4702_vm2  ;;  %v5696_v56 = vld [vmem:[%s7699_s4 + $0x78] sm:$0xff]  ;;  %v5766_v0 = vld [vmem:[%s7701_s6 + $0xa] ss:$0 sm:$0xff] }
0x1a62   : > { %v4739_v33 = vsel %vm4736_vm1, %v4738_v23, %v4734_v10  ;;  %v4725_v13 = vmul.f32 %v5877_v38, %v4724_v11  ;;  %v4698_v15 = vsub.f32 1.0, %v4697_v9  ;;  %vm4748_vm8 = vmor %vm4746_vm6, %vm4747_vm3  ;;  %v5704_v9 = vld [vmem:[%s7700_s5 + $0xf8] sm:$0xff]  ;;  %v5703_v10 = vld [vmem:[%s7700_s5 + $0xf0] sm:$0xff] }
0x1a63   : > { %v4740_v16 = vmul.f32 %v5879_v40, %v4739_v33  ;;  %v4743_v17 = vsub.f32 1.0, %v4742_v12  ;;  %v5702_v11 = vld [vmem:[%s7700_s5 + $0xe8] sm:$0xff]  ;;  %v5701_v12 = vld [vmem:[%s7700_s5 + $0xe0] sm:$0xff]  ;;  %v5700_v33 = vld [vmem:[%s7700_s5 + $0xd8] sm:$0xff] }
0x1a64   : > { %v4699_v19 = vmul.f32 %v5889_v4, %v4698_v15  ;;  %5685 = vmatmul.msk.f32.vlgmr.msra.gmra.mxu2 %vm666_vm5, %v4725_v13  ;;  %v5699_v13 = vld [vmem:[%s7700_s5 + $0xd0] sm:$0xff]  ;;  %v5698_v15 = vld [vmem:[%s7700_s5 + $0xc8] sm:$0xff] }
0x1a65   : > { %v4744_v21 = vmul.f32 %v5891_v48, %v4743_v17  ;;  %5686 = vmatmul.msk.f32.vlgmr.msrb.gmra.mxu3 %vm666_vm5, %v4740_v16  ;;  %5033 = vmatpush.msra.mxu2 %v5704_v9 }
0x1a66   : > { %v4700_v6 = vadd.f32 %v5889_v4, %v4699_v19 }
0x1a67   : > { %v4745_v24 = vadd.f32 %v5891_v48, %v4744_v21  ;;  %5034 = vmatpush.msra.mxu2 %v5703_v10 }
0x1a68   : > { %v4704_v28 = vsel %vm4703_vm7, %v5889_v4, %v4700_v6 }
0x1a69   : > { %v4749_v20 = vsel %vm4748_vm8, %v5891_v48, %v4745_v24  ;;  %v4709_v29 = vsel %vm4706_vm9, %v4708_v26, %v4704_v28  ;;  %5035 = vmatpush.msra.mxu2 %v5702_v11 }
0x1a6a   : > { %v4754_v30 = vsel %vm4751_vm10, %v4753_v27, %v4749_v20  ;;  %v4710_v32 = vmul.f32 %v7566_v44, %v4709_v29 }
0x1a6b   : > { %v4755_v34 = vmul.f32 %v7568_v45, %v4754_v30  ;;  %5036 = vmatpush.msra.mxu2 %v5701_v12 }
0x1a6c   : > { %5684 = vmatmul.msk.f32.vlgmr.msrb.gmra.mxu1 %vm666_vm5, %v4710_v32 }
0x1a6d   : > { %5687 = vmatmul.msk.f32.vlgmr.msra.gmra.mxu0 %vm666_vm5, %v4755_v34  ;;  %5000 = vmatpush.msrb.mxu1 %v5696_v56  ;;  %v5072_v34 = vld [vmem:[%s7702_s7 + $0x18] sm:$0xff] }
0x1a6e   : > { %5037 = vmatpush.msra.mxu2 %v5700_v33  ;;  %5088 = vmatpush.msrb.mxu3 %v5072_v34 }
0x1a6f   : > { %5001 = vmatpush.msrb.mxu1 %v5695_v57 }
0x1a70   : > { %5038 = vmatpush.msra.mxu2 %v5699_v13  ;;  %5089 = vmatpush.msrb.mxu3 %v5071_v35 }
0x1a71   : > { %5002 = vmatpush.msrb.mxu1 %v5694_v58 }
0x1a72   : > { %5039 = vmatpush.msra.mxu2 %v5698_v15  ;;  %5090 = vmatpush.msrb.mxu3 %v5070_v36 }
0x1a74   : > { %5040 = vmatpush.msra.mxu2 %v5697_v25  ;;  %5091 = vmatpush.msrb.mxu3 %v5069_v37 }
0x1ae7   : > { %v4799_v38 = vpop.f32.mrf.mxu2 }
0x1ae8   : > { %v4822_v39 = vpop.f32.mrf.mxu3  ;;  %5689 = vmatmul.msk.f32.vlgmr.msrb.gmra.mxu2 %vm666_vm5, %v4799_v38 }
0x1ae9   : > { %5690 = vmatmul.msk.f32.vlgmr.msra.gmra.mxu3 %vm666_vm5, %v4822_v39  ;;  %v4776_v40 = vpop.f32.mrf.mxu1 }
0x1aea   : > { %v4845_v41 = vpop.f32.mrf.mxu0  ;;  %5688 = vmatmul.msk.f32.vlgmr.msra.gmra.mxu1 %vm666_vm5, %v4776_v40 }
0x1aeb   : > { %5691 = vmatmul.msk.f32.vlgmr.msrb.gmra.mxu0 %vm666_vm5, %v4845_v41 }
0x1b67   : > { %v4868_v42 = vpop.f32.mrf.mxu1 }
0x1b68   : > { %v4940_v44 = vsel %vm341_vm0, %v4868_v42, 0.0  ;;  %v4937_v47 = vpop.f32.mrf.mxu0 }
0x1b69   : > { %v4945_v51 = vsel %vm341_vm0, %v4937_v47, 0.0  ;;  %v5767_v47 = vld [vmem:[%s7701_s6 + $0xb] ss:$0 sm:$0xff] }
0x1b6b   : > { %v4891_v43 = vpop.f32.mrf.mxu2 }
0x1b6c   : > { %v4941_v45 = vsel %vm341_vm0, %v4891_v43, 0.0  ;;  %v4914_v46 = vpop.f32.mrf.mxu3 }
0x1b6d   : > { %v4942_v49 = vadd.f32 %v4941_v45, %v4940_v44  ;;  %v4943_v5 = vsel %vm341_vm0, %v4914_v46, 0.0 }
0x1b6f   : > { %v4944_v50 = vadd.f32 %v4943_v5, %v4942_v49 }
0x1b71   : > { %v4946_v52 = vadd.f32 %v4945_v51, %v4944_v50 }
0x1b73   : > { %v4947_v53 = vadd.f32 %v4946_v52, %v7374_v60  ;;  %v5693_v60 = vld [vmem:[%s7699_s4 + $0x60] sm:$0xff] }
0x1b74   : > { %5003 = vmatpush.msrb.mxu1 %v5693_v60 }
0x1b75   : > { %v4950_v54 = vmul.f32 %v4947_v53, %v4947_v53 }
0x1b77   : > { %v4951_v55 = vsel %vm341_vm0, %v4950_v54, 0.0 }
0x1b78   : > { %4952 = vadd.xlane.f32.xlu2 %v4951_v55 }
0x1beb   : > { %v4953_v59 = vpop.xlane.xlu2 %4952 }
0x1bec   : > { %v4954_v61 = vmul.f32 %v4953_v59, %v6147_v31 }
0x1bee   : > { %v4955_v62 = vadd.f32 1e-06, %v4954_v61 }
0x1bf0   : > { %5892 = vrsqrt.f32 %v4955_v62  ;;  %vm4962_vm12 = vweird.f32 %v4955_v62 }
0x1bf6   : > { %v5893_v63 = vpop.eup %5892 }
0x1bf7   : > { %v4957_v1 = vmul.f32 %v5893_v63, %v4955_v62  ;;  %vm4963_vm5 = vweird.f32 %v5893_v63 }
0x1bf8   : > { %vm4964_vm13 = vmor %vm4962_vm12, %vm4963_vm5 }
0x1bf9   : > { %v4958_v3 = vmul.f32 %v5893_v63, %v4957_v1 }
0x1bfb   : > { %v4959_v2 = vmul.f32 0.5, %v4958_v3 }
0x1bfd   : > { %v4960_v4 = vsub.f32 1.5, %v4959_v2 }
0x1bff   : > { %v4961_v7 = vmul.f32 %v5893_v63, %v4960_v4 }
0x1c01   : > { %v4965_v48 = vsel %vm4964_vm13, %v5893_v63, %v4961_v7 }
0x1c02   : > { %v4966_v23 = vmul.f32 %v4965_v48, %v4947_v53 }
0x1c04   : > { %v4970_v8 = vmul.f32 %v5766_v0, %v4966_v23 }
0x1c06   : > { %5705 = vmatmul.msk.f32.vlgmr.msrb.gmra.mxu1 %vm341_vm0, %v4970_v8 }
0x1c83   : > { %v5005_v16 = vpop.f32.mrf.mxu1 }
0x1c84   : > { %5018 = vrot.lane.b32.xlu1 %v5005_v16, %s5971_s23  ;;  %v5009_v17 = vmul.f32 0.044715, %v5005_v16  ;;  %v5008_v24 = vmul.f32 0.5, %v5005_v16  ;;  %s5926_s23 = scalar_lea.hbm %s7703_s8, 16 }
0x1c85   : > { %p5928_p1 = scmp.lt.s32.totalorder %s5926_s23, %s5922_s20 }
0x1c86   : > { %v5010_v18 = vmul.f32 %v5009_v17, %v5005_v16 }
0x1c87   : > { %p5929_p2 = por %p5928_p1, %p5927_p0 }
0x1c88   : > { %v5011_v19 = vmul.f32 %v5010_v18, %v5005_v16 }
0x1c89   : > { %p5930_p3 = pnand %p5929_p2, %p5925_p13 }
0x1c8a   : > { %v5012_v22 = vadd.f32 %v5011_v19, %v5005_v16 }
0x1c8c   : > { %v5013_v21 = vmul.f32 0.7978846, %v5012_v22 }
0x1c8e   : > { %5894 = vtanh.f32 %v5013_v21 }
0x1c94   : > { %v5895_v14 = vpop.eup %5894 }
0x1c95   : > { %v5015_v6 = vadd.f32 1.0, %v5895_v14 }
0x1c97   : > { %v5016_v26 = vmul.f32 %v5015_v6, %v5008_v24 }
0x1cf6   : > { %v5019_v27 = vpop.permute.xlu1 %5018 }
0x1cf7   : > { %v5021_v28 = vmul.f32 %v5019_v27, %v5016_v26 }
0x1cf9   : > { %5706 = vmatmul.msk.f32.vlgmr.msra.gmra.mxu2 %vm1131_vm11, %v5021_v28 }
0x1d7c   : > { %v5042_v20 = vpop.f32.mrf.mxu2 }
0x1d7d   : > { %v5045_v29 = vadd.f32 %v5042_v20, %v4947_v53 }
0x1d7f   : > { %v5048_v30 = vmul.f32 %v5045_v29, %v5045_v29 }
0x1d81   : > { %v5049_v32 = vsel %vm341_vm0, %v5048_v30, 0.0 }
0x1d82   : > { %5050 = vadd.xlane.f32.xlu0 %v5049_v32 }
0x1df5   : > { %v5051_v38 = vpop.xlane.xlu0 %5050 }
0x1df6   : > { %v5052_v39 = vmul.f32 %v5051_v38, %v6147_v31 }
0x1df8   : > { %v5053_v40 = vadd.f32 1e-06, %v5052_v39 }
0x1dfa   : > { %5896 = vrsqrt.f32 %v5053_v40  ;;  %vm5060_vm14 = vweird.f32 %v5053_v40 }
0x1e00   : > { %v5897_v41 = vpop.eup %5896 }
0x1e01   : > { %v5055_v42 = vmul.f32 %v5897_v41, %v5053_v40  ;;  %vm5061_vm11 = vweird.f32 %v5897_v41 }
0x1e02   : > { %vm5062_vm15 = vmor %vm5060_vm14, %vm5061_vm11 }
0x1e03   : > { %v5056_v43 = vmul.f32 %v5897_v41, %v5055_v42 }
0x1e05   : > { %v5057_v44 = vmul.f32 0.5, %v5056_v43 }
0x1e07   : > { %v5058_v45 = vsub.f32 1.5, %v5057_v44 }
0x1e09   : > { %v5059_v46 = vmul.f32 %v5897_v41, %v5058_v45 }
0x1e0b   : > { %v5063_v49 = vsel %vm5062_vm15, %v5897_v41, %v5059_v46 }
0x1e0c   : > { %v5064_v5 = vmul.f32 %v5063_v49, %v5045_v29 }
0x1e0e   : > { %v5068_v31 = vmul.f32 %v5767_v47, %v5064_v5 }
0x1e10   : > { %5708 = vmatmul.msk.f32.vlgmr.msrb.gmra.mxu3 %vm341_vm0, %v5068_v31 }
0x1e93   : > { %v5093_v50 = vpop.f32.mrf.mxu3 }
0x1e94   : > { %5096 = vst [vmem:[%s313_s24] sm:$0xff] %v5093_v50 }
0x1e95   : > { %5933 = shalt.err (!%p5930_p3)
}
0x1e96   : > { %5715 = dma.vmem_to_hbm [thread:$0]  (%p6055_p5), %s5111_s13, 128, %s5113_s18, %s5098_s19  }
0x1e97 PF: > { %p5721_p4 = scmp.ge.s32.totalorder %s5968_s30, 2  ;;  %s5124_s17 = sand.u32 1, %s5956_s27  }
0x1e98   : > { %s5125_s10 = scalar_lea.sflag [#allocation3], %s5124_s17 }
0x1e99   : > { %p5718_p7 = pnand %p5721_p4, %p6059_p6 }
0x1e9b   : > { %p5719_p8 = pneg %p5718_p7 }
0x1e9d   : > { %5951 = dma.done.wait (%p5719_p8), %s5125_s10, 128  }
0x1e9e   : > { %5953 = vsyncadd (%p5719_p8), %s5125_s10, 4294967168  ;;  %p18_p9 = scmp.ge.s32.totalorder %s6042_s11, 4   ;;  %s7706_s27 = smov %s5960_s28 }
0x1e9f   : > { %s7707_s28 = smov %s5964_s29  ;;  %s7708_s29 = smov %s6053_s14 }
0x1ea0   : > { %s7709_s30 = smov %s6042_s11  ;;  %20 = sbr.rel (!%p18_p9) target bundleno = 3 (0x3), region = 130 }
0x1ea5   :  { %5131 = vsyncpa [#allocation3], 1 }
0x1ea6   :  { %5133 = vsyncpa [#allocation3 + $0x1], 1 }

</bundles_post_ra>
